<compile_context>
chip_gen: v6e
topology: v6e:2x2x1
jax: 0.10.0
libtpu: 0.0.40
codegen_flags: <defaults>
</compile_context>

<pallas_src>
import functools
import math

import jax
import jax.numpy as jnp
from jax.experimental import pallas as pl
from jax.experimental.pallas import tpu as pltpu

BN_EPS = 1e-5
LANE = 128
VMEM_LIMIT = 48 * 1024 * 1024  # <= physical VMEM on v5e/v6e/v7x


def _round_up(x, m):
    return ((x + m - 1) // m) * m


def _pick_tile(n, candidates):
    for c in candidates:
        if n % c == 0:
            return c
    return None


# ----------------------------------------------------------------------------
# Pallas kernels
# ----------------------------------------------------------------------------
def _mm_bias_kernel(x_ref, w_ref, b_ref, o_ref, acc_ref, *, relu):
    """(TM,TK)@(TK,TN) bf16 MXU matmul, f32 accumulation over the K grid axis,
    bias (+ optional ReLU) epilogue on the last K step."""
    @pl.when(pl.program_id(2) == 0)
    def _():
        acc_ref[...] = jnp.zeros_like(acc_ref)

    acc_ref[...] += jnp.dot(x_ref[...], w_ref[...],
                            preferred_element_type=jnp.float32)

    @pl.when(pl.program_id(2) == pl.num_programs(2) - 1)
    def _():
        y = acc_ref[...] + b_ref[...]
        if relu:
            y = jnp.maximum(y, 0.0)
        o_ref[...] = y.astype(o_ref.dtype)


def _conv3x3_kernel(x_ref, w_ref, b_ref, o_ref, acc_ref, *, r_out, wp):
    """Fused 3x3 conv (stride 1, pad 1) + folded-BN bias + ReLU.

    x_ref  : (1, R, Cin_p) bf16, R = (r_out+2)*wp + 16 flattened padded rows
             (r_out output image rows plus a 2-image-row halo).
    w_ref  : (3, 3*Cin_p, Cout_p) bf16 -- the 3 kx taps of each ky fused on K.
    b_ref  : (1, Cout_p) f32.
    o_ref  : (1, r_out*wp, Cout_p) bf16.
    acc_ref: (r_out*wp, Cout_p) f32 VMEM scratch accumulator.
    """
    m = r_out * wp
    rows = (r_out + 2) * wp
    # kx = 0/1/2 shifted views (shift by 1/2 flattened rows), fused along the
    # lane axis so each matmul sees K = 3*Cin_p.
    s0 = x_ref[0, 0:rows, :]
    s1 = x_ref[0, 1:rows + 1, :]
    s2 = x_ref[0, 2:rows + 2, :]
    # TODO(synk): pltpu.roll along sublanes is the XLU-native form of the +/-1
    # column shifts; static slices are used here for lowering robustness.
    xcat = jnp.concatenate([s0, s1, s2], axis=-1)          # (rows, 3*Cin_p)
    for ky in range(3):
        lhs = xcat[ky * wp:ky * wp + m, :]                 # 16-aligned slice
        d = jnp.dot(lhs, w_ref[ky], preferred_element_type=jnp.float32)
        if ky == 0:
            acc_ref[...] = d
        else:
            acc_ref[...] += d
    y = jnp.maximum(acc_ref[...] + b_ref[...], 0.0)
    o_ref[0] = y.astype(o_ref.dtype)


def _affine_kernel(x_ref, s_ref, b_ref, o_ref):
    """Per-channel affine (inference BatchNorm, no ReLU) computed in f32."""
    o_ref[...] = x_ref[...].astype(jnp.float32) * s_ref[...] + b_ref[...]


# ----------------------------------------------------------------------------
# Pallas wrappers
# ----------------------------------------------------------------------------
def matmul_bias_pallas(x2, wmat, bias, *, relu, out_dtype=jnp.bfloat16):
    """relu_opt(x2 @ wmat + bias); wmat (Kp,Np) / bias (1,Np) are pre-padded."""
    M, K = x2.shape
    Kp, Np = wmat.shape
    assert K <= Kp, (K, Kp)

    x2 = x2.astype(jnp.bfloat16)
    TM = _pick_tile(M, (1024, 512, 256, 128))
    if TM is None:
        TM = _round_up(M, 8) if M <= 1024 else 512
    Mp = _round_up(M, TM)
    if Mp != M or Kp != K:
        x2 = jnp.pad(x2, ((0, Mp - M), (0, Kp - K)))

    TN = _pick_tile(Np, (512, 256, 128))
    TK = _pick_tile(Kp, (512, 256, 128))
    grid = (Mp // TM, Np // TN, Kp // TK)

    out = pl.pallas_call(
        functools.partial(_mm_bias_kernel, relu=relu),
        out_shape=jax.ShapeDtypeStruct((Mp, Np), out_dtype),
        grid_spec=pltpu.PrefetchScalarGridSpec(
            num_scalar_prefetch=0,
            grid=grid,
            in_specs=[
                pl.BlockSpec((TM, TK), lambda i, j, k: (i, k)),
                pl.BlockSpec((TK, TN), lambda i, j, k: (k, j)),
                pl.BlockSpec((1, TN), lambda i, j, k: (0, j)),
            ],
            out_specs=pl.BlockSpec((TM, TN), lambda i, j, k: (i, j)),
            scratch_shapes=[pltpu.VMEM((TM, TN), jnp.float32)],
        ),
        compiler_params=pltpu.CompilerParams(
            dimension_semantics=("parallel", "parallel", "arbitrary"),
            vmem_limit_bytes=VMEM_LIMIT),
    )(x2, wmat, bias)
    return out[:M] if Mp != M else out


def conv1x1_bn_relu(x, conv, *, relu=True):
    """1x1 Conv2d(bias=False) -> folded BN -> optional ReLU (pure matmul).

    Output keeps its 128-lane-padded channel slab; pad lanes are exact zeros
    (weight columns / bias lanes beyond `cout` are zero and relu(0) = 0)."""
    N, H, W, C = x.shape
    y = matmul_bias_pallas(x.reshape(N * H * W, C), conv["w"], conv["b"],
                           relu=relu)
    return y.reshape(N, H, W, y.shape[-1])


def conv3x3_bn_relu(x, conv):
    """3x3 Conv2d(stride=1, pad=1, bias=False) -> folded BN -> ReLU, fused.

    x: (N, H, W, Cin_p) bf16, channel-padded.  Returns (N, H, W, Cout_p) bf16
    (channel-padded, pad lanes exact zeros).  No HBM im2col: each row tile is
    staged once (with a 2-image-row halo) and the kernel does 3 fused matmuls.
    """
    w3, bias = conv["w3"], conv["b"]
    N, H, W, cin_p = x.shape
    assert w3.shape[1] == 3 * cin_p, (w3.shape, cin_p)
    cout_p = w3.shape[-1]

    wp = _round_up(W + 2, 16)               # padded width (sublane aligned)
    r_out = max(1, min(H, 2048 // wp))      # output image rows per tile
    nt = -(-H // r_out)                     # row tiles per image
    m = r_out * wp                          # matmul M per tile
    R = (r_out + 2) * wp + 16               # staged rows per tile (w/ halo)

    # Spatial zero-pad (1 top row, 1 left col, rest to reach the tiled extent),
    # flatten rows, stage overlapping row tiles (2-image-row halo each).
    rows_total = nt * r_out + 3
    xp = jnp.pad(x, ((0, 0), (1, rows_total - 1 - H), (1, wp - W - 1), (0, 0)))
    flat = xp.reshape(N, rows_total * wp, cin_p)
    tiles = [flat[:, i * m:i * m + R, :] for i in range(nt)]
    staged = jnp.stack(tiles, axis=1).reshape(N * nt, R, cin_p)

    out = pl.pallas_call(
        functools.partial(_conv3x3_kernel, r_out=r_out, wp=wp),
        out_shape=jax.ShapeDtypeStruct((N * nt, m, cout_p), jnp.bfloat16),
        grid_spec=pltpu.PrefetchScalarGridSpec(
            num_scalar_prefetch=0,
            grid=(N * nt,),
            in_specs=[
                pl.BlockSpec((1, R, cin_p), lambda g: (g, 0, 0)),
                pl.BlockSpec(w3.shape, lambda g: (0, 0, 0)),
                pl.BlockSpec((1, cout_p), lambda g: (0, 0)),
            ],
            out_specs=pl.BlockSpec((1, m, cout_p), lambda g: (g, 0, 0)),
            scratch_shapes=[pltpu.VMEM((m, cout_p), jnp.float32)],
        ),
        compiler_params=pltpu.CompilerParams(
            dimension_semantics=("parallel",),
            vmem_limit_bytes=VMEM_LIMIT),
    )(staged, w3, bias)

    out = out.reshape(N, nt * r_out, wp, cout_p)
    return out[:, :H, :W, :]


def affine_pallas(x2, scale_p, bias_p, c_real):
    """x2 * scale + bias (per-channel); x2 is (M, Cp) channel-padded."""
    M, Cp = x2.shape
    assert scale_p.shape == (1, Cp)
    TM = _pick_tile(M, (1024, 512, 256, 128))
    if TM is None:
        TM = _round_up(M, 8) if M <= 1024 else 512
    Mp = _round_up(M, TM)
    xp = jnp.pad(x2, ((0, Mp - M), (0, 0))) if Mp != M else x2

    out = pl.pallas_call(
        _affine_kernel,
        out_shape=jax.ShapeDtypeStruct((Mp, Cp), jnp.float32),
        grid_spec=pltpu.PrefetchScalarGridSpec(
            num_scalar_prefetch=0,
            grid=(Mp // TM,),
            in_specs=[
                pl.BlockSpec((TM, Cp), lambda i: (i, 0)),
                pl.BlockSpec((1, Cp), lambda i: (0, 0)),
                pl.BlockSpec((1, Cp), lambda i: (0, 0)),
            ],
            out_specs=pl.BlockSpec((TM, Cp), lambda i: (i, 0)),
        ),
        compiler_params=pltpu.CompilerParams(
            dimension_semantics=("parallel",),
            vmem_limit_bytes=VMEM_LIMIT),
    )(xp, scale_p, bias_p)
    return out[:M, :c_real]


# ----------------------------------------------------------------------------
# Stem im2col (7x7, Cin=1 only -> cheap) and pooling glue
# ----------------------------------------------------------------------------
def _im2col(x, kh, kw, stride, pad):
    # x: NHWC
    N, H, W, C = x.shape
    xp = jnp.pad(x, ((0, 0), (pad, pad), (pad, pad), (0, 0)))
    OH = (H + 2 * pad - kh) // stride + 1
    OW = (W + 2 * pad - kw) // stride + 1
    cols = []
    for i in range(kh):
        for j in range(kw):
            cols.append(xp[:, i:i + stride * OH:stride,
                           j:j + stride * OW:stride, :])
    p = jnp.stack(cols, axis=3)                 # (N, OH, OW, kh*kw, C)
    return p.reshape(N * OH * OW, kh * kw * C), OH, OW


def pool2d(x, mode):
    """2x2, stride 2, ceil_mode=True pooling (PyTorch semantics), NHWC, bf16.

    TODO(synk): not fused into the producing Pallas kernel (plain-XLA glue)."""
    N, H, W, C = x.shape
    OH, OW = -(-H // 2), -(-W // 2)
    ph, pw = 2 * OH - H, 2 * OW - W
    if mode == "max":
        xp = jnp.pad(x, ((0, 0), (0, ph), (0, pw), (0, 0)),
                     constant_values=-jnp.inf)
        return jnp.max(xp.reshape(N, OH, 2, OW, 2, C), axis=(2, 4))
    # avg: divisor counts only in-bounds elements (PyTorch ceil_mode clipping)
    xp = jnp.pad(x, ((0, 0), (0, ph), (0, pw), (0, 0)))
    s = jnp.sum(xp.reshape(N, OH, 2, OW, 2, C).astype(jnp.float32), axis=(2, 4))
    rows = jnp.minimum(jnp.arange(OH) * 2 + 2, H) - jnp.arange(OH) * 2
    cols = jnp.minimum(jnp.arange(OW) * 2 + 2, W) - jnp.arange(OW) * 2
    cnt = (rows[:, None] * cols[None, :]).astype(jnp.float32)
    return (s / cnt[None, :, :, None]).astype(x.dtype)


# ----------------------------------------------------------------------------
# Parameter initialization + packing (deterministic, synthetic)
# ----------------------------------------------------------------------------
def _key_iter(key):
    while True:
        key, sub = jax.random.split(key)
        yield sub


def _conv_init(key, cout, cin, kh, kw):
    return 0.1 * jax.random.normal(key, (cout, cin, kh, kw), jnp.float32)


def _bn_init(key, c):
    k1, k2, k3, k4 = jax.random.split(key, 4)
    gamma = 1.0 + 0.1 * jax.random.normal(k1, (c,), jnp.float32)
    beta = 0.1 * jax.random.normal(k2, (c,), jnp.float32)
    mean = 0.1 * jax.random.normal(k3, (c,), jnp.float32)
    var = 1.0 + 0.1 * jax.random.uniform(k4, (c,), jnp.float32)
    scale = gamma / jnp.sqrt(var + BN_EPS)
    bias = beta - mean * scale
    return scale, bias


def _pack_matmul_weight(w_oihw, scale, bias):
    """(O,I,KH,KW) conv weight -> padded bf16 (Kp, Np) matmul weight with BN
    scale folded into the columns, plus padded f32 bias (1, Np).  Pad rows /
    columns / bias lanes are exact zeros (relied upon for channel-padded
    activations downstream)."""
    cout, cin, kh, kw = w_oihw.shape
    k = kh * kw * cin
    wm = jnp.transpose(w_oihw, (2, 3, 1, 0)).reshape(k, cout) * scale[None, :]
    kp, np_ = _round_up(k, LANE), _round_up(cout, LANE)
    wm = jnp.pad(wm, ((0, kp - k), (0, np_ - cout))).astype(jnp.bfloat16)
    b = jnp.pad(bias, (0, np_ - cout)).reshape(1, np_).astype(jnp.float32)
    return {"w": wm, "b": b, "cout": cout}


def _pack_conv3x3(w_oihw, scale, bias):
    """(O,I,3,3) conv weight -> bf16 (3, 3*Cin_p, Cout_p) with the 3 kx taps of
    each ky fused along K (BN folded), plus padded f32 bias (1, Cout_p)."""
    cout, cin, _, _ = w_oihw.shape
    cin_p, cout_p = _round_up(cin, LANE), _round_up(cout, LANE)
    a = jnp.transpose(w_oihw, (2, 3, 1, 0)) * scale[None, None, None, :]
    a = jnp.pad(a, ((0, 0), (0, 0), (0, cin_p - cin), (0, cout_p - cout)))
    w3 = a.reshape(3, 3 * cin_p, cout_p).astype(jnp.bfloat16)
    b = jnp.pad(bias, (0, cout_p - cout)).reshape(1, cout_p).astype(jnp.float32)
    return {"w3": w3, "b": b, "cout": cout}


def _make_dense_params(ki, n_channels, growth_rate, n_layers):
    layers = []
    c = n_channels
    inter = 4 * growth_rate
    for _ in range(n_layers):
        s1, b1 = _bn_init(next(ki), inter)
        s2, b2 = _bn_init(next(ki), growth_rate)
        w1 = _conv_init(next(ki), inter, c, 1, 1)
        w2 = _conv_init(next(ki), growth_rate, inter, 3, 3)
        layers.append({
            "conv1": _pack_matmul_weight(w1, s1, b1),
            "conv2": _pack_conv3x3(w2, s2, b2),
        })
        c += growth_rate
    return layers, c


def _make_trans_params(ki, n_in, n_out):
    s, b = _bn_init(next(ki), n_out)
    w = _conv_init(next(ki), n_out, n_in, 1, 1)
    return _pack_matmul_weight(w, s, b)


def init_densenet(key, growth_rate, num_layers, reduction=0.5):
    ki = _key_iter(key)
    params = {}
    n_channels = 2 * growth_rate

    conv1_w = _conv_init(next(ki), n_channels, 1, 7, 7)
    s, b = _bn_init(next(ki), n_channels)
    params["stem"] = _pack_matmul_weight(conv1_w, s, b)

    params["dense1"], n_channels = _make_dense_params(
        ki, n_channels, growth_rate, num_layers)
    n_out = int(math.floor(n_channels * reduction))
    params["trans1"] = _make_trans_params(ki, n_channels, n_out)
    n_channels = n_out

    params["dense2"], n_channels = _make_dense_params(
        ki, n_channels, growth_rate, num_layers)
    n_out = int(math.floor(n_channels * reduction))
    params["trans2"] = _make_trans_params(ki, n_channels, n_out)
    n_channels = n_out

    params["dense3"], n_channels = _make_dense_params(
        ki, n_channels, growth_rate, num_layers)

    s, b = _bn_init(next(ki), n_channels)
    cp = _round_up(n_channels, LANE)
    params["post"] = {
        "s": jnp.pad(s, (0, cp - n_channels)).reshape(1, cp).astype(jnp.float32),
        "b": jnp.pad(b, (0, cp - n_channels)).reshape(1, cp).astype(jnp.float32),
        "c": n_channels,
    }
    params["out_channels"] = n_channels
    return params


# ----------------------------------------------------------------------------
# Forward pass
# ----------------------------------------------------------------------------
def _dense_block_fwd(x, c_real, layers):
    """x: (N,H,W,Cp) bf16 channel-padded slab with real channels [0:c_real]."""
    for lyr in layers:
        inter = conv1x1_bn_relu(x, lyr["conv1"])          # padded 4g slab
        new = conv3x3_bn_relu(inter, lyr["conv2"])        # padded g slab
        g = lyr["conv2"]["cout"]
        c_new = c_real + g
        cp_new = _round_up(c_new, LANE)
        # DenseNet concat, written directly at the next consumer's padded
        # width, so no extra jnp.pad round trip before the next 1x1 conv.
        # TODO(synk): a fully fused variant would K-split the next 1x1 conv
        # over [x, new] / write `new` in place via input_output_aliases.
        parts = [x[..., :c_real], new[..., :g]]
        if cp_new > c_new:
            parts.append(jnp.zeros(x.shape[:-1] + (cp_new - c_new,), x.dtype))
        x = jnp.concatenate(parts, axis=-1)
        c_real = c_new
    return x, c_real


def _transition_fwd(x, tr):
    y = conv1x1_bn_relu(x, tr)          # keeps 128-padded channel slab
    # TODO(synk): avg-pool is plain-XLA glue (bf16), not fused into the conv.
    return pool2d(y, "avg")


def densenet_forward(params, x_nchw, x_mask):
    x = jnp.transpose(x_nchw, (0, 2, 3, 1)).astype(jnp.float32)   # -> NHWC
    N = x.shape[0]

    # stem: conv7x7(s2,p3) -> BN -> ReLU (fused matmul), then 2x2 maxpool.
    # TODO(synk): the 7x7/Cin=1 stem still uses a small XLA im2col.
    st = params["stem"]
    patches, OH, OW = _im2col(x, 7, 7, 2, 3)
    y = matmul_bias_pallas(patches, st["w"], st["b"], relu=True)
    out = y.reshape(N, OH, OW, y.shape[-1])      # keep 128-padded channels
    c_real = st["cout"]
    out_mask = x_mask[:, 0::2, 0::2]
    out = pool2d(out, "max")
    out_mask = out_mask[:, 0::2, 0::2]

    out, c_real = _dense_block_fwd(out, c_real, params["dense1"])
    out = _transition_fwd(out, params["trans1"])
    c_real = params["trans1"]["cout"]
    out_mask = out_mask[:, 0::2, 0::2]

    out, c_real = _dense_block_fwd(out, c_real, params["dense2"])
    out = _transition_fwd(out, params["trans2"])
    c_real = params["trans2"]["cout"]
    out_mask = out_mask[:, 0::2, 0::2]

    out, c_real = _dense_block_fwd(out, c_real, params["dense3"])

    # post_norm: BatchNorm only (no ReLU) -- Pallas affine kernel, f32 output.
    Nb, Hh, Ww, Cp = out.shape
    post = params["post"]
    out = affine_pallas(out.reshape(Nb * Hh * Ww, Cp), post["s"], post["b"],
                        post["c"]).reshape(Nb, Hh, Ww, post["c"])

    return jnp.transpose(out, (0, 3, 1, 2)), out_mask   # -> NCHW, mask


# ----------------------------------------------------------------------------
if __name__ == "__main__":
    key = jax.random.PRNGKey(0)
    k_params, k_x, k_mask = jax.random.split(key, 3)

    growth_rate, num_layers = 4, 2
    params = init_densenet(k_params, growth_rate, num_layers)

    B, H, W = 2, 32, 32
    x = jax.random.normal(k_x, (B, 1, H, W), jnp.float32)       # NCHW like PyTorch
    x_mask = jax.random.bernoulli(k_mask, 0.9, (B, H, W))

    fwd = jax.jit(lambda xi, mi: densenet_forward(params, xi, mi))
    out, out_mask = fwd(x, x_mask)
    out = jax.block_until_ready(out)
    out_mask = jax.block_until_ready(out_mask)

    expected_c = params["out_channels"]                          # 16 for (g=4, L=2)
    assert out.shape == (B, expected_c, 2, 2), out.shape
    assert out_mask.shape == (B, 2, 2), out_mask.shape
    assert bool(jnp.all(jnp.isfinite(out)))
    print("KERNEL_OK")
</pallas_src>

<mosaic_0001>
module attributes {stable_mosaic.version = 11 : i64} {
  func.func @_mm_bias_kernel(%arg0: i32, %arg1: i32, %arg2: i32, %arg3: memref<512x128xbf16, #tpu.memory_space<vmem>>, %arg4: memref<128x128xbf16, #tpu.memory_space<vmem>>, %arg5: memref<1x128xf32, #tpu.memory_space<vmem>>, %arg6: memref<512x128xbf16, #tpu.memory_space<vmem>>, %arg7: memref<512x128xf32, #tpu.memory_space<vmem>>) attributes {dimension_semantics = [#tpu.dimension_semantics<parallel>, #tpu.dimension_semantics<parallel>, #tpu.dimension_semantics<arbitrary>], iteration_bounds = array<i64: 1, 1, 1>, scalar_prefetch = 0 : i64, scratch_operands = 1 : i64, tpu.core_type = #tpu.core_type<tc>, window_params = [{transform_indices = @transform_0, window_bounds = array<i64: 512, 128>}, {transform_indices = @transform_1, window_bounds = array<i64: 128, 128>}, {transform_indices = @transform_2, window_bounds = array<i64: 1, 128>}, {transform_indices = @transform_3, window_bounds = array<i64: 512, 128>}]} {
    %c0_i32 = arith.constant 0 : i32
    %0 = arith.cmpi eq, %arg2, %c0_i32 : i32
    %1 = arith.extui %0 : i1 to i32
    %c0_i32_0 = arith.constant 0 : i32
    %2 = arith.cmpi ne, %1, %c0_i32_0 : i32
    scf.if %2 {
      %cst_10 = arith.constant 0.000000e+00 : f32
      %12 = vector.broadcast %cst_10 : f32 to vector<512x128xf32>
      %c0_11 = arith.constant 0 : index
      %c0_12 = arith.constant 0 : index
      %13 = vector.load %arg7[%c0_11, %c0_12] : memref<512x128xf32, #tpu.memory_space<vmem>>, vector<512x128xf32>
      tpu.vector_store %arg7[%c0_11, %c0_12], %12 {strides = array<i32>} : memref<512x128xf32, #tpu.memory_space<vmem>>, vector<512x128xf32>,
    } else {
    }
    %c0 = arith.constant 0 : index
    %c0_1 = arith.constant 0 : index
    %3 = vector.load %arg7[%c0, %c0_1] : memref<512x128xf32, #tpu.memory_space<vmem>>, vector<512x128xf32>
    %c0_2 = arith.constant 0 : index
    %c0_3 = arith.constant 0 : index
    %4 = vector.load %arg3[%c0_2, %c0_3] : memref<512x128xbf16, #tpu.memory_space<vmem>>, vector<512x128xbf16>
    %c0_4 = arith.constant 0 : index
    %c0_5 = arith.constant 0 : index
    %5 = vector.load %arg4[%c0_4, %c0_5] : memref<128x128xbf16, #tpu.memory_space<vmem>>, vector<128x128xbf16>
    %cst = arith.constant dense<0.000000e+00> : vector<512x128xf32>
    %6 = tpu.matmul %4, %5, %cst {dimension_numbers = #tpu.dot_dimension_numbers<[1], [0], [0], [1], [0, 0, 1, 1], [], []>} : vector<512x128xbf16>, vector<128x128xbf16>, vector<512x128xf32> -> vector<512x128xf32>
    %7 = arith.addf %3, %6 : vector<512x128xf32>
    %c0_6 = arith.constant 0 : index
    %c0_7 = arith.constant 0 : index
    %8 = vector.load %arg7[%c0_6, %c0_7] : memref<512x128xf32, #tpu.memory_space<vmem>>, vector<512x128xf32>
    tpu.vector_store %arg7[%c0_6, %c0_7], %7 {strides = array<i32>} : memref<512x128xf32, #tpu.memory_space<vmem>>, vector<512x128xf32>,
    %c0_i32_8 = arith.constant 0 : i32
    %9 = arith.cmpi eq, %arg2, %c0_i32_8 : i32
    %10 = arith.extui %9 : i1 to i32
    %c0_i32_9 = arith.constant 0 : i32
    %11 = arith.cmpi ne, %10, %c0_i32_9 : i32
    scf.if %11 {
      %c0_10 = arith.constant 0 : index
      %c0_11 = arith.constant 0 : index
      %12 = vector.load %arg7[%c0_10, %c0_11] : memref<512x128xf32, #tpu.memory_space<vmem>>, vector<512x128xf32>
      %c0_12 = arith.constant 0 : index
      %c0_13 = arith.constant 0 : index
      %13 = vector.load %arg5[%c0_12, %c0_13] : memref<1x128xf32, #tpu.memory_space<vmem>>, vector<1x128xf32>
      %14 = vector.broadcast %13 : vector<1x128xf32> to vector<512x128xf32>
      %15 = arith.addf %12, %14 : vector<512x128xf32>
      %cst_14 = arith.constant 0.000000e+00 : f32
      %16 = vector.broadcast %cst_14 : f32 to vector<512x128xf32>
      %17 = arith.maximumf %15, %16 : vector<512x128xf32>
      %18 = arith.truncf %17 : vector<512x128xf32> to vector<512x128xbf16>
      %c0_15 = arith.constant 0 : index
      %c0_16 = arith.constant 0 : index
      %19 = vector.load %arg6[%c0_15, %c0_16] : memref<512x128xbf16, #tpu.memory_space<vmem>>, vector<512x128xbf16>
      tpu.vector_store %arg6[%c0_15, %c0_16], %18 {strides = array<i32>} : memref<512x128xbf16, #tpu.memory_space<vmem>>, vector<512x128xbf16>,
    } else {
    }
    return
  }
  func.func @transform_0(%arg0: i32, %arg1: i32, %arg2: i32) -> (i32, i32) {
    %c0_i32 = arith.constant 0 : i32
    return %arg0, %arg2 : i32, i32
  }
  func.func @transform_1(%arg0: i32, %arg1: i32, %arg2: i32) -> (i32, i32) {
    %c0_i32 = arith.constant 0 : i32
    return %arg2, %arg1 : i32, i32
  }
  func.func @transform_2(%arg0: i32, %arg1: i32, %arg2: i32) -> (i32, i32) {
    %c0_i32 = arith.constant 0 : i32
    %c0_i32_0 = arith.constant 0 : i32
    return %c0_i32, %arg1 : i32, i32
  }
  func.func @transform_3(%arg0: i32, %arg1: i32, %arg2: i32) -> (i32, i32) {
    %c0_i32 = arith.constant 0 : i32
    return %arg0, %arg1 : i32, i32
  }
}

module attributes {stable_mosaic.version = 11 : i64} {
  func.func @_mm_bias_kernel(%arg0: i32, %arg1: i32, %arg2: i32, %arg3: memref<128x128xbf16, #tpu.memory_space<vmem>>, %arg4: memref<128x128xbf16, #tpu.memory_space<vmem>>, %arg5: memref<1x128xf32, #tpu.memory_space<vmem>>, %arg6: memref<128x128xbf16, #tpu.memory_space<vmem>>, %arg7: memref<128x128xf32, #tpu.memory_space<vmem>>) attributes {dimension_semantics = [#tpu.dimension_semantics<parallel>, #tpu.dimension_semantics<parallel>, #tpu.dimension_semantics<arbitrary>], iteration_bounds = array<i64: 1, 1, 1>, scalar_prefetch = 0 : i64, scratch_operands = 1 : i64, tpu.core_type = #tpu.core_type<tc>, window_params = [{transform_indices = @transform_0, window_bounds = array<i64: 128, 128>}, {transform_indices = @transform_1, window_bounds = array<i64: 128, 128>}, {transform_indices = @transform_2, window_bounds = array<i64: 1, 128>}, {transform_indices = @transform_3, window_bounds = array<i64: 128, 128>}]} {
    %c0_i32 = arith.constant 0 : i32
    %0 = arith.cmpi eq, %arg2, %c0_i32 : i32
    %1 = arith.extui %0 : i1 to i32
    %c0_i32_0 = arith.constant 0 : i32
    %2 = arith.cmpi ne, %1, %c0_i32_0 : i32
    scf.if %2 {
      %cst_10 = arith.constant 0.000000e+00 : f32
      %12 = vector.broadcast %cst_10 : f32 to vector<128x128xf32>
      %c0_11 = arith.constant 0 : index
      %c0_12 = arith.constant 0 : index
      %13 = vector.load %arg7[%c0_11, %c0_12] : memref<128x128xf32, #tpu.memory_space<vmem>>, vector<128x128xf32>
      tpu.vector_store %arg7[%c0_11, %c0_12], %12 {strides = array<i32>} : memref<128x128xf32, #tpu.memory_space<vmem>>, vector<128x128xf32>,
    } else {
    }
    %c0 = arith.constant 0 : index
    %c0_1 = arith.constant 0 : index
    %3 = vector.load %arg7[%c0, %c0_1] : memref<128x128xf32, #tpu.memory_space<vmem>>, vector<128x128xf32>
    %c0_2 = arith.constant 0 : index
    %c0_3 = arith.constant 0 : index
    %4 = vector.load %arg3[%c0_2, %c0_3] : memref<128x128xbf16, #tpu.memory_space<vmem>>, vector<128x128xbf16>
    %c0_4 = arith.constant 0 : index
    %c0_5 = arith.constant 0 : index
    %5 = vector.load %arg4[%c0_4, %c0_5] : memref<128x128xbf16, #tpu.memory_space<vmem>>, vector<128x128xbf16>
    %cst = arith.constant dense<0.000000e+00> : vector<128x128xf32>
    %6 = tpu.matmul %4, %5, %cst {dimension_numbers = #tpu.dot_dimension_numbers<[1], [0], [0], [1], [0, 0, 1, 1], [], []>} : vector<128x128xbf16>, vector<128x128xbf16>, vector<128x128xf32> -> vector<128x128xf32>
    %7 = arith.addf %3, %6 : vector<128x128xf32>
    %c0_6 = arith.constant 0 : index
    %c0_7 = arith.constant 0 : index
    %8 = vector.load %arg7[%c0_6, %c0_7] : memref<128x128xf32, #tpu.memory_space<vmem>>, vector<128x128xf32>
    tpu.vector_store %arg7[%c0_6, %c0_7], %7 {strides = array<i32>} : memref<128x128xf32, #tpu.memory_space<vmem>>, vector<128x128xf32>,
    %c0_i32_8 = arith.constant 0 : i32
    %9 = arith.cmpi eq, %arg2, %c0_i32_8 : i32
    %10 = arith.extui %9 : i1 to i32
    %c0_i32_9 = arith.constant 0 : i32
    %11 = arith.cmpi ne, %10, %c0_i32_9 : i32
    scf.if %11 {
      %c0_10 = arith.constant 0 : index
      %c0_11 = arith.constant 0 : index
      %12 = vector.load %arg7[%c0_10, %c0_11] : memref<128x128xf32, #tpu.memory_space<vmem>>, vector<128x128xf32>
      %c0_12 = arith.constant 0 : index
      %c0_13 = arith.constant 0 : index
      %13 = vector.load %arg5[%c0_12, %c0_13] : memref<1x128xf32, #tpu.memory_space<vmem>>, vector<1x128xf32>
      %14 = vector.broadcast %13 : vector<1x128xf32> to vector<128x128xf32>
      %15 = arith.addf %12, %14 : vector<128x128xf32>
      %cst_14 = arith.constant 0.000000e+00 : f32
      %16 = vector.broadcast %cst_14 : f32 to vector<128x128xf32>
      %17 = arith.maximumf %15, %16 : vector<128x128xf32>
      %18 = arith.truncf %17 : vector<128x128xf32> to vector<128x128xbf16>
      %c0_15 = arith.constant 0 : index
      %c0_16 = arith.constant 0 : index
      %19 = vector.load %arg6[%c0_15, %c0_16] : memref<128x128xbf16, #tpu.memory_space<vmem>>, vector<128x128xbf16>
      tpu.vector_store %arg6[%c0_15, %c0_16], %18 {strides = array<i32>} : memref<128x128xbf16, #tpu.memory_space<vmem>>, vector<128x128xbf16>,
    } else {
    }
    return
  }
  func.func @transform_0(%arg0: i32, %arg1: i32, %arg2: i32) -> (i32, i32) {
    %c0_i32 = arith.constant 0 : i32
    return %arg0, %arg2 : i32, i32
  }
  func.func @transform_1(%arg0: i32, %arg1: i32, %arg2: i32) -> (i32, i32) {
    %c0_i32 = arith.constant 0 : i32
    return %arg2, %arg1 : i32, i32
  }
  func.func @transform_2(%arg0: i32, %arg1: i32, %arg2: i32) -> (i32, i32) {
    %c0_i32 = arith.constant 0 : i32
    %c0_i32_0 = arith.constant 0 : i32
    return %c0_i32, %arg1 : i32, i32
  }
  func.func @transform_3(%arg0: i32, %arg1: i32, %arg2: i32) -> (i32, i32) {
    %c0_i32 = arith.constant 0 : i32
    return %arg0, %arg1 : i32, i32
  }
}

module attributes {stable_mosaic.version = 11 : i64} {
  func.func @_conv3x3_kernel(%arg0: i32, %arg1: memref<1x176x128xbf16, #tpu.memory_space<vmem>>, %arg2: memref<3x384x128xbf16, #tpu.memory_space<vmem>>, %arg3: memref<1x128xf32, #tpu.memory_space<vmem>>, %arg4: memref<1x128x128xbf16, #tpu.memory_space<vmem>>, %arg5: memref<128x128xf32, #tpu.memory_space<vmem>>) attributes {dimension_semantics = [#tpu.dimension_semantics<parallel>], iteration_bounds = array<i64: 2>, scalar_prefetch = 0 : i64, scratch_operands = 1 : i64, tpu.core_type = #tpu.core_type<tc>, window_params = [{transform_indices = @transform_0, window_bounds = array<i64: 1, 176, 128>}, {pipeline_mode = #tpu.pipeline_mode<synchronous>, transform_indices = @transform_1, window_bounds = array<i64: 3, 384, 128>}, {pipeline_mode = #tpu.pipeline_mode<synchronous>, transform_indices = @transform_2, window_bounds = array<i64: 1, 128>}, {transform_indices = @transform_3, window_bounds = array<i64: 1, 128, 128>}]} {
    %c0 = arith.constant 0 : index
    %c0_0 = arith.constant 0 : index
    %c0_1 = arith.constant 0 : index
    %0 = vector.load %arg1[%c0, %c0_0, %c0_1] : memref<1x176x128xbf16, #tpu.memory_space<vmem>>, vector<1x160x128xbf16>
    %1 = vector.shape_cast %0 : vector<1x160x128xbf16> to vector<160x128xbf16>
    %c0_2 = arith.constant 0 : index
    %c1 = arith.constant 1 : index
    %c0_3 = arith.constant 0 : index
    %2 = vector.load %arg1[%c0_2, %c1, %c0_3] : memref<1x176x128xbf16, #tpu.memory_space<vmem>>, vector<1x160x128xbf16>
    %3 = vector.shape_cast %2 : vector<1x160x128xbf16> to vector<160x128xbf16>
    %c0_4 = arith.constant 0 : index
    %c2 = arith.constant 2 : index
    %c0_5 = arith.constant 0 : index
    %4 = vector.load %arg1[%c0_4, %c2, %c0_5] : memref<1x176x128xbf16, #tpu.memory_space<vmem>>, vector<1x160x128xbf16>
    %5 = vector.shape_cast %4 : vector<1x160x128xbf16> to vector<160x128xbf16>
    %6 = tpu.concatenate %1, %3, %5 in 1 : vector<160x128xbf16>, vector<160x128xbf16>, vector<160x128xbf16> -> vector<160x384xbf16>
    %7 = vector.extract_strided_slice %6 {offsets = [0, 0], sizes = [128, 384], strides = [1, 1]} : vector<160x384xbf16> to vector<128x384xbf16>
    %c0_6 = arith.constant 0 : index
    %c0_7 = arith.constant 0 : index
    %c0_8 = arith.constant 0 : index
    %8 = vector.load %arg2[%c0_6, %c0_7, %c0_8] : memref<3x384x128xbf16, #tpu.memory_space<vmem>>, vector<1x384x128xbf16>
    %9 = vector.shape_cast %8 : vector<1x384x128xbf16> to vector<384x128xbf16>
    %cst = arith.constant dense<0.000000e+00> : vector<128x128xf32>
    %10 = tpu.matmul %7, %9, %cst {dimension_numbers = #tpu.dot_dimension_numbers<[1], [0], [0], [1], [0, 0, 1, 1], [], []>} : vector<128x384xbf16>, vector<384x128xbf16>, vector<128x128xf32> -> vector<128x128xf32>
    %c0_9 = arith.constant 0 : index
    %c0_10 = arith.constant 0 : index
    %11 = vector.load %arg5[%c0_9, %c0_10] : memref<128x128xf32, #tpu.memory_space<vmem>>, vector<128x128xf32>
    tpu.vector_store %arg5[%c0_9, %c0_10], %10 {strides = array<i32>} : memref<128x128xf32, #tpu.memory_space<vmem>>, vector<128x128xf32>,
    %12 = vector.extract_strided_slice %6 {offsets = [16, 0], sizes = [128, 384], strides = [1, 1]} : vector<160x384xbf16> to vector<128x384xbf16>
    %c1_11 = arith.constant 1 : index
    %c0_12 = arith.constant 0 : index
    %c0_13 = arith.constant 0 : index
    %13 = vector.load %arg2[%c1_11, %c0_12, %c0_13] : memref<3x384x128xbf16, #tpu.memory_space<vmem>>, vector<1x384x128xbf16>
    %14 = vector.shape_cast %13 : vector<1x384x128xbf16> to vector<384x128xbf16>
    %cst_14 = arith.constant dense<0.000000e+00> : vector<128x128xf32>
    %15 = tpu.matmul %12, %14, %cst_14 {dimension_numbers = #tpu.dot_dimension_numbers<[1], [0], [0], [1], [0, 0, 1, 1], [], []>} : vector<128x384xbf16>, vector<384x128xbf16>, vector<128x128xf32> -> vector<128x128xf32>
    %c0_15 = arith.constant 0 : index
    %c0_16 = arith.constant 0 : index
    %16 = vector.load %arg5[%c0_15, %c0_16] : memref<128x128xf32, #tpu.memory_space<vmem>>, vector<128x128xf32>
    %17 = arith.addf %16, %15 : vector<128x128xf32>
    %c0_17 = arith.constant 0 : index
    %c0_18 = arith.constant 0 : index
    %18 = vector.load %arg5[%c0_17, %c0_18] : memref<128x128xf32, #tpu.memory_space<vmem>>, vector<128x128xf32>
    tpu.vector_store %arg5[%c0_17, %c0_18], %17 {strides = array<i32>} : memref<128x128xf32, #tpu.memory_space<vmem>>, vector<128x128xf32>,
    %19 = vector.extract_strided_slice %6 {offsets = [32, 0], sizes = [128, 384], strides = [1, 1]} : vector<160x384xbf16> to vector<128x384xbf16>
    %c2_19 = arith.constant 2 : index
    %c0_20 = arith.constant 0 : index
    %c0_21 = arith.constant 0 : index
    %20 = vector.load %arg2[%c2_19, %c0_20, %c0_21] : memref<3x384x128xbf16, #tpu.memory_space<vmem>>, vector<1x384x128xbf16>
    %21 = vector.shape_cast %20 : vector<1x384x128xbf16> to vector<384x128xbf16>
    %cst_22 = arith.constant dense<0.000000e+00> : vector<128x128xf32>
    %22 = tpu.matmul %19, %21, %cst_22 {dimension_numbers = #tpu.dot_dimension_numbers<[1], [0], [0], [1], [0, 0, 1, 1], [], []>} : vector<128x384xbf16>, vector<384x128xbf16>, vector<128x128xf32> -> vector<128x128xf32>
    %c0_23 = arith.constant 0 : index
    %c0_24 = arith.constant 0 : index
    %23 = vector.load %arg5[%c0_23, %c0_24] : memref<128x128xf32, #tpu.memory_space<vmem>>, vector<128x128xf32>
    %24 = arith.addf %23, %22 : vector<128x128xf32>
    %c0_25 = arith.constant 0 : index
    %c0_26 = arith.constant 0 : index
    %25 = vector.load %arg5[%c0_25, %c0_26] : memref<128x128xf32, #tpu.memory_space<vmem>>, vector<128x128xf32>
    tpu.vector_store %arg5[%c0_25, %c0_26], %24 {strides = array<i32>} : memref<128x128xf32, #tpu.memory_space<vmem>>, vector<128x128xf32>,
    %c0_27 = arith.constant 0 : index
    %c0_28 = arith.constant 0 : index
    %26 = vector.load %arg5[%c0_27, %c0_28] : memref<128x128xf32, #tpu.memory_space<vmem>>, vector<128x128xf32>
    %c0_29 = arith.constant 0 : index
    %c0_30 = arith.constant 0 : index
    %27 = vector.load %arg3[%c0_29, %c0_30] : memref<1x128xf32, #tpu.memory_space<vmem>>, vector<1x128xf32>
    %28 = vector.broadcast %27 : vector<1x128xf32> to vector<128x128xf32>
    %29 = arith.addf %26, %28 : vector<128x128xf32>
    %cst_31 = arith.constant 0.000000e+00 : f32
    %30 = vector.broadcast %cst_31 : f32 to vector<128x128xf32>
    %31 = arith.maximumf %29, %30 : vector<128x128xf32>
    %32 = arith.truncf %31 : vector<128x128xf32> to vector<128x128xbf16>
    %c0_32 = arith.constant 0 : index
    %c0_33 = arith.constant 0 : index
    %c0_34 = arith.constant 0 : index
    %33 = vector.load %arg4[%c0_32, %c0_33, %c0_34] : memref<1x128x128xbf16, #tpu.memory_space<vmem>>, vector<1x128x128xbf16>
    %34 = vector.shape_cast %33 : vector<1x128x128xbf16> to vector<128x128xbf16>
    %35 = vector.shape_cast %32 : vector<128x128xbf16> to vector<1x128x128xbf16>
    tpu.vector_store %arg4[%c0_32, %c0_33, %c0_34], %35 {strides = array<i32>} : memref<1x128x128xbf16, #tpu.memory_space<vmem>>, vector<1x128x128xbf16>,
    return
  }
  func.func @transform_0(%arg0: i32) -> (i32, i32, i32) {
    %c0_i32 = arith.constant 0 : i32
    %c0_i32_0 = arith.constant 0 : i32
    %c0_i32_1 = arith.constant 0 : i32
    return %arg0, %c0_i32, %c0_i32_0 : i32, i32, i32
  }
  func.func @transform_1(%arg0: i32) -> (i32, i32, i32) {
    %c0_i32 = arith.constant 0 : i32
    %c0_i32_0 = arith.constant 0 : i32
    %c0_i32_1 = arith.constant 0 : i32
    %c0_i32_2 = arith.constant 0 : i32
    return %c0_i32, %c0_i32_0, %c0_i32_1 : i32, i32, i32
  }
  func.func @transform_2(%arg0: i32) -> (i32, i32) {
    %c0_i32 = arith.constant 0 : i32
    %c0_i32_0 = arith.constant 0 : i32
    %c0_i32_1 = arith.constant 0 : i32
    return %c0_i32, %c0_i32_0 : i32, i32
  }
  func.func @transform_3(%arg0: i32) -> (i32, i32, i32) {
    %c0_i32 = arith.constant 0 : i32
    %c0_i32_0 = arith.constant 0 : i32
    %c0_i32_1 = arith.constant 0 : i32
    return %arg0, %c0_i32, %c0_i32_0 : i32, i32, i32
  }
}

module attributes {stable_mosaic.version = 11 : i64} {
  func.func @_conv3x3_kernel(%arg0: i32, %arg1: memref<1x112x128xbf16, #tpu.memory_space<vmem>>, %arg2: memref<3x384x128xbf16, #tpu.memory_space<vmem>>, %arg3: memref<1x128xf32, #tpu.memory_space<vmem>>, %arg4: memref<1x64x128xbf16, #tpu.memory_space<vmem>>, %arg5: memref<64x128xf32, #tpu.memory_space<vmem>>) attributes {dimension_semantics = [#tpu.dimension_semantics<parallel>], iteration_bounds = array<i64: 2>, scalar_prefetch = 0 : i64, scratch_operands = 1 : i64, tpu.core_type = #tpu.core_type<tc>, window_params = [{transform_indices = @transform_0, window_bounds = array<i64: 1, 112, 128>}, {pipeline_mode = #tpu.pipeline_mode<synchronous>, transform_indices = @transform_1, window_bounds = array<i64: 3, 384, 128>}, {pipeline_mode = #tpu.pipeline_mode<synchronous>, transform_indices = @transform_2, window_bounds = array<i64: 1, 128>}, {transform_indices = @transform_3, window_bounds = array<i64: 1, 64, 128>}]} {
    %c0 = arith.constant 0 : index
    %c0_0 = arith.constant 0 : index
    %c0_1 = arith.constant 0 : index
    %0 = vector.load %arg1[%c0, %c0_0, %c0_1] : memref<1x112x128xbf16, #tpu.memory_space<vmem>>, vector<1x96x128xbf16>
    %1 = vector.shape_cast %0 : vector<1x96x128xbf16> to vector<96x128xbf16>
    %c0_2 = arith.constant 0 : index
    %c1 = arith.constant 1 : index
    %c0_3 = arith.constant 0 : index
    %2 = vector.load %arg1[%c0_2, %c1, %c0_3] : memref<1x112x128xbf16, #tpu.memory_space<vmem>>, vector<1x96x128xbf16>
    %3 = vector.shape_cast %2 : vector<1x96x128xbf16> to vector<96x128xbf16>
    %c0_4 = arith.constant 0 : index
    %c2 = arith.constant 2 : index
    %c0_5 = arith.constant 0 : index
    %4 = vector.load %arg1[%c0_4, %c2, %c0_5] : memref<1x112x128xbf16, #tpu.memory_space<vmem>>, vector<1x96x128xbf16>
    %5 = vector.shape_cast %4 : vector<1x96x128xbf16> to vector<96x128xbf16>
    %6 = tpu.concatenate %1, %3, %5 in 1 : vector<96x128xbf16>, vector<96x128xbf16>, vector<96x128xbf16> -> vector<96x384xbf16>
    %7 = vector.extract_strided_slice %6 {offsets = [0, 0], sizes = [64, 384], strides = [1, 1]} : vector<96x384xbf16> to vector<64x384xbf16>
    %c0_6 = arith.constant 0 : index
    %c0_7 = arith.constant 0 : index
    %c0_8 = arith.constant 0 : index
    %8 = vector.load %arg2[%c0_6, %c0_7, %c0_8] : memref<3x384x128xbf16, #tpu.memory_space<vmem>>, vector<1x384x128xbf16>
    %9 = vector.shape_cast %8 : vector<1x384x128xbf16> to vector<384x128xbf16>
    %cst = arith.constant dense<0.000000e+00> : vector<64x128xf32>
    %10 = tpu.matmul %7, %9, %cst {dimension_numbers = #tpu.dot_dimension_numbers<[1], [0], [0], [1], [0, 0, 1, 1], [], []>} : vector<64x384xbf16>, vector<384x128xbf16>, vector<64x128xf32> -> vector<64x128xf32>
    %c0_9 = arith.constant 0 : index
    %c0_10 = arith.constant 0 : index
    %11 = vector.load %arg5[%c0_9, %c0_10] : memref<64x128xf32, #tpu.memory_space<vmem>>, vector<64x128xf32>
    tpu.vector_store %arg5[%c0_9, %c0_10], %10 {strides = array<i32>} : memref<64x128xf32, #tpu.memory_space<vmem>>, vector<64x128xf32>,
    %12 = vector.extract_strided_slice %6 {offsets = [16, 0], sizes = [64, 384], strides = [1, 1]} : vector<96x384xbf16> to vector<64x384xbf16>
    %c1_11 = arith.constant 1 : index
    %c0_12 = arith.constant 0 : index
    %c0_13 = arith.constant 0 : index
    %13 = vector.load %arg2[%c1_11, %c0_12, %c0_13] : memref<3x384x128xbf16, #tpu.memory_space<vmem>>, vector<1x384x128xbf16>
    %14 = vector.shape_cast %13 : vector<1x384x128xbf16> to vector<384x128xbf16>
    %cst_14 = arith.constant dense<0.000000e+00> : vector<64x128xf32>
    %15 = tpu.matmul %12, %14, %cst_14 {dimension_numbers = #tpu.dot_dimension_numbers<[1], [0], [0], [1], [0, 0, 1, 1], [], []>} : vector<64x384xbf16>, vector<384x128xbf16>, vector<64x128xf32> -> vector<64x128xf32>
    %c0_15 = arith.constant 0 : index
    %c0_16 = arith.constant 0 : index
    %16 = vector.load %arg5[%c0_15, %c0_16] : memref<64x128xf32, #tpu.memory_space<vmem>>, vector<64x128xf32>
    %17 = arith.addf %16, %15 : vector<64x128xf32>
    %c0_17 = arith.constant 0 : index
    %c0_18 = arith.constant 0 : index
    %18 = vector.load %arg5[%c0_17, %c0_18] : memref<64x128xf32, #tpu.memory_space<vmem>>, vector<64x128xf32>
    tpu.vector_store %arg5[%c0_17, %c0_18], %17 {strides = array<i32>} : memref<64x128xf32, #tpu.memory_space<vmem>>, vector<64x128xf32>,
    %19 = vector.extract_strided_slice %6 {offsets = [32, 0], sizes = [64, 384], strides = [1, 1]} : vector<96x384xbf16> to vector<64x384xbf16>
    %c2_19 = arith.constant 2 : index
    %c0_20 = arith.constant 0 : index
    %c0_21 = arith.constant 0 : index
    %20 = vector.load %arg2[%c2_19, %c0_20, %c0_21] : memref<3x384x128xbf16, #tpu.memory_space<vmem>>, vector<1x384x128xbf16>
    %21 = vector.shape_cast %20 : vector<1x384x128xbf16> to vector<384x128xbf16>
    %cst_22 = arith.constant dense<0.000000e+00> : vector<64x128xf32>
    %22 = tpu.matmul %19, %21, %cst_22 {dimension_numbers = #tpu.dot_dimension_numbers<[1], [0], [0], [1], [0, 0, 1, 1], [], []>} : vector<64x384xbf16>, vector<384x128xbf16>, vector<64x128xf32> -> vector<64x128xf32>
    %c0_23 = arith.constant 0 : index
    %c0_24 = arith.constant 0 : index
    %23 = vector.load %arg5[%c0_23, %c0_24] : memref<64x128xf32, #tpu.memory_space<vmem>>, vector<64x128xf32>
    %24 = arith.addf %23, %22 : vector<64x128xf32>
    %c0_25 = arith.constant 0 : index
    %c0_26 = arith.constant 0 : index
    %25 = vector.load %arg5[%c0_25, %c0_26] : memref<64x128xf32, #tpu.memory_space<vmem>>, vector<64x128xf32>
    tpu.vector_store %arg5[%c0_25, %c0_26], %24 {strides = array<i32>} : memref<64x128xf32, #tpu.memory_space<vmem>>, vector<64x128xf32>,
    %c0_27 = arith.constant 0 : index
    %c0_28 = arith.constant 0 : index
    %26 = vector.load %arg5[%c0_27, %c0_28] : memref<64x128xf32, #tpu.memory_space<vmem>>, vector<64x128xf32>
    %c0_29 = arith.constant 0 : index
    %c0_30 = arith.constant 0 : index
    %27 = vector.load %arg3[%c0_29, %c0_30] : memref<1x128xf32, #tpu.memory_space<vmem>>, vector<1x128xf32>
    %28 = vector.broadcast %27 : vector<1x128xf32> to vector<64x128xf32>
    %29 = arith.addf %26, %28 : vector<64x128xf32>
    %cst_31 = arith.constant 0.000000e+00 : f32
    %30 = vector.broadcast %cst_31 : f32 to vector<64x128xf32>
    %31 = arith.maximumf %29, %30 : vector<64x128xf32>
    %32 = arith.truncf %31 : vector<64x128xf32> to vector<64x128xbf16>
    %c0_32 = arith.constant 0 : index
    %c0_33 = arith.constant 0 : index
    %c0_34 = arith.constant 0 : index
    %33 = vector.load %arg4[%c0_32, %c0_33, %c0_34] : memref<1x64x128xbf16, #tpu.memory_space<vmem>>, vector<1x64x128xbf16>
    %34 = vector.shape_cast %33 : vector<1x64x128xbf16> to vector<64x128xbf16>
    %35 = vector.shape_cast %32 : vector<64x128xbf16> to vector<1x64x128xbf16>
    tpu.vector_store %arg4[%c0_32, %c0_33, %c0_34], %35 {strides = array<i32>} : memref<1x64x128xbf16, #tpu.memory_space<vmem>>, vector<1x64x128xbf16>,
    return
  }
  func.func @transform_0(%arg0: i32) -> (i32, i32, i32) {
    %c0_i32 = arith.constant 0 : i32
    %c0_i32_0 = arith.constant 0 : i32
    %c0_i32_1 = arith.constant 0 : i32
    return %arg0, %c0_i32, %c0_i32_0 : i32, i32, i32
  }
  func.func @transform_1(%arg0: i32) -> (i32, i32, i32) {
    %c0_i32 = arith.constant 0 : i32
    %c0_i32_0 = arith.constant 0 : i32
    %c0_i32_1 = arith.constant 0 : i32
    %c0_i32_2 = arith.constant 0 : i32
    return %c0_i32, %c0_i32_0, %c0_i32_1 : i32, i32, i32
  }
  func.func @transform_2(%arg0: i32) -> (i32, i32) {
    %c0_i32 = arith.constant 0 : i32
    %c0_i32_0 = arith.constant 0 : i32
    %c0_i32_1 = arith.constant 0 : i32
    return %c0_i32, %c0_i32_0 : i32, i32
  }
  func.func @transform_3(%arg0: i32) -> (i32, i32, i32) {
    %c0_i32 = arith.constant 0 : i32
    %c0_i32_0 = arith.constant 0 : i32
    %c0_i32_1 = arith.constant 0 : i32
    return %arg0, %c0_i32, %c0_i32_0 : i32, i32, i32
  }
}

module attributes {stable_mosaic.version = 11 : i64} {
  func.func @_mm_bias_kernel(%arg0: i32, %arg1: i32, %arg2: i32, %arg3: memref<32x128xbf16, #tpu.memory_space<vmem>>, %arg4: memref<128x128xbf16, #tpu.memory_space<vmem>>, %arg5: memref<1x128xf32, #tpu.memory_space<vmem>>, %arg6: memref<32x128xbf16, #tpu.memory_space<vmem>>, %arg7: memref<32x128xf32, #tpu.memory_space<vmem>>) attributes {dimension_semantics = [#tpu.dimension_semantics<parallel>, #tpu.dimension_semantics<parallel>, #tpu.dimension_semantics<arbitrary>], iteration_bounds = array<i64: 1, 1, 1>, scalar_prefetch = 0 : i64, scratch_operands = 1 : i64, tpu.core_type = #tpu.core_type<tc>, window_params = [{transform_indices = @transform_0, window_bounds = array<i64: 32, 128>}, {transform_indices = @transform_1, window_bounds = array<i64: 128, 128>}, {transform_indices = @transform_2, window_bounds = array<i64: 1, 128>}, {transform_indices = @transform_3, window_bounds = array<i64: 32, 128>}]} {
    %c0_i32 = arith.constant 0 : i32
    %0 = arith.cmpi eq, %arg2, %c0_i32 : i32
    %1 = arith.extui %0 : i1 to i32
    %c0_i32_0 = arith.constant 0 : i32
    %2 = arith.cmpi ne, %1, %c0_i32_0 : i32
    scf.if %2 {
      %cst_10 = arith.constant 0.000000e+00 : f32
      %12 = vector.broadcast %cst_10 : f32 to vector<32x128xf32>
      %c0_11 = arith.constant 0 : index
      %c0_12 = arith.constant 0 : index
      %13 = vector.load %arg7[%c0_11, %c0_12] : memref<32x128xf32, #tpu.memory_space<vmem>>, vector<32x128xf32>
      tpu.vector_store %arg7[%c0_11, %c0_12], %12 {strides = array<i32>} : memref<32x128xf32, #tpu.memory_space<vmem>>, vector<32x128xf32>,
    } else {
    }
    %c0 = arith.constant 0 : index
    %c0_1 = arith.constant 0 : index
    %3 = vector.load %arg7[%c0, %c0_1] : memref<32x128xf32, #tpu.memory_space<vmem>>, vector<32x128xf32>
    %c0_2 = arith.constant 0 : index
    %c0_3 = arith.constant 0 : index
    %4 = vector.load %arg3[%c0_2, %c0_3] : memref<32x128xbf16, #tpu.memory_space<vmem>>, vector<32x128xbf16>
    %c0_4 = arith.constant 0 : index
    %c0_5 = arith.constant 0 : index
    %5 = vector.load %arg4[%c0_4, %c0_5] : memref<128x128xbf16, #tpu.memory_space<vmem>>, vector<128x128xbf16>
    %cst = arith.constant dense<0.000000e+00> : vector<32x128xf32>
    %6 = tpu.matmul %4, %5, %cst {dimension_numbers = #tpu.dot_dimension_numbers<[1], [0], [0], [1], [0, 0, 1, 1], [], []>} : vector<32x128xbf16>, vector<128x128xbf16>, vector<32x128xf32> -> vector<32x128xf32>
    %7 = arith.addf %3, %6 : vector<32x128xf32>
    %c0_6 = arith.constant 0 : index
    %c0_7 = arith.constant 0 : index
    %8 = vector.load %arg7[%c0_6, %c0_7] : memref<32x128xf32, #tpu.memory_space<vmem>>, vector<32x128xf32>
    tpu.vector_store %arg7[%c0_6, %c0_7], %7 {strides = array<i32>} : memref<32x128xf32, #tpu.memory_space<vmem>>, vector<32x128xf32>,
    %c0_i32_8 = arith.constant 0 : i32
    %9 = arith.cmpi eq, %arg2, %c0_i32_8 : i32
    %10 = arith.extui %9 : i1 to i32
    %c0_i32_9 = arith.constant 0 : i32
    %11 = arith.cmpi ne, %10, %c0_i32_9 : i32
    scf.if %11 {
      %c0_10 = arith.constant 0 : index
      %c0_11 = arith.constant 0 : index
      %12 = vector.load %arg7[%c0_10, %c0_11] : memref<32x128xf32, #tpu.memory_space<vmem>>, vector<32x128xf32>
      %c0_12 = arith.constant 0 : index
      %c0_13 = arith.constant 0 : index
      %13 = vector.load %arg5[%c0_12, %c0_13] : memref<1x128xf32, #tpu.memory_space<vmem>>, vector<1x128xf32>
      %14 = vector.broadcast %13 : vector<1x128xf32> to vector<32x128xf32>
      %15 = arith.addf %12, %14 : vector<32x128xf32>
      %cst_14 = arith.constant 0.000000e+00 : f32
      %16 = vector.broadcast %cst_14 : f32 to vector<32x128xf32>
      %17 = arith.maximumf %15, %16 : vector<32x128xf32>
      %18 = arith.truncf %17 : vector<32x128xf32> to vector<32x128xbf16>
      %c0_15 = arith.constant 0 : index
      %c0_16 = arith.constant 0 : index
      %19 = vector.load %arg6[%c0_15, %c0_16] : memref<32x128xbf16, #tpu.memory_space<vmem>>, vector<32x128xbf16>
      tpu.vector_store %arg6[%c0_15, %c0_16], %18 {strides = array<i32>} : memref<32x128xbf16, #tpu.memory_space<vmem>>, vector<32x128xbf16>,
    } else {
    }
    return
  }
  func.func @transform_0(%arg0: i32, %arg1: i32, %arg2: i32) -> (i32, i32) {
    %c0_i32 = arith.constant 0 : i32
    return %arg0, %arg2 : i32, i32
  }
  func.func @transform_1(%arg0: i32, %arg1: i32, %arg2: i32) -> (i32, i32) {
    %c0_i32 = arith.constant 0 : i32
    return %arg2, %arg1 : i32, i32
  }
  func.func @transform_2(%arg0: i32, %arg1: i32, %arg2: i32) -> (i32, i32) {
    %c0_i32 = arith.constant 0 : i32
    %c0_i32_0 = arith.constant 0 : i32
    return %c0_i32, %arg1 : i32, i32
  }
  func.func @transform_3(%arg0: i32, %arg1: i32, %arg2: i32) -> (i32, i32) {
    %c0_i32 = arith.constant 0 : i32
    return %arg0, %arg1 : i32, i32
  }
}

module attributes {stable_mosaic.version = 11 : i64} {
  func.func @_conv3x3_kernel(%arg0: i32, %arg1: memref<1x80x128xbf16, #tpu.memory_space<vmem>>, %arg2: memref<3x384x128xbf16, #tpu.memory_space<vmem>>, %arg3: memref<1x128xf32, #tpu.memory_space<vmem>>, %arg4: memref<1x32x128xbf16, #tpu.memory_space<vmem>>, %arg5: memref<32x128xf32, #tpu.memory_space<vmem>>) attributes {dimension_semantics = [#tpu.dimension_semantics<parallel>], iteration_bounds = array<i64: 2>, scalar_prefetch = 0 : i64, scratch_operands = 1 : i64, tpu.core_type = #tpu.core_type<tc>, window_params = [{transform_indices = @transform_0, window_bounds = array<i64: 1, 80, 128>}, {pipeline_mode = #tpu.pipeline_mode<synchronous>, transform_indices = @transform_1, window_bounds = array<i64: 3, 384, 128>}, {pipeline_mode = #tpu.pipeline_mode<synchronous>, transform_indices = @transform_2, window_bounds = array<i64: 1, 128>}, {transform_indices = @transform_3, window_bounds = array<i64: 1, 32, 128>}]} {
    %c0 = arith.constant 0 : index
    %c0_0 = arith.constant 0 : index
    %c0_1 = arith.constant 0 : index
    %0 = vector.load %arg1[%c0, %c0_0, %c0_1] : memref<1x80x128xbf16, #tpu.memory_space<vmem>>, vector<1x64x128xbf16>
    %1 = vector.shape_cast %0 : vector<1x64x128xbf16> to vector<64x128xbf16>
    %c0_2 = arith.constant 0 : index
    %c1 = arith.constant 1 : index
    %c0_3 = arith.constant 0 : index
    %2 = vector.load %arg1[%c0_2, %c1, %c0_3] : memref<1x80x128xbf16, #tpu.memory_space<vmem>>, vector<1x64x128xbf16>
    %3 = vector.shape_cast %2 : vector<1x64x128xbf16> to vector<64x128xbf16>
    %c0_4 = arith.constant 0 : index
    %c2 = arith.constant 2 : index
    %c0_5 = arith.constant 0 : index
    %4 = vector.load %arg1[%c0_4, %c2, %c0_5] : memref<1x80x128xbf16, #tpu.memory_space<vmem>>, vector<1x64x128xbf16>
    %5 = vector.shape_cast %4 : vector<1x64x128xbf16> to vector<64x128xbf16>
    %6 = tpu.concatenate %1, %3, %5 in 1 : vector<64x128xbf16>, vector<64x128xbf16>, vector<64x128xbf16> -> vector<64x384xbf16>
    %7 = vector.extract_strided_slice %6 {offsets = [0, 0], sizes = [32, 384], strides = [1, 1]} : vector<64x384xbf16> to vector<32x384xbf16>
    %c0_6 = arith.constant 0 : index
    %c0_7 = arith.constant 0 : index
    %c0_8 = arith.constant 0 : index
    %8 = vector.load %arg2[%c0_6, %c0_7, %c0_8] : memref<3x384x128xbf16, #tpu.memory_space<vmem>>, vector<1x384x128xbf16>
    %9 = vector.shape_cast %8 : vector<1x384x128xbf16> to vector<384x128xbf16>
    %cst = arith.constant dense<0.000000e+00> : vector<32x128xf32>
    %10 = tpu.matmul %7, %9, %cst {dimension_numbers = #tpu.dot_dimension_numbers<[1], [0], [0], [1], [0, 0, 1, 1], [], []>} : vector<32x384xbf16>, vector<384x128xbf16>, vector<32x128xf32> -> vector<32x128xf32>
    %c0_9 = arith.constant 0 : index
    %c0_10 = arith.constant 0 : index
    %11 = vector.load %arg5[%c0_9, %c0_10] : memref<32x128xf32, #tpu.memory_space<vmem>>, vector<32x128xf32>
    tpu.vector_store %arg5[%c0_9, %c0_10], %10 {strides = array<i32>} : memref<32x128xf32, #tpu.memory_space<vmem>>, vector<32x128xf32>,
    %12 = vector.extract_strided_slice %6 {offsets = [16, 0], sizes = [32, 384], strides = [1, 1]} : vector<64x384xbf16> to vector<32x384xbf16>
    %c1_11 = arith.constant 1 : index
    %c0_12 = arith.constant 0 : index
    %c0_13 = arith.constant 0 : index
    %13 = vector.load %arg2[%c1_11, %c0_12, %c0_13] : memref<3x384x128xbf16, #tpu.memory_space<vmem>>, vector<1x384x128xbf16>
    %14 = vector.shape_cast %13 : vector<1x384x128xbf16> to vector<384x128xbf16>
    %cst_14 = arith.constant dense<0.000000e+00> : vector<32x128xf32>
    %15 = tpu.matmul %12, %14, %cst_14 {dimension_numbers = #tpu.dot_dimension_numbers<[1], [0], [0], [1], [0, 0, 1, 1], [], []>} : vector<32x384xbf16>, vector<384x128xbf16>, vector<32x128xf32> -> vector<32x128xf32>
    %c0_15 = arith.constant 0 : index
    %c0_16 = arith.constant 0 : index
    %16 = vector.load %arg5[%c0_15, %c0_16] : memref<32x128xf32, #tpu.memory_space<vmem>>, vector<32x128xf32>
    %17 = arith.addf %16, %15 : vector<32x128xf32>
    %c0_17 = arith.constant 0 : index
    %c0_18 = arith.constant 0 : index
    %18 = vector.load %arg5[%c0_17, %c0_18] : memref<32x128xf32, #tpu.memory_space<vmem>>, vector<32x128xf32>
    tpu.vector_store %arg5[%c0_17, %c0_18], %17 {strides = array<i32>} : memref<32x128xf32, #tpu.memory_space<vmem>>, vector<32x128xf32>,
    %19 = vector.extract_strided_slice %6 {offsets = [32, 0], sizes = [32, 384], strides = [1, 1]} : vector<64x384xbf16> to vector<32x384xbf16>
    %c2_19 = arith.constant 2 : index
    %c0_20 = arith.constant 0 : index
    %c0_21 = arith.constant 0 : index
    %20 = vector.load %arg2[%c2_19, %c0_20, %c0_21] : memref<3x384x128xbf16, #tpu.memory_space<vmem>>, vector<1x384x128xbf16>
    %21 = vector.shape_cast %20 : vector<1x384x128xbf16> to vector<384x128xbf16>
    %cst_22 = arith.constant dense<0.000000e+00> : vector<32x128xf32>
    %22 = tpu.matmul %19, %21, %cst_22 {dimension_numbers = #tpu.dot_dimension_numbers<[1], [0], [0], [1], [0, 0, 1, 1], [], []>} : vector<32x384xbf16>, vector<384x128xbf16>, vector<32x128xf32> -> vector<32x128xf32>
    %c0_23 = arith.constant 0 : index
    %c0_24 = arith.constant 0 : index
    %23 = vector.load %arg5[%c0_23, %c0_24] : memref<32x128xf32, #tpu.memory_space<vmem>>, vector<32x128xf32>
    %24 = arith.addf %23, %22 : vector<32x128xf32>
    %c0_25 = arith.constant 0 : index
    %c0_26 = arith.constant 0 : index
    %25 = vector.load %arg5[%c0_25, %c0_26] : memref<32x128xf32, #tpu.memory_space<vmem>>, vector<32x128xf32>
    tpu.vector_store %arg5[%c0_25, %c0_26], %24 {strides = array<i32>} : memref<32x128xf32, #tpu.memory_space<vmem>>, vector<32x128xf32>,
    %c0_27 = arith.constant 0 : index
    %c0_28 = arith.constant 0 : index
    %26 = vector.load %arg5[%c0_27, %c0_28] : memref<32x128xf32, #tpu.memory_space<vmem>>, vector<32x128xf32>
    %c0_29 = arith.constant 0 : index
    %c0_30 = arith.constant 0 : index
    %27 = vector.load %arg3[%c0_29, %c0_30] : memref<1x128xf32, #tpu.memory_space<vmem>>, vector<1x128xf32>
    %28 = vector.broadcast %27 : vector<1x128xf32> to vector<32x128xf32>
    %29 = arith.addf %26, %28 : vector<32x128xf32>
    %cst_31 = arith.constant 0.000000e+00 : f32
    %30 = vector.broadcast %cst_31 : f32 to vector<32x128xf32>
    %31 = arith.maximumf %29, %30 : vector<32x128xf32>
    %32 = arith.truncf %31 : vector<32x128xf32> to vector<32x128xbf16>
    %c0_32 = arith.constant 0 : index
    %c0_33 = arith.constant 0 : index
    %c0_34 = arith.constant 0 : index
    %33 = vector.load %arg4[%c0_32, %c0_33, %c0_34] : memref<1x32x128xbf16, #tpu.memory_space<vmem>>, vector<1x32x128xbf16>
    %34 = vector.shape_cast %33 : vector<1x32x128xbf16> to vector<32x128xbf16>
    %35 = vector.shape_cast %32 : vector<32x128xbf16> to vector<1x32x128xbf16>
    tpu.vector_store %arg4[%c0_32, %c0_33, %c0_34], %35 {strides = array<i32>} : memref<1x32x128xbf16, #tpu.memory_space<vmem>>, vector<1x32x128xbf16>,
    return
  }
  func.func @transform_0(%arg0: i32) -> (i32, i32, i32) {
    %c0_i32 = arith.constant 0 : i32
    %c0_i32_0 = arith.constant 0 : i32
    %c0_i32_1 = arith.constant 0 : i32
    return %arg0, %c0_i32, %c0_i32_0 : i32, i32, i32
  }
  func.func @transform_1(%arg0: i32) -> (i32, i32, i32) {
    %c0_i32 = arith.constant 0 : i32
    %c0_i32_0 = arith.constant 0 : i32
    %c0_i32_1 = arith.constant 0 : i32
    %c0_i32_2 = arith.constant 0 : i32
    return %c0_i32, %c0_i32_0, %c0_i32_1 : i32, i32, i32
  }
  func.func @transform_2(%arg0: i32) -> (i32, i32) {
    %c0_i32 = arith.constant 0 : i32
    %c0_i32_0 = arith.constant 0 : i32
    %c0_i32_1 = arith.constant 0 : i32
    return %c0_i32, %c0_i32_0 : i32, i32
  }
  func.func @transform_3(%arg0: i32) -> (i32, i32, i32) {
    %c0_i32 = arith.constant 0 : i32
    %c0_i32_0 = arith.constant 0 : i32
    %c0_i32_1 = arith.constant 0 : i32
    return %arg0, %c0_i32, %c0_i32_0 : i32, i32, i32
  }
}

module attributes {stable_mosaic.version = 11 : i64} {
  func.func @_mm_bias_kernel(%arg0: i32, %arg1: i32, %arg2: i32, %arg3: memref<8x128xbf16, #tpu.memory_space<vmem>>, %arg4: memref<128x128xbf16, #tpu.memory_space<vmem>>, %arg5: memref<1x128xf32, #tpu.memory_space<vmem>>, %arg6: memref<8x128xbf16, #tpu.memory_space<vmem>>, %arg7: memref<8x128xf32, #tpu.memory_space<vmem>>) attributes {dimension_semantics = [#tpu.dimension_semantics<parallel>, #tpu.dimension_semantics<parallel>, #tpu.dimension_semantics<arbitrary>], iteration_bounds = array<i64: 1, 1, 1>, scalar_prefetch = 0 : i64, scratch_operands = 1 : i64, tpu.core_type = #tpu.core_type<tc>, window_params = [{transform_indices = @transform_0, window_bounds = array<i64: 8, 128>}, {transform_indices = @transform_1, window_bounds = array<i64: 128, 128>}, {transform_indices = @transform_2, window_bounds = array<i64: 1, 128>}, {transform_indices = @transform_3, window_bounds = array<i64: 8, 128>}]} {
    %c0_i32 = arith.constant 0 : i32
    %0 = arith.cmpi eq, %arg2, %c0_i32 : i32
    %1 = arith.extui %0 : i1 to i32
    %c0_i32_0 = arith.constant 0 : i32
    %2 = arith.cmpi ne, %1, %c0_i32_0 : i32
    scf.if %2 {
      %cst_10 = arith.constant 0.000000e+00 : f32
      %12 = vector.broadcast %cst_10 : f32 to vector<8x128xf32>
      %c0_11 = arith.constant 0 : index
      %c0_12 = arith.constant 0 : index
      %13 = vector.load %arg7[%c0_11, %c0_12] : memref<8x128xf32, #tpu.memory_space<vmem>>, vector<8x128xf32>
      tpu.vector_store %arg7[%c0_11, %c0_12], %12 {strides = array<i32>} : memref<8x128xf32, #tpu.memory_space<vmem>>, vector<8x128xf32>,
    } else {
    }
    %c0 = arith.constant 0 : index
    %c0_1 = arith.constant 0 : index
    %3 = vector.load %arg7[%c0, %c0_1] : memref<8x128xf32, #tpu.memory_space<vmem>>, vector<8x128xf32>
    %c0_2 = arith.constant 0 : index
    %c0_3 = arith.constant 0 : index
    %4 = vector.load %arg3[%c0_2, %c0_3] : memref<8x128xbf16, #tpu.memory_space<vmem>>, vector<8x128xbf16>
    %c0_4 = arith.constant 0 : index
    %c0_5 = arith.constant 0 : index
    %5 = vector.load %arg4[%c0_4, %c0_5] : memref<128x128xbf16, #tpu.memory_space<vmem>>, vector<128x128xbf16>
    %cst = arith.constant dense<0.000000e+00> : vector<8x128xf32>
    %6 = tpu.matmul %4, %5, %cst {dimension_numbers = #tpu.dot_dimension_numbers<[1], [0], [0], [1], [0, 0, 1, 1], [], []>} : vector<8x128xbf16>, vector<128x128xbf16>, vector<8x128xf32> -> vector<8x128xf32>
    %7 = arith.addf %3, %6 : vector<8x128xf32>
    %c0_6 = arith.constant 0 : index
    %c0_7 = arith.constant 0 : index
    %8 = vector.load %arg7[%c0_6, %c0_7] : memref<8x128xf32, #tpu.memory_space<vmem>>, vector<8x128xf32>
    tpu.vector_store %arg7[%c0_6, %c0_7], %7 {strides = array<i32>} : memref<8x128xf32, #tpu.memory_space<vmem>>, vector<8x128xf32>,
    %c0_i32_8 = arith.constant 0 : i32
    %9 = arith.cmpi eq, %arg2, %c0_i32_8 : i32
    %10 = arith.extui %9 : i1 to i32
    %c0_i32_9 = arith.constant 0 : i32
    %11 = arith.cmpi ne, %10, %c0_i32_9 : i32
    scf.if %11 {
      %c0_10 = arith.constant 0 : index
      %c0_11 = arith.constant 0 : index
      %12 = vector.load %arg7[%c0_10, %c0_11] : memref<8x128xf32, #tpu.memory_space<vmem>>, vector<8x128xf32>
      %c0_12 = arith.constant 0 : index
      %c0_13 = arith.constant 0 : index
      %13 = vector.load %arg5[%c0_12, %c0_13] : memref<1x128xf32, #tpu.memory_space<vmem>>, vector<1x128xf32>
      %14 = vector.broadcast %13 : vector<1x128xf32> to vector<8x128xf32>
      %15 = arith.addf %12, %14 : vector<8x128xf32>
      %cst_14 = arith.constant 0.000000e+00 : f32
      %16 = vector.broadcast %cst_14 : f32 to vector<8x128xf32>
      %17 = arith.maximumf %15, %16 : vector<8x128xf32>
      %18 = arith.truncf %17 : vector<8x128xf32> to vector<8x128xbf16>
      %c0_15 = arith.constant 0 : index
      %c0_16 = arith.constant 0 : index
      %19 = vector.load %arg6[%c0_15, %c0_16] : memref<8x128xbf16, #tpu.memory_space<vmem>>, vector<8x128xbf16>
      tpu.vector_store %arg6[%c0_15, %c0_16], %18 {strides = array<i32>} : memref<8x128xbf16, #tpu.memory_space<vmem>>, vector<8x128xbf16>,
    } else {
    }
    return
  }
  func.func @transform_0(%arg0: i32, %arg1: i32, %arg2: i32) -> (i32, i32) {
    %c0_i32 = arith.constant 0 : i32
    return %arg0, %arg2 : i32, i32
  }
  func.func @transform_1(%arg0: i32, %arg1: i32, %arg2: i32) -> (i32, i32) {
    %c0_i32 = arith.constant 0 : i32
    return %arg2, %arg1 : i32, i32
  }
  func.func @transform_2(%arg0: i32, %arg1: i32, %arg2: i32) -> (i32, i32) {
    %c0_i32 = arith.constant 0 : i32
    %c0_i32_0 = arith.constant 0 : i32
    return %c0_i32, %arg1 : i32, i32
  }
  func.func @transform_3(%arg0: i32, %arg1: i32, %arg2: i32) -> (i32, i32) {
    %c0_i32 = arith.constant 0 : i32
    return %arg0, %arg1 : i32, i32
  }
}

module attributes {stable_mosaic.version = 11 : i64} {
  func.func @_affine_kernel(%arg0: i32, %arg1: memref<8x128xbf16, #tpu.memory_space<vmem>>, %arg2: memref<1x128xf32, #tpu.memory_space<vmem>>, %arg3: memref<1x128xf32, #tpu.memory_space<vmem>>, %arg4: memref<8x128xf32, #tpu.memory_space<vmem>>) attributes {dimension_semantics = [#tpu.dimension_semantics<parallel>], iteration_bounds = array<i64: 1>, scalar_prefetch = 0 : i64, scratch_operands = 0 : i64, tpu.core_type = #tpu.core_type<tc>, window_params = [{transform_indices = @transform_0, window_bounds = array<i64: 8, 128>}, {pipeline_mode = #tpu.pipeline_mode<synchronous>, transform_indices = @transform_1, window_bounds = array<i64: 1, 128>}, {pipeline_mode = #tpu.pipeline_mode<synchronous>, transform_indices = @transform_2, window_bounds = array<i64: 1, 128>}, {transform_indices = @transform_3, window_bounds = array<i64: 8, 128>}]} {
    %c0 = arith.constant 0 : index
    %c0_0 = arith.constant 0 : index
    %0 = vector.load %arg1[%c0, %c0_0] : memref<8x128xbf16, #tpu.memory_space<vmem>>, vector<8x128xbf16>
    %1 = arith.extf %0 : vector<8x128xbf16> to vector<8x128xf32>
    %c0_1 = arith.constant 0 : index
    %c0_2 = arith.constant 0 : index
    %2 = vector.load %arg2[%c0_1, %c0_2] : memref<1x128xf32, #tpu.memory_space<vmem>>, vector<1x128xf32>
    %3 = vector.broadcast %2 : vector<1x128xf32> to vector<8x128xf32>
    %4 = arith.mulf %1, %3 : vector<8x128xf32>
    %c0_3 = arith.constant 0 : index
    %c0_4 = arith.constant 0 : index
    %5 = vector.load %arg3[%c0_3, %c0_4] : memref<1x128xf32, #tpu.memory_space<vmem>>, vector<1x128xf32>
    %6 = vector.broadcast %5 : vector<1x128xf32> to vector<8x128xf32>
    %7 = arith.addf %4, %6 : vector<8x128xf32>
    %c0_5 = arith.constant 0 : index
    %c0_6 = arith.constant 0 : index
    %8 = vector.load %arg4[%c0_5, %c0_6] : memref<8x128xf32, #tpu.memory_space<vmem>>, vector<8x128xf32>
    tpu.vector_store %arg4[%c0_5, %c0_6], %7 {strides = array<i32>} : memref<8x128xf32, #tpu.memory_space<vmem>>, vector<8x128xf32>,
    return
  }
  func.func @transform_0(%arg0: i32) -> (i32, i32) {
    %c0_i32 = arith.constant 0 : i32
    %c0_i32_0 = arith.constant 0 : i32
    return %arg0, %c0_i32 : i32, i32
  }
  func.func @transform_1(%arg0: i32) -> (i32, i32) {
    %c0_i32 = arith.constant 0 : i32
    %c0_i32_0 = arith.constant 0 : i32
    %c0_i32_1 = arith.constant 0 : i32
    return %c0_i32, %c0_i32_0 : i32, i32
  }
  func.func @transform_2(%arg0: i32) -> (i32, i32) {
    %c0_i32 = arith.constant 0 : i32
    %c0_i32_0 = arith.constant 0 : i32
    %c0_i32_1 = arith.constant 0 : i32
    return %c0_i32, %c0_i32_0 : i32, i32
  }
  func.func @transform_3(%arg0: i32) -> (i32, i32) {
    %c0_i32 = arith.constant 0 : i32
    %c0_i32_0 = arith.constant 0 : i32
    return %arg0, %c0_i32 : i32, i32
  }
}

</mosaic_0001>

<bundles_post_ra>
// kernel: _lambda_.17
= control target key start
LH: loop header
LB: loop body
LE: loop exit
PB: predicated region body
PF: predicated region fallthrough
CT: control target
= control target key end

     0   :  { %s721_s1 = inlined_call_operand.vmem [shape: bf16[128,128], index: 1, kind: input, shape index: {}]   ;;  %s722_s0 = inlined_call_operand.vmem [shape: bf16[128,128], index: 0, kind: input, shape index: {}]   ;;  %s723_s2 = inlined_call_operand.vmem [shape: f32[1,128], index: 2, kind: input, shape index: {}]   ;;  %s724_s3 = inlined_call_operand.vmem [shape: bf16[128,128], index: 3, kind: output, shape index: {}]  }
   0x1   :  { %v610_v0 = vld [vmem:[%s721_s1 + $0x38] sm:$0xff]   ;;  %v611_v1 = vld [vmem:[%s721_s1 + $0x30] sm:$0xff]   ;;  %v612_v2 = vld [vmem:[%s721_s1 + $0x28] sm:$0xff]  }
   0x2   :  { %562 = vmatprep.subr.bf16.mxu0 %v610_v0  ;;  %594 = vmatprep.subr.bf16.mxu1 %v610_v0  ;;  %v613_v3 = vld [vmem:[%s721_s1 + $0x20] sm:$0xff]   ;;  %v614_v6 = vld [vmem:[%s721_s1 + $0x18] sm:$0xff]   ;;  %v615_v7 = vld [vmem:[%s721_s1 + $0x10] sm:$0xff]  }
   0x3   :  { %563 = vmatpush3.bf16.msra.mxu0 %v610_v0  ;;  %602 = vmatpush3.bf16.msra.mxu1 %v610_v0  ;;  %v618_v4 = vld [vmem:[%s722_s0] sm:$0xff]   ;;  %v616_v8 = vld [vmem:[%s721_s1 + $0x8] sm:$0xff]   ;;  %v622_v12 = vld [vmem:[%s722_s0 + $0x10] sm:$0xff]  }
   0x4   :  { %564 = vmatprep.subr.bf16.mxu0 %v611_v1  ;;  %595 = vmatprep.subr.bf16.mxu1 %v611_v1  ;;  %v619_v5 = vld [vmem:[%s722_s0 + $0x20] sm:$0xff]   ;;  %v620_v10 = vld [vmem:[%s722_s0 + $0x8] sm:$0xff]   ;;  %v623_v13 = vld [vmem:[%s722_s0 + $0x30] sm:$0xff]  }
   0x5   :  { %578 = vmatprep.mubr.bf16.mxu0 %v618_v4  ;;  %586 = vmatprep.mubr.bf16.mxu1 %v619_v5  ;;  %v617_v9 = vld [vmem:[%s721_s1] sm:$0xff]   ;;  %v621_v11 = vld [vmem:[%s722_s0 + $0x28] sm:$0xff]   ;;  %v624_v14 = vld [vmem:[%s722_s0 + $0x18] sm:$0xff]  }
   0x6   :  { %v625_v15 = vld [vmem:[%s722_s0 + $0x38] sm:$0xff]   ;;  %v466_v16 = vld [vmem:[%s723_s2] ss:$0 sm:$0xff] }
   0x7   :  { %565 = vmatpush3.bf16.msra.mxu0 %v611_v1  ;;  %603 = vmatpush3.bf16.msra.mxu1 %v611_v1 }
   0x8   :  { %566 = vmatprep.subr.bf16.mxu0 %v612_v2  ;;  %596 = vmatprep.subr.bf16.mxu1 %v612_v2 }
   0xb   :  { %567 = vmatpush3.bf16.msra.mxu0 %v612_v2  ;;  %604 = vmatpush3.bf16.msra.mxu1 %v612_v2 }
   0xc   :  { %568 = vmatprep.subr.bf16.mxu0 %v613_v3  ;;  %597 = vmatprep.subr.bf16.mxu1 %v613_v3 }
   0xf   :  { %569 = vmatpush3.bf16.msra.mxu0 %v613_v3  ;;  %605 = vmatpush3.bf16.msra.mxu1 %v613_v3 }
  0x10   :  { %570 = vmatprep.subr.bf16.mxu0 %v614_v6  ;;  %598 = vmatprep.subr.bf16.mxu1 %v614_v6 }
  0x13   :  { %571 = vmatpush3.bf16.msra.mxu0 %v614_v6  ;;  %606 = vmatpush3.bf16.msra.mxu1 %v614_v6 }
  0x14   :  { %572 = vmatprep.subr.bf16.mxu0 %v615_v7  ;;  %599 = vmatprep.subr.bf16.mxu1 %v615_v7 }
  0x17   :  { %573 = vmatpush3.bf16.msra.mxu0 %v615_v7  ;;  %607 = vmatpush3.bf16.msra.mxu1 %v615_v7 }
  0x18   :  { %574 = vmatprep.subr.bf16.mxu0 %v616_v8  ;;  %600 = vmatprep.subr.bf16.mxu1 %v616_v8 }
  0x1b   :  { %575 = vmatpush3.bf16.msra.mxu0 %v616_v8  ;;  %608 = vmatpush3.bf16.msra.mxu1 %v616_v8 }
  0x1c   :  { %576 = vmatprep.subr.bf16.mxu0 %v617_v9  ;;  %601 = vmatprep.subr.bf16.mxu1 %v617_v9 }
  0x1f   :  { %577 = vmatpush3.bf16.msra.mxu0 %v617_v9  ;;  %609 = vmatpush3.bf16.msra.mxu1 %v617_v9 }
  0x22   :  { %579 = vmatmul.mubr.bf16.vlgmr.msra.gmra.mxu0 %v620_v10  ;;  %587 = vmatmul.mubr.bf16.vlgmr.msra.gmra.mxu1 %v621_v11 }
  0x23   :  { %582 = vmatprep.mubr.bf16.mxu0 %v622_v12  ;;  %590 = vmatprep.mubr.bf16.mxu1 %v623_v13 }
  0x2a   :  { %583 = vmatmul.mubr.bf16.gmra.mxu0 %v624_v14  ;;  %591 = vmatmul.mubr.bf16.gmra.mxu1 %v625_v15 }
  0xe2   :  { %v580_v17 = vpop.f32.mrf.mxu0  ;;  %v588_v18 = vpop.f32.mrf.mxu1 }
  0xe3   :  { %v336_v19 = vadd.f32 %v580_v17, %v466_v16  ;;  %v344_v20 = vadd.f32 %v588_v18, %v466_v16 }
  0xe4   :  { %v213_v21 = vpop.f32.mrf.mxu0  ;;  %v245_v22 = vpop.f32.mrf.mxu1 }
  0xe5   :  { %v334_v23 = vadd.f32 %v466_v16, %v213_v21  ;;  %v342_v24 = vadd.f32 %v466_v16, %v245_v22  ;;  %v352_v29 = vmax.f32 %v336_v19, 0.0  ;;  %v360_v30 = vmax.f32 %v344_v20, 0.0 }
  0xe6   :  { %v581_v25 = vpop.f32.mrf.mxu0  ;;  %v589_v26 = vpop.f32.mrf.mxu1 }
  0xe7   :  { %v337_v27 = vadd.f32 %v581_v25, %v466_v16  ;;  %v345_v28 = vadd.f32 %v589_v26, %v466_v16  ;;  %v350_v37 = vmax.f32 %v334_v23, 0.0  ;;  %v358_v38 = vmax.f32 %v342_v24, 0.0 }
  0xe8   :  { %v216_v31 = vpop.f32.mrf.mxu0  ;;  %v248_v32 = vpop.f32.mrf.mxu1 }
  0xe9   :  { %v353_v33 = vmax.f32 %v337_v27, 0.0  ;;  %v361_v34 = vmax.f32 %v345_v28, 0.0  ;;  %v335_v35 = vadd.f32 %v466_v16, %v216_v31  ;;  %v343_v36 = vadd.f32 %v466_v16, %v248_v32 }
  0xea   :  { %v584_v39 = vpop.f32.mrf.mxu0  ;;  %v592_v40 = vpop.f32.mrf.mxu1 }
  0xeb   :  { %v507_v41 = vpack.c.bf16 %v353_v33, %v352_v29  ;;  %v527_v42 = vpack.c.bf16 %v361_v34, %v360_v30  ;;  %v351_v43 = vmax.f32 %v335_v35, 0.0  ;;  %v359_v44 = vmax.f32 %v343_v36, 0.0 }
  0xec   :  { %v340_v45 = vadd.f32 %v584_v39, %v466_v16  ;;  %v348_v46 = vadd.f32 %v592_v40, %v466_v16  ;;  %v229_v47 = vpop.f32.mrf.mxu0  ;;  %v261_v48 = vpop.f32.mrf.mxu1 }
  0xed   :  { %539 = vst [vmem:[%s724_s3 + $0x8] sm:$0xff] %v507_v41   ;;  %543 = vst [vmem:[%s724_s3 + $0x28] sm:$0xff] %v527_v42   ;;  %v502_v49 = vpack.c.bf16 %v351_v43, %v350_v37  ;;  %v522_v50 = vpack.c.bf16 %v359_v44, %v358_v38  ;;  %v338_v51 = vadd.f32 %v466_v16, %v229_v47 }
  0xee   :  { %v346_v52 = vadd.f32 %v466_v16, %v261_v48  ;;  %v585_v53 = vpop.f32.mrf.mxu0  ;;  %v593_v54 = vpop.f32.mrf.mxu1  ;;  %v356_v57 = vmax.f32 %v340_v45, 0.0  ;;  %v364_v58 = vmax.f32 %v348_v46, 0.0 }
  0xef   :  { %503 = vst [vmem:[%s724_s3] sm:$0xff] %v502_v49   ;;  %542 = vst [vmem:[%s724_s3 + $0x20] sm:$0xff] %v522_v50   ;;  %v341_v55 = vadd.f32 %v585_v53, %v466_v16  ;;  %v349_v56 = vadd.f32 %v593_v54, %v466_v16  ;;  %v354_v1 = vmax.f32 %v338_v51, 0.0 }
  0xf0   :  { %v232_v59 = vpop.f32.mrf.mxu0  ;;  %v264_v60 = vpop.f32.mrf.mxu1  ;;  %v362_v2 = vmax.f32 %v346_v52, 0.0 }
  0xf1   :  { %v357_v61 = vmax.f32 %v341_v55, 0.0  ;;  %v365_v62 = vmax.f32 %v349_v56, 0.0  ;;  %v339_v63 = vadd.f32 %v466_v16, %v232_v59  ;;  %v347_v0 = vadd.f32 %v466_v16, %v264_v60 }
  0xf3   :  { %v517_v3 = vpack.c.bf16 %v357_v61, %v356_v57  ;;  %v537_v4 = vpack.c.bf16 %v365_v62, %v364_v58  ;;  %v355_v5 = vmax.f32 %v339_v63, 0.0  ;;  %v363_v6 = vmax.f32 %v347_v0, 0.0 }
  0xf5   :  { %541 = vst [vmem:[%s724_s3 + $0x18] sm:$0xff] %v517_v3   ;;  %545 = vst [vmem:[%s724_s3 + $0x38] sm:$0xff] %v537_v4   ;;  %v512_v7 = vpack.c.bf16 %v355_v5, %v354_v1  ;;  %v532_v8 = vpack.c.bf16 %v363_v6, %v362_v2 }
  0xf7   :  { %540 = vst [vmem:[%s724_s3 + $0x10] sm:$0xff] %v512_v7   ;;  %544 = vst [vmem:[%s724_s3 + $0x30] sm:$0xff] %v532_v8  }

// kernel: _lambda_.16
= control target key start
LH: loop header
LB: loop body
LE: loop exit
PB: predicated region body
PF: predicated region fallthrough
CT: control target
= control target key end

     0   :  { %s2251_s1 = inlined_call_operand.vmem [shape: bf16[128,128], index: 1, kind: input, shape index: {}]   ;;  %s2252_s0 = inlined_call_operand.vmem [shape: bf16[512,128], index: 0, kind: input, shape index: {}]   ;;  %s2253_s2 = inlined_call_operand.vmem [shape: f32[1,128], index: 2, kind: input, shape index: {}]   ;;  %s2254_s3 = inlined_call_operand.vmem [shape: bf16[512,128], index: 3, kind: output, shape index: {}]  }
   0x1   :  { %v1906_v0 = vld [vmem:[%s2251_s1 + $0x38] sm:$0xff]   ;;  %v1907_v1 = vld [vmem:[%s2251_s1 + $0x30] sm:$0xff]   ;;  %v1908_v2 = vld [vmem:[%s2251_s1 + $0x28] sm:$0xff]  }
   0x2   :  { %1810 = vmatprep.subr.bf16.mxu0 %v1906_v0  ;;  %1890 = vmatprep.subr.bf16.mxu1 %v1906_v0  ;;  %v1909_v3 = vld [vmem:[%s2251_s1 + $0x20] sm:$0xff]   ;;  %v1910_v6 = vld [vmem:[%s2251_s1 + $0x18] sm:$0xff]   ;;  %v1911_v7 = vld [vmem:[%s2251_s1 + $0x10] sm:$0xff]  }
   0x3   :  { %1811 = vmatpush3.bf16.msra.mxu0 %v1906_v0  ;;  %1898 = vmatpush3.bf16.msra.mxu1 %v1906_v0  ;;  %v1914_v4 = vld [vmem:[%s2252_s0] sm:$0xff]   ;;  %v1912_v8 = vld [vmem:[%s2251_s1 + $0x8] sm:$0xff]   ;;  %v1918_v12 = vld [vmem:[%s2252_s0 + $0x10] sm:$0xff]  }
   0x4   :  { %1812 = vmatprep.subr.bf16.mxu0 %v1907_v1  ;;  %1891 = vmatprep.subr.bf16.mxu1 %v1907_v1  ;;  %v1915_v5 = vld [vmem:[%s2252_s0 + $0x80] sm:$0xff]   ;;  %v1916_v10 = vld [vmem:[%s2252_s0 + $0x8] sm:$0xff]   ;;  %v1919_v13 = vld [vmem:[%s2252_s0 + $0x90] sm:$0xff]  }
   0x5   :  { %1826 = vmatprep.mubr.bf16.mxu0 %v1914_v4  ;;  %1858 = vmatprep.mubr.bf16.mxu1 %v1915_v5  ;;  %v1913_v9 = vld [vmem:[%s2251_s1] sm:$0xff]   ;;  %v1917_v11 = vld [vmem:[%s2252_s0 + $0x88] sm:$0xff]   ;;  %v1920_v14 = vld [vmem:[%s2252_s0 + $0x18] sm:$0xff]  }
   0x6   :  { %v1921_v15 = vld [vmem:[%s2252_s0 + $0x98] sm:$0xff]   ;;  %v1922_v16 = vld [vmem:[%s2252_s0 + $0x20] sm:$0xff]   ;;  %v1924_v18 = vld [vmem:[%s2252_s0 + $0x28] sm:$0xff]  }
   0x7   :  { %1813 = vmatpush3.bf16.msra.mxu0 %v1907_v1  ;;  %1899 = vmatpush3.bf16.msra.mxu1 %v1907_v1  ;;  %v1923_v17 = vld [vmem:[%s2252_s0 + $0xa0] sm:$0xff]   ;;  %v1925_v19 = vld [vmem:[%s2252_s0 + $0xa8] sm:$0xff]   ;;  %v1926_v20 = vld [vmem:[%s2252_s0 + $0x30] sm:$0xff]  }
   0x8   :  { %1814 = vmatprep.subr.bf16.mxu0 %v1908_v2  ;;  %1892 = vmatprep.subr.bf16.mxu1 %v1908_v2  ;;  %v1927_v21 = vld [vmem:[%s2252_s0 + $0xb0] sm:$0xff]   ;;  %v1928_v22 = vld [vmem:[%s2252_s0 + $0x38] sm:$0xff]   ;;  %v1930_v24 = vld [vmem:[%s2252_s0 + $0x40] sm:$0xff]  }
   0x9   :  { %v1929_v23 = vld [vmem:[%s2252_s0 + $0xb8] sm:$0xff]   ;;  %v1931_v25 = vld [vmem:[%s2252_s0 + $0xc0] sm:$0xff]   ;;  %v1932_v26 = vld [vmem:[%s2252_s0 + $0x48] sm:$0xff]  }
   0xa   :  { %v1933_v27 = vld [vmem:[%s2252_s0 + $0xc8] sm:$0xff]   ;;  %v1934_v28 = vld [vmem:[%s2252_s0 + $0x50] sm:$0xff]   ;;  %v1936_v30 = vld [vmem:[%s2252_s0 + $0x58] sm:$0xff]  }
   0xb   :  { %1815 = vmatpush3.bf16.msra.mxu0 %v1908_v2  ;;  %1900 = vmatpush3.bf16.msra.mxu1 %v1908_v2  ;;  %v1935_v29 = vld [vmem:[%s2252_s0 + $0xd0] sm:$0xff]   ;;  %v1937_v31 = vld [vmem:[%s2252_s0 + $0xd8] sm:$0xff]   ;;  %v1938_v32 = vld [vmem:[%s2252_s0 + $0x60] sm:$0xff]  }
   0xc   :  { %1816 = vmatprep.subr.bf16.mxu0 %v1909_v3  ;;  %1893 = vmatprep.subr.bf16.mxu1 %v1909_v3  ;;  %v1939_v33 = vld [vmem:[%s2252_s0 + $0xe0] sm:$0xff]   ;;  %v1940_v34 = vld [vmem:[%s2252_s0 + $0x68] sm:$0xff]   ;;  %v1942_v36 = vld [vmem:[%s2252_s0 + $0x70] sm:$0xff]  }
   0xd   :  { %v1941_v35 = vld [vmem:[%s2252_s0 + $0xe8] sm:$0xff]   ;;  %v1943_v37 = vld [vmem:[%s2252_s0 + $0xf0] sm:$0xff]   ;;  %v1944_v38 = vld [vmem:[%s2252_s0 + $0x78] sm:$0xff]  }
   0xe   :  { %v1945_v39 = vld [vmem:[%s2252_s0 + $0xf8] sm:$0xff]   ;;  %v2089_v40 = vld [vmem:[%s2253_s2] ss:$0 sm:$0xff] }
   0xf   :  { %1817 = vmatpush3.bf16.msra.mxu0 %v1909_v3  ;;  %1901 = vmatpush3.bf16.msra.mxu1 %v1909_v3 }
  0x10   :  { %1818 = vmatprep.subr.bf16.mxu0 %v1910_v6  ;;  %1894 = vmatprep.subr.bf16.mxu1 %v1910_v6 }
  0x13   :  { %1819 = vmatpush3.bf16.msra.mxu0 %v1910_v6  ;;  %1902 = vmatpush3.bf16.msra.mxu1 %v1910_v6 }
  0x14   :  { %1820 = vmatprep.subr.bf16.mxu0 %v1911_v7  ;;  %1895 = vmatprep.subr.bf16.mxu1 %v1911_v7 }
  0x17   :  { %1821 = vmatpush3.bf16.msra.mxu0 %v1911_v7  ;;  %1903 = vmatpush3.bf16.msra.mxu1 %v1911_v7 }
  0x18   :  { %1822 = vmatprep.subr.bf16.mxu0 %v1912_v8  ;;  %1896 = vmatprep.subr.bf16.mxu1 %v1912_v8 }
  0x1b   :  { %1823 = vmatpush3.bf16.msra.mxu0 %v1912_v8  ;;  %1904 = vmatpush3.bf16.msra.mxu1 %v1912_v8 }
  0x1c   :  { %1824 = vmatprep.subr.bf16.mxu0 %v1913_v9  ;;  %1897 = vmatprep.subr.bf16.mxu1 %v1913_v9 }
  0x1f   :  { %1825 = vmatpush3.bf16.msra.mxu0 %v1913_v9  ;;  %1905 = vmatpush3.bf16.msra.mxu1 %v1913_v9 }
  0x22   :  { %1827 = vmatmul.mubr.bf16.vlgmr.msra.gmra.mxu0 %v1916_v10  ;;  %1859 = vmatmul.mubr.bf16.vlgmr.msra.gmra.mxu1 %v1917_v11 }
  0x23   :  { %1830 = vmatprep.mubr.bf16.mxu0 %v1918_v12  ;;  %1862 = vmatprep.mubr.bf16.mxu1 %v1919_v13 }
  0x2a   :  { %1831 = vmatmul.mubr.bf16.gmra.mxu0 %v1920_v14  ;;  %1863 = vmatmul.mubr.bf16.gmra.mxu1 %v1921_v15 }
  0x2b   :  { %1834 = vmatprep.mubr.bf16.mxu0 %v1922_v16  ;;  %1866 = vmatprep.mubr.bf16.mxu1 %v1923_v17 }
  0x32   :  { %1835 = vmatmul.mubr.bf16.gmra.mxu0 %v1924_v18  ;;  %1867 = vmatmul.mubr.bf16.gmra.mxu1 %v1925_v19 }
  0x33   :  { %1838 = vmatprep.mubr.bf16.mxu0 %v1926_v20  ;;  %1870 = vmatprep.mubr.bf16.mxu1 %v1927_v21 }
  0x3a   :  { %1839 = vmatmul.mubr.bf16.gmra.mxu0 %v1928_v22  ;;  %1871 = vmatmul.mubr.bf16.gmra.mxu1 %v1929_v23 }
  0x3b   :  { %1842 = vmatprep.mubr.bf16.mxu0 %v1930_v24  ;;  %1874 = vmatprep.mubr.bf16.mxu1 %v1931_v25 }
  0x42   :  { %1843 = vmatmul.mubr.bf16.gmra.mxu0 %v1932_v26  ;;  %1875 = vmatmul.mubr.bf16.gmra.mxu1 %v1933_v27 }
  0x43   :  { %1846 = vmatprep.mubr.bf16.mxu0 %v1934_v28  ;;  %1878 = vmatprep.mubr.bf16.mxu1 %v1935_v29 }
  0x4a   :  { %1847 = vmatmul.mubr.bf16.gmra.mxu0 %v1936_v30  ;;  %1879 = vmatmul.mubr.bf16.gmra.mxu1 %v1937_v31 }
  0x4b   :  { %1850 = vmatprep.mubr.bf16.mxu0 %v1938_v32  ;;  %1882 = vmatprep.mubr.bf16.mxu1 %v1939_v33 }
  0x52   :  { %1851 = vmatmul.mubr.bf16.gmra.mxu0 %v1940_v34  ;;  %1883 = vmatmul.mubr.bf16.gmra.mxu1 %v1941_v35 }
  0x53   :  { %1854 = vmatprep.mubr.bf16.mxu0 %v1942_v36  ;;  %1886 = vmatprep.mubr.bf16.mxu1 %v1943_v37 }
  0x5a   :  { %1855 = vmatmul.mubr.bf16.gmra.mxu0 %v1944_v38  ;;  %1887 = vmatmul.mubr.bf16.gmra.mxu1 %v1945_v39 }
  0xe2   :  { %v1828_v41 = vpop.f32.mrf.mxu0  ;;  %v1860_v42 = vpop.f32.mrf.mxu1 }
  0xe3   :  { %v960_v43 = vadd.f32 %v1828_v41, %v2089_v40  ;;  %v992_v44 = vadd.f32 %v1860_v42, %v2089_v40 }
  0xe4   :  { %v501_v45 = vpop.f32.mrf.mxu0  ;;  %v629_v46 = vpop.f32.mrf.mxu1 }
  0xe5   :  { %v958_v47 = vadd.f32 %v2089_v40, %v501_v45  ;;  %v990_v48 = vadd.f32 %v2089_v40, %v629_v46  ;;  %v1024_v53 = vmax.f32 %v960_v43, 0.0  ;;  %v1056_v54 = vmax.f32 %v992_v44, 0.0 }
  0xe6   :  { %v1829_v49 = vpop.f32.mrf.mxu0  ;;  %v1861_v50 = vpop.f32.mrf.mxu1 }
  0xe7   :  { %v961_v51 = vadd.f32 %v1829_v49, %v2089_v40  ;;  %v993_v52 = vadd.f32 %v1861_v50, %v2089_v40  ;;  %v1022_v61 = vmax.f32 %v958_v47, 0.0  ;;  %v1054_v62 = vmax.f32 %v990_v48, 0.0 }
  0xe8   :  { %v504_v55 = vpop.f32.mrf.mxu0  ;;  %v632_v56 = vpop.f32.mrf.mxu1 }
  0xe9   :  { %v1025_v57 = vmax.f32 %v961_v51, 0.0  ;;  %v1057_v58 = vmax.f32 %v993_v52, 0.0  ;;  %v959_v59 = vadd.f32 %v2089_v40, %v504_v55  ;;  %v991_v60 = vadd.f32 %v2089_v40, %v632_v56 }
  0xea   :  { %v1832_v63 = vpop.f32.mrf.mxu0  ;;  %v1864_v0 = vpop.f32.mrf.mxu1 }
  0xeb   :  { %v1587_v1 = vpack.c.bf16 %v1025_v57, %v1024_v53  ;;  %v1667_v2 = vpack.c.bf16 %v1057_v58, %v1056_v54  ;;  %v1023_v3 = vmax.f32 %v959_v59, 0.0  ;;  %v1055_v4 = vmax.f32 %v991_v60, 0.0 }
  0xec   :  { %v964_v5 = vadd.f32 %v1832_v63, %v2089_v40  ;;  %v996_v6 = vadd.f32 %v1864_v0, %v2089_v40  ;;  %v517_v7 = vpop.f32.mrf.mxu0  ;;  %v645_v8 = vpop.f32.mrf.mxu1 }
  0xed   :  { %1739 = vst [vmem:[%s2254_s3 + $0x8] sm:$0xff] %v1587_v1   ;;  %1755 = vst [vmem:[%s2254_s3 + $0x88] sm:$0xff] %v1667_v2   ;;  %v1582_v9 = vpack.c.bf16 %v1023_v3, %v1022_v61  ;;  %v1662_v10 = vpack.c.bf16 %v1055_v4, %v1054_v62  ;;  %v962_v11 = vadd.f32 %v2089_v40, %v517_v7 }
  0xee   :  { %v994_v12 = vadd.f32 %v2089_v40, %v645_v8  ;;  %v1833_v13 = vpop.f32.mrf.mxu0  ;;  %v1865_v14 = vpop.f32.mrf.mxu1  ;;  %v1028_v17 = vmax.f32 %v964_v5, 0.0  ;;  %v1060_v18 = vmax.f32 %v996_v6, 0.0 }
  0xef   :  { %1583 = vst [vmem:[%s2254_s3] sm:$0xff] %v1582_v9   ;;  %1754 = vst [vmem:[%s2254_s3 + $0x80] sm:$0xff] %v1662_v10   ;;  %v965_v15 = vadd.f32 %v1833_v13, %v2089_v40  ;;  %v997_v16 = vadd.f32 %v1865_v14, %v2089_v40  ;;  %v1026_v25 = vmax.f32 %v962_v11, 0.0 }
  0xf0   :  { %v520_v19 = vpop.f32.mrf.mxu0  ;;  %v648_v20 = vpop.f32.mrf.mxu1  ;;  %v1058_v26 = vmax.f32 %v994_v12, 0.0 }
  0xf1   :  { %v1029_v21 = vmax.f32 %v965_v15, 0.0  ;;  %v1061_v22 = vmax.f32 %v997_v16, 0.0  ;;  %v963_v23 = vadd.f32 %v2089_v40, %v520_v19  ;;  %v995_v24 = vadd.f32 %v2089_v40, %v648_v20 }
  0xf2   :  { %v1836_v27 = vpop.f32.mrf.mxu0  ;;  %v1868_v28 = vpop.f32.mrf.mxu1 }
  0xf3   :  { %v1597_v29 = vpack.c.bf16 %v1029_v21, %v1028_v17  ;;  %v1677_v30 = vpack.c.bf16 %v1061_v22, %v1060_v18  ;;  %v1027_v31 = vmax.f32 %v963_v23, 0.0  ;;  %v1059_v32 = vmax.f32 %v995_v24, 0.0 }
  0xf4   :  { %v968_v33 = vadd.f32 %v1836_v27, %v2089_v40  ;;  %v1000_v34 = vadd.f32 %v1868_v28, %v2089_v40  ;;  %v533_v35 = vpop.f32.mrf.mxu0  ;;  %v661_v36 = vpop.f32.mrf.mxu1 }
  0xf5   :  { %1741 = vst [vmem:[%s2254_s3 + $0x18] sm:$0xff] %v1597_v29   ;;  %1757 = vst [vmem:[%s2254_s3 + $0x98] sm:$0xff] %v1677_v30   ;;  %v1592_v37 = vpack.c.bf16 %v1027_v31, %v1026_v25  ;;  %v1672_v38 = vpack.c.bf16 %v1059_v32, %v1058_v26  ;;  %v966_v39 = vadd.f32 %v2089_v40, %v533_v35 }
  0xf6   :  { %v998_v41 = vadd.f32 %v2089_v40, %v661_v36  ;;  %v1837_v42 = vpop.f32.mrf.mxu0  ;;  %v1869_v43 = vpop.f32.mrf.mxu1  ;;  %v1032_v46 = vmax.f32 %v968_v33, 0.0  ;;  %v1064_v47 = vmax.f32 %v1000_v34, 0.0 }
  0xf7   :  { %1740 = vst [vmem:[%s2254_s3 + $0x10] sm:$0xff] %v1592_v37   ;;  %1756 = vst [vmem:[%s2254_s3 + $0x90] sm:$0xff] %v1672_v38   ;;  %v969_v44 = vadd.f32 %v1837_v42, %v2089_v40  ;;  %v1001_v45 = vadd.f32 %v1869_v43, %v2089_v40  ;;  %v1030_v54 = vmax.f32 %v966_v39, 0.0 }
  0xf8   :  { %v536_v48 = vpop.f32.mrf.mxu0  ;;  %v664_v49 = vpop.f32.mrf.mxu1  ;;  %v1062_v55 = vmax.f32 %v998_v41, 0.0 }
  0xf9   :  { %v1033_v50 = vmax.f32 %v969_v44, 0.0  ;;  %v1065_v51 = vmax.f32 %v1001_v45, 0.0  ;;  %v967_v52 = vadd.f32 %v2089_v40, %v536_v48  ;;  %v999_v53 = vadd.f32 %v2089_v40, %v664_v49 }
  0xfa   :  { %v1840_v56 = vpop.f32.mrf.mxu0  ;;  %v1872_v57 = vpop.f32.mrf.mxu1 }
  0xfb   :  { %v1607_v58 = vpack.c.bf16 %v1033_v50, %v1032_v46  ;;  %v1687_v59 = vpack.c.bf16 %v1065_v51, %v1064_v47  ;;  %v1031_v60 = vmax.f32 %v967_v52, 0.0  ;;  %v1063_v61 = vmax.f32 %v999_v53, 0.0 }
  0xfc   :  { %v972_v62 = vadd.f32 %v1840_v56, %v2089_v40  ;;  %v1004_v63 = vadd.f32 %v1872_v57, %v2089_v40  ;;  %v549_v0 = vpop.f32.mrf.mxu0  ;;  %v677_v1 = vpop.f32.mrf.mxu1 }
  0xfd   :  { %1743 = vst [vmem:[%s2254_s3 + $0x28] sm:$0xff] %v1607_v58   ;;  %1759 = vst [vmem:[%s2254_s3 + $0xa8] sm:$0xff] %v1687_v59   ;;  %v1602_v2 = vpack.c.bf16 %v1031_v60, %v1030_v54  ;;  %v1682_v3 = vpack.c.bf16 %v1063_v61, %v1062_v55  ;;  %v970_v4 = vadd.f32 %v2089_v40, %v549_v0 }
  0xfe   :  { %v1002_v5 = vadd.f32 %v2089_v40, %v677_v1  ;;  %v1841_v6 = vpop.f32.mrf.mxu0  ;;  %v1873_v7 = vpop.f32.mrf.mxu1  ;;  %v1036_v10 = vmax.f32 %v972_v62, 0.0  ;;  %v1068_v11 = vmax.f32 %v1004_v63, 0.0 }
  0xff   :  { %1742 = vst [vmem:[%s2254_s3 + $0x20] sm:$0xff] %v1602_v2   ;;  %1758 = vst [vmem:[%s2254_s3 + $0xa0] sm:$0xff] %v1682_v3   ;;  %v973_v8 = vadd.f32 %v1841_v6, %v2089_v40  ;;  %v1005_v9 = vadd.f32 %v1873_v7, %v2089_v40  ;;  %v1034_v18 = vmax.f32 %v970_v4, 0.0 }
 0x100   :  { %v552_v12 = vpop.f32.mrf.mxu0  ;;  %v680_v13 = vpop.f32.mrf.mxu1  ;;  %v1066_v19 = vmax.f32 %v1002_v5, 0.0 }
 0x101   :  { %v1037_v14 = vmax.f32 %v973_v8, 0.0  ;;  %v1069_v15 = vmax.f32 %v1005_v9, 0.0  ;;  %v971_v16 = vadd.f32 %v2089_v40, %v552_v12  ;;  %v1003_v17 = vadd.f32 %v2089_v40, %v680_v13 }
 0x102   :  { %v1844_v20 = vpop.f32.mrf.mxu0  ;;  %v1876_v21 = vpop.f32.mrf.mxu1 }
 0x103   :  { %v1617_v22 = vpack.c.bf16 %v1037_v14, %v1036_v10  ;;  %v1697_v23 = vpack.c.bf16 %v1069_v15, %v1068_v11  ;;  %v1035_v24 = vmax.f32 %v971_v16, 0.0  ;;  %v1067_v25 = vmax.f32 %v1003_v17, 0.0 }
 0x104   :  { %v976_v26 = vadd.f32 %v1844_v20, %v2089_v40  ;;  %v1008_v27 = vadd.f32 %v1876_v21, %v2089_v40  ;;  %v565_v28 = vpop.f32.mrf.mxu0  ;;  %v693_v29 = vpop.f32.mrf.mxu1 }
 0x105   :  { %1745 = vst [vmem:[%s2254_s3 + $0x38] sm:$0xff] %v1617_v22   ;;  %1761 = vst [vmem:[%s2254_s3 + $0xb8] sm:$0xff] %v1697_v23   ;;  %v1612_v30 = vpack.c.bf16 %v1035_v24, %v1034_v18  ;;  %v1692_v31 = vpack.c.bf16 %v1067_v25, %v1066_v19  ;;  %v974_v32 = vadd.f32 %v2089_v40, %v565_v28 }
 0x106   :  { %v1006_v33 = vadd.f32 %v2089_v40, %v693_v29  ;;  %v1845_v34 = vpop.f32.mrf.mxu0  ;;  %v1877_v35 = vpop.f32.mrf.mxu1  ;;  %v1040_v38 = vmax.f32 %v976_v26, 0.0  ;;  %v1072_v39 = vmax.f32 %v1008_v27, 0.0 }
 0x107   :  { %1744 = vst [vmem:[%s2254_s3 + $0x30] sm:$0xff] %v1612_v30   ;;  %1760 = vst [vmem:[%s2254_s3 + $0xb0] sm:$0xff] %v1692_v31   ;;  %v977_v36 = vadd.f32 %v1845_v34, %v2089_v40  ;;  %v1009_v37 = vadd.f32 %v1877_v35, %v2089_v40  ;;  %v1038_v47 = vmax.f32 %v974_v32, 0.0 }
 0x108   :  { %v568_v41 = vpop.f32.mrf.mxu0  ;;  %v696_v42 = vpop.f32.mrf.mxu1  ;;  %v1070_v48 = vmax.f32 %v1006_v33, 0.0 }
 0x109   :  { %v1041_v43 = vmax.f32 %v977_v36, 0.0  ;;  %v1073_v44 = vmax.f32 %v1009_v37, 0.0  ;;  %v975_v45 = vadd.f32 %v2089_v40, %v568_v41  ;;  %v1007_v46 = vadd.f32 %v2089_v40, %v696_v42 }
 0x10a   :  { %v1848_v49 = vpop.f32.mrf.mxu0  ;;  %v1880_v50 = vpop.f32.mrf.mxu1 }
 0x10b   :  { %v1627_v51 = vpack.c.bf16 %v1041_v43, %v1040_v38  ;;  %v1707_v52 = vpack.c.bf16 %v1073_v44, %v1072_v39  ;;  %v1039_v53 = vmax.f32 %v975_v45, 0.0  ;;  %v1071_v54 = vmax.f32 %v1007_v46, 0.0 }
 0x10c   :  { %v980_v55 = vadd.f32 %v1848_v49, %v2089_v40  ;;  %v1012_v56 = vadd.f32 %v1880_v50, %v2089_v40  ;;  %v581_v57 = vpop.f32.mrf.mxu0  ;;  %v709_v58 = vpop.f32.mrf.mxu1 }
 0x10d   :  { %1747 = vst [vmem:[%s2254_s3 + $0x48] sm:$0xff] %v1627_v51   ;;  %1763 = vst [vmem:[%s2254_s3 + $0xc8] sm:$0xff] %v1707_v52   ;;  %v1622_v59 = vpack.c.bf16 %v1039_v53, %v1038_v47  ;;  %v1702_v60 = vpack.c.bf16 %v1071_v54, %v1070_v48  ;;  %v978_v61 = vadd.f32 %v2089_v40, %v581_v57 }
 0x10e   :  { %v1010_v62 = vadd.f32 %v2089_v40, %v709_v58  ;;  %v1849_v63 = vpop.f32.mrf.mxu0  ;;  %v1881_v0 = vpop.f32.mrf.mxu1  ;;  %v1044_v3 = vmax.f32 %v980_v55, 0.0  ;;  %v1076_v4 = vmax.f32 %v1012_v56, 0.0 }
 0x10f   :  { %1746 = vst [vmem:[%s2254_s3 + $0x40] sm:$0xff] %v1622_v59   ;;  %1762 = vst [vmem:[%s2254_s3 + $0xc0] sm:$0xff] %v1702_v60   ;;  %v981_v1 = vadd.f32 %v1849_v63, %v2089_v40  ;;  %v1013_v2 = vadd.f32 %v1881_v0, %v2089_v40  ;;  %v1042_v11 = vmax.f32 %v978_v61, 0.0 }
 0x110   :  { %v584_v5 = vpop.f32.mrf.mxu0  ;;  %v712_v6 = vpop.f32.mrf.mxu1  ;;  %v1074_v12 = vmax.f32 %v1010_v62, 0.0 }
 0x111   :  { %v1045_v7 = vmax.f32 %v981_v1, 0.0  ;;  %v1077_v8 = vmax.f32 %v1013_v2, 0.0  ;;  %v979_v9 = vadd.f32 %v2089_v40, %v584_v5  ;;  %v1011_v10 = vadd.f32 %v2089_v40, %v712_v6 }
 0x112   :  { %v1852_v13 = vpop.f32.mrf.mxu0  ;;  %v1884_v14 = vpop.f32.mrf.mxu1 }
 0x113   :  { %v1637_v15 = vpack.c.bf16 %v1045_v7, %v1044_v3  ;;  %v1717_v16 = vpack.c.bf16 %v1077_v8, %v1076_v4  ;;  %v1043_v17 = vmax.f32 %v979_v9, 0.0  ;;  %v1075_v18 = vmax.f32 %v1011_v10, 0.0 }
 0x114   :  { %v984_v19 = vadd.f32 %v1852_v13, %v2089_v40  ;;  %v1016_v20 = vadd.f32 %v1884_v14, %v2089_v40  ;;  %v597_v21 = vpop.f32.mrf.mxu0  ;;  %v725_v22 = vpop.f32.mrf.mxu1 }
 0x115   :  { %1749 = vst [vmem:[%s2254_s3 + $0x58] sm:$0xff] %v1637_v15   ;;  %1765 = vst [vmem:[%s2254_s3 + $0xd8] sm:$0xff] %v1717_v16   ;;  %v1632_v23 = vpack.c.bf16 %v1043_v17, %v1042_v11  ;;  %v1712_v24 = vpack.c.bf16 %v1075_v18, %v1074_v12  ;;  %v982_v25 = vadd.f32 %v2089_v40, %v597_v21 }
 0x116   :  { %v1014_v26 = vadd.f32 %v2089_v40, %v725_v22  ;;  %v1853_v27 = vpop.f32.mrf.mxu0  ;;  %v1885_v28 = vpop.f32.mrf.mxu1  ;;  %v1048_v31 = vmax.f32 %v984_v19, 0.0  ;;  %v1080_v32 = vmax.f32 %v1016_v20, 0.0 }
 0x117   :  { %1748 = vst [vmem:[%s2254_s3 + $0x50] sm:$0xff] %v1632_v23   ;;  %1764 = vst [vmem:[%s2254_s3 + $0xd0] sm:$0xff] %v1712_v24   ;;  %v985_v29 = vadd.f32 %v1853_v27, %v2089_v40  ;;  %v1017_v30 = vadd.f32 %v1885_v28, %v2089_v40  ;;  %v1046_v39 = vmax.f32 %v982_v25, 0.0 }
 0x118   :  { %v600_v33 = vpop.f32.mrf.mxu0  ;;  %v728_v34 = vpop.f32.mrf.mxu1  ;;  %v1078_v41 = vmax.f32 %v1014_v26, 0.0 }
 0x119   :  { %v1049_v35 = vmax.f32 %v985_v29, 0.0  ;;  %v1081_v36 = vmax.f32 %v1017_v30, 0.0  ;;  %v983_v37 = vadd.f32 %v2089_v40, %v600_v33  ;;  %v1015_v38 = vadd.f32 %v2089_v40, %v728_v34 }
 0x11a   :  { %v1856_v42 = vpop.f32.mrf.mxu0  ;;  %v1888_v43 = vpop.f32.mrf.mxu1 }
 0x11b   :  { %v1647_v44 = vpack.c.bf16 %v1049_v35, %v1048_v31  ;;  %v1727_v45 = vpack.c.bf16 %v1081_v36, %v1080_v32  ;;  %v1047_v46 = vmax.f32 %v983_v37, 0.0  ;;  %v1079_v47 = vmax.f32 %v1015_v38, 0.0 }
 0x11c   :  { %v988_v48 = vadd.f32 %v1856_v42, %v2089_v40  ;;  %v1020_v49 = vadd.f32 %v1888_v43, %v2089_v40  ;;  %v613_v50 = vpop.f32.mrf.mxu0  ;;  %v741_v51 = vpop.f32.mrf.mxu1 }
 0x11d   :  { %1751 = vst [vmem:[%s2254_s3 + $0x68] sm:$0xff] %v1647_v44   ;;  %1767 = vst [vmem:[%s2254_s3 + $0xe8] sm:$0xff] %v1727_v45   ;;  %v1642_v52 = vpack.c.bf16 %v1047_v46, %v1046_v39  ;;  %v1722_v53 = vpack.c.bf16 %v1079_v47, %v1078_v41  ;;  %v986_v54 = vadd.f32 %v2089_v40, %v613_v50 }
 0x11e   :  { %v1018_v55 = vadd.f32 %v2089_v40, %v741_v51  ;;  %v1857_v56 = vpop.f32.mrf.mxu0  ;;  %v1889_v57 = vpop.f32.mrf.mxu1  ;;  %v1052_v60 = vmax.f32 %v988_v48, 0.0  ;;  %v1084_v61 = vmax.f32 %v1020_v49, 0.0 }
 0x11f   :  { %1750 = vst [vmem:[%s2254_s3 + $0x60] sm:$0xff] %v1642_v52   ;;  %1766 = vst [vmem:[%s2254_s3 + $0xe0] sm:$0xff] %v1722_v53   ;;  %v989_v58 = vadd.f32 %v1857_v56, %v2089_v40  ;;  %v1021_v59 = vadd.f32 %v1889_v57, %v2089_v40  ;;  %v1050_v4 = vmax.f32 %v986_v54, 0.0 }
 0x120   :  { %v616_v62 = vpop.f32.mrf.mxu0  ;;  %v744_v63 = vpop.f32.mrf.mxu1  ;;  %v1082_v5 = vmax.f32 %v1018_v55, 0.0 }
 0x121   :  { %v1053_v0 = vmax.f32 %v989_v58, 0.0  ;;  %v1085_v1 = vmax.f32 %v1021_v59, 0.0  ;;  %v987_v2 = vadd.f32 %v2089_v40, %v616_v62  ;;  %v1019_v3 = vadd.f32 %v2089_v40, %v744_v63 }
 0x123   :  { %v1657_v6 = vpack.c.bf16 %v1053_v0, %v1052_v60  ;;  %v1737_v7 = vpack.c.bf16 %v1085_v1, %v1084_v61  ;;  %v1051_v8 = vmax.f32 %v987_v2, 0.0  ;;  %v1083_v9 = vmax.f32 %v1019_v3, 0.0 }
 0x125   :  { %1753 = vst [vmem:[%s2254_s3 + $0x78] sm:$0xff] %v1657_v6   ;;  %1769 = vst [vmem:[%s2254_s3 + $0xf8] sm:$0xff] %v1737_v7   ;;  %v1652_v10 = vpack.c.bf16 %v1051_v8, %v1050_v4  ;;  %v1732_v11 = vpack.c.bf16 %v1083_v9, %v1082_v5 }
 0x127   :  { %1752 = vst [vmem:[%s2254_s3 + $0x70] sm:$0xff] %v1652_v10   ;;  %1768 = vst [vmem:[%s2254_s3 + $0xf0] sm:$0xff] %v1732_v11  }

// kernel: _lambda_.22
= control target key start
LH: loop header
LB: loop body
LE: loop exit
PB: predicated region body
PF: predicated region fallthrough
CT: control target
= control target key end

     0   :  { %s339_s1 = inlined_call_operand.vmem [shape: bf16[128,128], index: 1, kind: input, shape index: {}]   ;;  %s340_s0 = inlined_call_operand.vmem [shape: bf16[32,128], index: 0, kind: input, shape index: {}]   ;;  %s341_s2 = inlined_call_operand.vmem [shape: f32[1,128], index: 2, kind: input, shape index: {}]   ;;  %s342_s3 = inlined_call_operand.vmem [shape: bf16[32,128], index: 3, kind: output, shape index: {}]  }
   0x1   :  { %v270_v0 = vld [vmem:[%s339_s1 + $0x38] sm:$0xff]   ;;  %v271_v1 = vld [vmem:[%s339_s1 + $0x30] sm:$0xff]   ;;  %v272_v2 = vld [vmem:[%s339_s1 + $0x28] sm:$0xff]  }
   0x2   :  { %250 = vmatprep.subr.bf16.mxu0 %v270_v0  ;;  %v273_v3 = vld [vmem:[%s339_s1 + $0x20] sm:$0xff]   ;;  %v274_v5 = vld [vmem:[%s339_s1 + $0x18] sm:$0xff]   ;;  %v275_v6 = vld [vmem:[%s339_s1 + $0x10] sm:$0xff]  }
   0x3   :  { %251 = vmatpush3.bf16.msra.mxu0 %v270_v0  ;;  %v278_v4 = vld [vmem:[%s340_s0] sm:$0xff]   ;;  %v276_v7 = vld [vmem:[%s339_s1 + $0x8] sm:$0xff]  }
   0x4   :  { %252 = vmatprep.subr.bf16.mxu0 %v271_v1  ;;  %266 = vmatprep.mubr.bf16.mxu0 %v278_v4  ;;  %v277_v8 = vld [vmem:[%s339_s1] sm:$0xff]   ;;  %v279_v9 = vld [vmem:[%s340_s0 + $0x8] sm:$0xff]  }
   0x5   :  { %v220_v11 = vld [vmem:[%s341_s2] ss:$0 sm:$0xff] }
   0x7   :  { %253 = vmatpush3.bf16.msra.mxu0 %v271_v1 }
   0x8   :  { %254 = vmatprep.subr.bf16.mxu0 %v272_v2 }
   0xb   :  { %255 = vmatpush3.bf16.msra.mxu0 %v272_v2 }
   0xc   :  { %256 = vmatprep.subr.bf16.mxu0 %v273_v3 }
   0xf   :  { %257 = vmatpush3.bf16.msra.mxu0 %v273_v3 }
  0x10   :  { %258 = vmatprep.subr.bf16.mxu0 %v274_v5 }
  0x13   :  { %259 = vmatpush3.bf16.msra.mxu0 %v274_v5 }
  0x14   :  { %260 = vmatprep.subr.bf16.mxu0 %v275_v6 }
  0x17   :  { %261 = vmatpush3.bf16.msra.mxu0 %v275_v6 }
  0x18   :  { %262 = vmatprep.subr.bf16.mxu0 %v276_v7 }
  0x1b   :  { %263 = vmatpush3.bf16.msra.mxu0 %v276_v7 }
  0x1c   :  { %264 = vmatprep.subr.bf16.mxu0 %v277_v8 }
  0x1f   :  { %265 = vmatpush3.bf16.msra.mxu0 %v277_v8 }
  0x22   :  { %267 = vmatmul.mubr.bf16.vlgmr.msra.gmra.mxu0 %v279_v9 }
  0xe2   :  { %v268_v10 = vpop.f32.mrf.mxu0 }
  0xe3   :  { %v180_v13 = vadd.f32 %v268_v10, %v220_v11 }
  0xe4   :  { %v141_v12 = vpop.f32.mrf.mxu0 }
  0xe5   :  { %v178_v15 = vadd.f32 %v220_v11, %v141_v12  ;;  %v184_v18 = vmax.f32 %v180_v13, 0.0 }
  0xe6   :  { %v269_v14 = vpop.f32.mrf.mxu0 }
  0xe7   :  { %v181_v16 = vadd.f32 %v269_v14, %v220_v11  ;;  %v182_v21 = vmax.f32 %v178_v15, 0.0 }
  0xe8   :  { %v144_v17 = vpop.f32.mrf.mxu0 }
  0xe9   :  { %v185_v19 = vmax.f32 %v181_v16, 0.0  ;;  %v179_v20 = vadd.f32 %v220_v11, %v144_v17 }
  0xeb   :  { %v237_v22 = vpack.c.bf16 %v185_v19, %v184_v18  ;;  %v183_v23 = vmax.f32 %v179_v20, 0.0 }
  0xed   :  { %239 = vst [vmem:[%s342_s3 + $0x8] sm:$0xff] %v237_v22   ;;  %v232_v24 = vpack.c.bf16 %v183_v23, %v182_v21 }
  0xef   :  { %233 = vst [vmem:[%s342_s3] sm:$0xff] %v232_v24  }

// kernel: _lambda_.18
= control target key start
LH: loop header
LB: loop body
LE: loop exit
PB: predicated region body
PF: predicated region fallthrough
CT: control target
= control target key end

     0   :  { %s2577_s12 = smov 0   ;;  %s3157_s0 = inlined_call_operand.vmem [shape: bf16[2,176,128], index: 0, kind: input, shape index: {}]   ;;  %s3158_s1 = inlined_call_operand.vmem [shape: bf16[3,384,128], index: 1, kind: input, shape index: {}]   ;;  %s3159_s2 = inlined_call_operand.vmem [shape: f32[1,128], index: 2, kind: input, shape index: {}]   ;;  %s3160_s3 = inlined_call_operand.vmem [shape: bf16[2,128,128], index: 3, kind: output, shape index: {}]  }
   0x1 LB: > { %s1849_s13 = sadd.s32 4294967295, %s2555_s12   ;;  %p1853_p0 = scmp.ge.s32.totalorder %s2555_s12, 1  ;;  %s2555_s12 = sphi %s2577_s12, %s13_s12  }
   0x2   : > { %p137_p1 = scmp.lt.s32.totalorder %s2555_s12, 3 }
   0x4   : > { %p138_p2 = pnand %p1853_p0, %p137_p1 }
   0x5   : > { %p161_p3 = scmp.lt.s32.totalorder (!%p138_p2), %s1849_s13, 1 }
   0x6   : > { %141 = sbr.rel (%p138_p2) target bundleno = 409 (0x199), region = 32 }
   0xb   : > { %v2465_v0 = vld [vmem:[%s3158_s1 + $0x78] sm:$0xff]   ;;  %v2468_v3 = vld [vmem:[%s3158_s1 + $0x70] sm:$0xff]   ;;  %v2471_v6 = vld [vmem:[%s3158_s1 + $0x68] sm:$0xff]   ;;  %s3162_s13 = smov (!%p161_p3, %s1849_s13), 1  ;;  %vm355_vm0 = vcmask 1046528  }
   0xc   : > { %v2466_v1 = vld [vmem:[%s3158_s1 + $0xb8] sm:$0xff]   ;;  %2120 = vmatprep.subr.bf16.mxu0 %v2465_v0  ;;  %v2469_v4 = vld [vmem:[%s3158_s1 + $0xb0] sm:$0xff]   ;;  %v2472_v7 = vld [vmem:[%s3158_s1 + $0xa8] sm:$0xff]   ;;  %s2456_s23 = smul.u32 88, %s3162_s13  ;;  %vm257_vm1 = vsmask.f32 7424 }
   0xd   : > { %v2467_v2 = vld [vmem:[%s3158_s1 + $0x38] sm:$0xff]   ;;  %2360 = vmatprep.subr.bf16.mxu1 %v2466_v1  ;;  %v2470_v5 = vld [vmem:[%s3158_s1 + $0x30] sm:$0xff]   ;;  %v2473_v8 = vld [vmem:[%s3158_s1 + $0x28] sm:$0xff]   ;;  %s2056_s16 = sshll.u32 %s3162_s13, 6 }
   0xe   : > { %2121 = vmatpush3.bf16.msra.mxu0 %v2467_v2  ;;  %2361 = vmatpush3.bf16.msra.mxu1 %v2466_v1  ;;  %v2474_v9 = vld [vmem:[%s3158_s1 + $0x60] sm:$0xff]   ;;  %v2477_v12 = vld [vmem:[%s3158_s1 + $0x58] sm:$0xff]   ;;  %v2480_v15 = vld [vmem:[%s3158_s1 + $0x50] sm:$0xff]   ;;  %s2655_s5 = scalar_lea.vmem %s3157_s0, %s2456_s23  ;;  %s3102_s19 = scalar_lea.vmem %s3160_s3, %s2056_s16 }
   0xf   : > { %2122 = vmatprep.subr.bf16.mxu0 %v2468_v3  ;;  %2362 = vmatprep.subr.bf16.mxu1 %v2469_v4  ;;  %v2475_v10 = vld [vmem:[%s3158_s1 + $0xa0] sm:$0xff]   ;;  %v2478_v13 = vld [vmem:[%s3158_s1 + $0x98] sm:$0xff]   ;;  %v2481_v16 = vld [vmem:[%s3158_s1 + $0x90] sm:$0xff]  }
  0x10   : > { %v2476_v11 = vld [vmem:[%s3158_s1 + $0x20] sm:$0xff]   ;;  %v2479_v14 = vld [vmem:[%s3158_s1 + $0x18] sm:$0xff]   ;;  %v2482_v17 = vld [vmem:[%s3158_s1 + $0x10] sm:$0xff]  }
  0x11   : > { %v2483_v18 = vld [vmem:[%s3158_s1 + $0x48] sm:$0xff]   ;;  %v2486_v21 = vld [vmem:[%s3158_s1 + $0x40] sm:$0xff]   ;;  %v2672_v27 = vld [vmem:[%s2655_s5 + $0x10] sm:$0xff]  }
  0x12   : > { %2123 = vmatpush3.bf16.msra.mxu0 %v2470_v5  ;;  %2363 = vmatpush3.bf16.msra.mxu1 %v2469_v4  ;;  %v2484_v19 = vld [vmem:[%s3158_s1 + $0x88] sm:$0xff]   ;;  %v2487_v22 = vld [vmem:[%s3158_s1 + $0x80] sm:$0xff]   ;;  %v359_v35 = vrot.slane %v2672_v27, 1  ;;  %v2493_v39 = vld [vmem:[%s3158_s1 + $0x138] sm:$0xff]   ;;  %v274_v45 = vshll.u32 %v2672_v27, 16  ;;  %v278_v49 = vshrl.u32 %v2672_v27, 16 }
  0x13   : > { %2124 = vmatprep.subr.bf16.mxu0 %v2471_v6  ;;  %2364 = vmatprep.subr.bf16.mxu1 %v2472_v7  ;;  %v2485_v20 = vld [vmem:[%s3158_s1 + $0x8] sm:$0xff]   ;;  %v172_v23 = vld [vmem:[%s2655_s5] sm:$0xf]  ;;  %v173_v24 = vld [vmem:[%s2655_s5 + $0x4] sm:$0xf] }
  0x14   : > { %v1857_v25 = vcombine.low %v172_v23, %v173_v24  ;;  %v2669_v26 = vld [vmem:[%s2655_s5 + $0x8] sm:$0xff]   ;;  %v193_v28 = vld [vmem:[%s2655_s5] sm:$0xe]  ;;  %v2494_v40 = vld [vmem:[%s3158_s1 + $0x178] sm:$0xff]   ;;  %v276_v51 = vrot.slane %v274_v45, 1 }
  0x15   : > { %v2488_v29 = vld [vmem:[%s3158_s1] sm:$0xff]   ;;  %v266_v32 = vshll.u32 %v2669_v26, 16  ;;  %v1868_v33 = vcombine.low %v193_v28, %v173_v24  ;;  %v357_v34 = vrot.slane %v2669_v26, 1  ;;  %v270_v41 = vshrl.u32 %v2669_v26, 16  ;;  %v2495_v44 = vld [vmem:[%s3158_s1 + $0xf8] sm:$0xff]   ;;  %v2496_v47 = vld [vmem:[%s3158_s1 + $0x130] sm:$0xff]  }
  0x16   : > { %2125 = vmatpush3.bf16.msra.mxu0 %v2473_v8  ;;  %2365 = vmatpush3.bf16.msra.mxu1 %v2472_v7  ;;  %v259_v30 = vshrl.u32 %v1857_v25, 16  ;;  %v261_v31 = vshll.u32 %v1857_v25, 16  ;;  %v2702_v52 = vld [vmem:[%s2655_s5 + $0x18] sm:$0xff]   ;;  %v2705_v53 = vld [vmem:[%s2655_s5 + $0x20] sm:$0xff]   ;;  %v2497_v54 = vld [vmem:[%s3158_s1 + $0xf0] sm:$0xff]   ;;  %v280_v61 = vor.u32 %v278_v49, %v276_v51 }
  0x17   : > { %2126 = vmatprep.subr.bf16.mxu0 %v2474_v9  ;;  %2366 = vmatprep.subr.bf16.mxu1 %v2475_v10  ;;  %v268_v37 = vrot.slane %v266_v32, 1  ;;  %v356_v38 = vrot.slane %v1868_v33, 1  ;;  %v2694_v46 = vsel %vm355_vm0, %v357_v34, %v359_v35  ;;  %v361_v56 = vrot.slane %v2702_v52, 1  ;;  %v2501_v58 = vld [vmem:[%s3158_s1 + $0x170] sm:$0xff]   ;;  %v2500_v60 = vld [vmem:[%s3158_s1 + $0x128] sm:$0xff]   ;;  %v2503_v0 = vld [vmem:[%s3158_s1 + $0x120] sm:$0xff]  }
  0x18   : > { %v263_v36 = vrot.slane %v261_v31, 1  ;;  %v363_v57 = vrot.slane %v2705_v53, 1  ;;  %v282_v62 = vshll.u32 %v2702_v52, 16  ;;  %v2502_v63 = vld [vmem:[%s3158_s1 + $0xe8] sm:$0xff]   ;;  %v286_v4 = vshrl.u32 %v2702_v52, 16  ;;  %v2745_v6 = vld [vmem:[%s2655_s5 + $0x30] sm:$0xff]  }
  0x19   : > { %v358_v43 = vsel %vm355_vm0, %v356_v38, %v357_v34  ;;  %v272_v48 = vor.u32 %v270_v41, %v268_v37  ;;  %v2721_v59 = vsel %vm355_vm0, %v359_v35, %v361_v56  ;;  %v2738_v3 = vld [vmem:[%s2655_s5 + $0x28] sm:$0xff]   ;;  %v290_v7 = vshll.u32 %v2705_v53, 16  ;;  %v2519_v34 = vld [vmem:[%s3158_s1 + $0x158] sm:$0xff]   ;;  %v2517_v38 = vld [vmem:[%s3158_s1 + $0x100] sm:$0xff]  }
  0x1a   : > { %2127 = vmatpush3.bf16.msra.mxu0 %v2476_v11  ;;  %2367 = vmatpush3.bf16.msra.mxu1 %v2475_v10  ;;  %v264_v42 = vor.u32 %v263_v36, %v259_v30  ;;  %v284_v1 = vrot.slane %v282_v62, 1  ;;  %v2735_v2 = vsel %vm355_vm0, %v361_v56, %v363_v57  ;;  %v365_v8 = vrot.slane %v2738_v3, 1  ;;  %v2508_v9 = vld [vmem:[%s3158_s1 + $0x168] sm:$0xff]   ;;  %v2504_v10 = vld [vmem:[%s3158_s1 + $0xe0] sm:$0xff]   ;;  %v2520_v41 = vld [vmem:[%s3158_s1 + $0x150] sm:$0xff]  }
  0x1b   : > { %2128 = vmatprep.subr.bf16.mxu0 %v2477_v12  ;;  %2368 = vmatprep.subr.bf16.mxu1 %v2478_v13  ;;  %v2712_v55 = vsel %vm257_vm1, %v272_v48, %v276_v51  ;;  %v367_v12 = vrot.slane %v2745_v6, 1  ;;  %v298_v24 = vshll.u32 %v2738_v3, 16  ;;  %v2514_v31 = vld [vmem:[%s3158_s1 + $0x108] sm:$0xff]   ;;  %v2525_v45 = vld [vmem:[%s3158_s1 + $0x238] sm:$0xff]   ;;  %v2528_v51 = vld [vmem:[%s3158_s1 + $0x230] sm:$0xff]  }
  0x1c   : > { %v269_v50 = vsel %vm257_vm1, %v264_v42, %v268_v37  ;;  %2376 = vmatprep.mubr.bf16.mxu1 %v358_v43  ;;  %v2742_v5 = vsel %vm257_vm1, %v280_v61, %v284_v1  ;;  %v2759_v11 = vsel %vm355_vm0, %v363_v57, %v365_v8  ;;  %v2516_v36 = vld [vmem:[%s3158_s1 + $0xc8] sm:$0xff]   ;;  %v302_v37 = vshrl.u32 %v2738_v3, 16  ;;  %v2518_v42 = vld [vmem:[%s3158_s1 + $0xc0] sm:$0xff]   ;;  %v2523_v61 = vld [vmem:[%s3158_s1 + $0x1f8] sm:$0xff]  }
  0x1d   : > { %611 = vmatprep.mubr.bf16.mxu0 %v269_v50  ;;  %v300_v33 = vrot.slane %v298_v24, 1  ;;  %v2521_v50 = vld [vmem:[%s3158_s1 + $0x148] sm:$0xff]   ;;  %v2534_v62 = vld [vmem:[%s3158_s1 + $0x220] sm:$0xff]  }
  0x1e   : > { %2129 = vmatpush3.bf16.msra.mxu0 %v2479_v14  ;;  %2369 = vmatpush3.bf16.msra.mxu1 %v2478_v13  ;;  %v2507_v13 = vld [vmem:[%s3158_s1 + $0x118] sm:$0xff]   ;;  %v288_v14 = vor.u32 %v286_v4, %v284_v1  ;;  %v2531_v57 = vld [vmem:[%s3158_s1 + $0x228] sm:$0xff]  }
  0x1f   : > { %2130 = vmatprep.subr.bf16.mxu0 %v2480_v15  ;;  %2370 = vmatprep.subr.bf16.mxu1 %v2481_v16  ;;  %v292_v15 = vrot.slane %v290_v7, 1  ;;  %v304_v43 = vor.u32 %v302_v37, %v300_v33  ;;  %v2537_v4 = vld [vmem:[%s3158_s1 + $0x218] sm:$0xff]  }
  0x22   : > { %2131 = vmatpush3.bf16.msra.mxu0 %v2482_v17  ;;  %2371 = vmatpush3.bf16.msra.mxu1 %v2481_v16  ;;  %v2509_v16 = vld [vmem:[%s3158_s1 + $0xd8] sm:$0xff]   ;;  %v2510_v17 = vld [vmem:[%s3158_s1 + $0x110] sm:$0xff]  }
  0x23   : > { %2132 = vmatprep.subr.bf16.mxu0 %v2483_v18  ;;  %2372 = vmatprep.subr.bf16.mxu1 %v2484_v19  ;;  %v2773_v18 = vld [vmem:[%s2655_s5 + $0x38] sm:$0xff]  }
  0x24   : > { %v369_v23 = vrot.slane %v2773_v18, 1  ;;  %v314_v49 = vshll.u32 %v2773_v18, 16 }
  0x26   : > { %2133 = vmatpush3.bf16.msra.mxu0 %v2485_v20  ;;  %2373 = vmatpush3.bf16.msra.mxu1 %v2484_v19  ;;  %v2776_v19 = vsel %vm355_vm0, %v365_v8, %v367_v12  ;;  %v2779_v20 = vld [vmem:[%s2655_s5 + $0x40] sm:$0xff]   ;;  %v2793_v28 = vsel %vm355_vm0, %v367_v12, %v369_v23  ;;  %v316_v56 = vrot.slane %v314_v49, 1  ;;  %v2543_v49 = vld [vmem:[%s3158_s1 + $0x188] sm:$0xff]  }
  0x27   : > { %2134 = vmatprep.subr.bf16.mxu0 %v2486_v21  ;;  %2374 = vmatprep.subr.bf16.mxu1 %v2487_v22  ;;  %v294_v21 = vshrl.u32 %v2705_v53, 16  ;;  %v371_v30 = vrot.slane %v2779_v20, 1  ;;  %v326_v37 = vshrl.u32 %v2779_v20, 16 }
  0x29   : > { %v296_v32 = vor.u32 %v294_v21, %v292_v15  ;;  %v2810_v35 = vsel %vm355_vm0, %v369_v23, %v371_v30  ;;  %v2544_v23 = vld [vmem:[%s3158_s1 + $0x208] sm:$0xff]  }
  0x2a   : > { %2135 = vmatpush3.bf16.msra.mxu0 %v2488_v29  ;;  %2375 = vmatpush3.bf16.msra.mxu1 %v2487_v22  ;;  %v2783_v22 = vsel %vm257_vm1, %v288_v14, %v292_v15  ;;  %v2511_v29 = vld [vmem:[%s3158_s1 + $0xd0] sm:$0xff]  }
  0x2b   : > { %2200 = vmatprep.subr.bf16.mxu1 %v2493_v39  ;;  %2392 = vmatprep.subr.bf16.mxu0 %v2494_v40  ;;  %v2820_v39 = vsel %vm257_vm1, %v296_v32, %v300_v33  ;;  %v2548_v15 = vld [vmem:[%s2655_s5 + $0x50] ss:$0 sps:$4 sm:$0x11]   ;;  %v2529_v33 = vld [vmem:[%s3158_s1 + $0x1e8] sm:$0xff]  }
  0x2c   : > { %v338_v21 = vshll.u32 %v2548_v15, 16  ;;  %v2526_v32 = vld [vmem:[%s3158_s1 + $0x1f0] sm:$0xff]  }
  0x2d   : > { %612 = vmatmul.mubr.bf16.vlgmr.msra.gmra.mxu0 %v1857_v25  ;;  %2377 = vmatmul.mubr.bf16.vlgmr.msra.gmra.mxu1 %v2694_v46  ;;  %v2515_v25 = vld [vmem:[%s3158_s1 + $0x160] sm:$0xff]  }
  0x2e   : > { %2201 = vmatpush3.bf16.msra.mxu1 %v2495_v44  ;;  %2393 = vmatpush3.bf16.msra.mxu0 %v2494_v40  ;;  %v306_v40 = vshll.u32 %v2745_v6, 16 }
  0x2f   : > { %2202 = vmatprep.subr.bf16.mxu1 %v2496_v47  ;;  %619 = vmatprep.mubr.bf16.mxu0 %v2712_v55  ;;  %v310_v47 = vshrl.u32 %v2745_v6, 16 }
  0x30   : > { %2380 = vmatprep.mubr.bf16.mxu1 %v2721_v59  ;;  %2394 = vmatprep.subr.bf16.mxu0 %v2501_v58  ;;  %v308_v44 = vrot.slane %v306_v40, 1  ;;  %v2535_v40 = vld [vmem:[%s3158_s1 + $0x1d8] sm:$0xff]  }
  0x32   : > { %2203 = vmatpush3.bf16.msra.mxu1 %v2497_v54  ;;  %2395 = vmatpush3.bf16.msra.mxu0 %v2501_v58  ;;  %v2838_v48 = vsel %vm257_vm1, %v304_v43, %v308_v44  ;;  %v2522_v54 = vld [vmem:[%s3158_s1 + $0x140] sm:$0xff]   ;;  %v2538_v43 = vld [vmem:[%s3158_s1 + $0x1d0] sm:$0xff]  }
  0x33   : > { %2204 = vmatprep.subr.bf16.mxu1 %v2500_v60  ;;  %2396 = vmatprep.subr.bf16.mxu0 %v2508_v9  ;;  %v322_v60 = vshll.u32 %v2779_v20, 16 }
  0x35   : > { %620 = vmatmul.mubr.bf16.gmra.mxu0 %v2669_v26  ;;  %2381 = vmatmul.mubr.bf16.gmra.mxu1 %v2735_v2  ;;  %v324_v1 = vrot.slane %v322_v60, 1 }
  0x36   : > { %2205 = vmatpush3.bf16.msra.mxu1 %v2502_v63  ;;  %627 = vmatprep.mubr.bf16.mxu0 %v2742_v5  ;;  %v2873_v63 = vld [vmem:[%s2655_s5 + $0x48] sm:$0xff]  }
  0x37   : > { %2206 = vmatprep.subr.bf16.mxu1 %v2503_v0  ;;  %2384 = vmatprep.mubr.bf16.mxu1 %v2759_v11  ;;  %v373_v7 = vrot.slane %v2873_v63, 1  ;;  %v330_v8 = vshll.u32 %v2873_v63, 16  ;;  %v334_v12 = vshrl.u32 %v2873_v63, 16 }
  0x38   : > { %2397 = vmatpush3.bf16.msra.mxu0 %v2508_v9 }
  0x39   : > { %2398 = vmatprep.subr.bf16.mxu0 %v2515_v25  ;;  %v2883_v9 = vsel %vm355_vm0, %v371_v30, %v373_v7  ;;  %v332_v14 = vrot.slane %v330_v8, 1  ;;  %v2547_v30 = vld [vmem:[%s3158_s1 + $0x200] sm:$0xff]  }
  0x3a   : > { %2207 = vmatpush3.bf16.msra.mxu1 %v2504_v10 }
  0x3b   : > { %2208 = vmatprep.subr.bf16.mxu1 %v2507_v13  ;;  %v2540_v13 = vld [vmem:[%s3158_s1 + $0x210] sm:$0xff]  }
  0x3c   : > { %2399 = vmatpush3.bf16.msra.mxu0 %v2515_v25  ;;  %v340_v25 = vrot.slane %v338_v21, 1 }
  0x3d   : > { %628 = vmatmul.mubr.bf16.gmra.mxu0 %v2672_v27  ;;  %2385 = vmatmul.mubr.bf16.gmra.mxu1 %v2776_v19 }
  0x3e   : > { %2209 = vmatpush3.bf16.msra.mxu1 %v2509_v16  ;;  %635 = vmatprep.mubr.bf16.mxu0 %v2783_v22  ;;  %v375_v16 = vrot.slane %v2548_v15, 1 }
  0x3f   : > { %2210 = vmatprep.subr.bf16.mxu1 %v2510_v17  ;;  %2388 = vmatprep.mubr.bf16.mxu1 %v2793_v28  ;;  %v336_v17 = vor.u32 %v334_v12, %v332_v14 }
  0x40   : > { %2400 = vmatprep.subr.bf16.mxu0 %v2519_v34  ;;  %v2901_v24 = vsel %vm355_vm0, %v373_v7, %v375_v16 }
  0x41   : > { %2401 = vmatpush3.bf16.msra.mxu0 %v2519_v34  ;;  %v2530_v34 = vld [vmem:[%s3158_s1 + $0x1a8] sm:$0xff]  }
  0x42   : > { %2211 = vmatpush3.bf16.msra.mxu1 %v2511_v29  ;;  %2402 = vmatprep.subr.bf16.mxu0 %v2520_v41  ;;  %v2904_v29 = vsel %vm257_vm1, %v336_v17, %v340_v25 }
  0x43   : > { %2212 = vmatprep.subr.bf16.mxu1 %v2514_v31  ;;  %v2524_v31 = vld [vmem:[%s3158_s1 + $0x1b8] sm:$0xff]  }
  0x45   : > { %636 = vmatmul.mubr.bf16.gmra.mxu0 %v2702_v52  ;;  %2389 = vmatmul.mubr.bf16.gmra.mxu1 %v2810_v35 }
  0x46   : > { %2213 = vmatpush3.bf16.msra.mxu1 %v2516_v36  ;;  %643 = vmatprep.mubr.bf16.mxu0 %v2820_v39  ;;  %v2532_v36 = vld [vmem:[%s3158_s1 + $0x1e0] sm:$0xff]  }
  0x47   : > { %2214 = vmatprep.subr.bf16.mxu1 %v2517_v38  ;;  %1014 = vmatprep.mubr.bf16.mxu1 %v2712_v55  ;;  %v312_v55 = vor.u32 %v310_v47, %v308_v44  ;;  %v2533_v38 = vld [vmem:[%s3158_s1 + $0x1a0] sm:$0xff]   ;;  %v2542_v47 = vld [vmem:[%s3158_s1 + $0x1c8] sm:$0xff]  }
  0x48   : > { %2403 = vmatpush3.bf16.msra.mxu0 %v2520_v41  ;;  %v328_v41 = vor.u32 %v326_v37, %v324_v1 }
  0x49   : > { %2404 = vmatprep.subr.bf16.mxu0 %v2521_v50  ;;  %v2859_v58 = vsel %vm257_vm1, %v312_v55, %v316_v56 }
  0x4a   : > { %2215 = vmatpush3.bf16.msra.mxu1 %v2518_v42  ;;  %v2536_v42 = vld [vmem:[%s3158_s1 + $0x198] sm:$0xff]   ;;  %v333_v44 = vsel %vm257_vm1, %v328_v41, %v332_v14 }
  0x4b   : > { %2424 = vmatprep.subr.bf16.mxu1 %v2525_v45 }
  0x4c   : > { %2405 = vmatpush3.bf16.msra.mxu0 %v2521_v50  ;;  %v2545_v50 = vld [vmem:[%s3158_s1 + $0x1c0] sm:$0xff]  }
  0x4d   : > { %644 = vmatmul.mubr.bf16.gmra.mxu0 %v2705_v53  ;;  %1015 = vmatmul.mubr.bf16.vlgmr.msra.gmra.mxu1 %v2669_v26  ;;  %v318_v26 = vshrl.u32 %v2773_v18, 16 }
  0x4e   : > { %651 = vmatprep.mubr.bf16.mxu0 %v2838_v48  ;;  %1022 = vmatprep.mubr.bf16.mxu1 %v2742_v5 }
  0x4f   : > { %2425 = vmatpush3.bf16.msra.mxu1 %v2525_v45  ;;  %2406 = vmatprep.subr.bf16.mxu0 %v2522_v54  ;;  %v320_v0 = vor.u32 %v318_v26, %v316_v56  ;;  %v2539_v45 = vld [vmem:[%s3158_s1 + $0x190] sm:$0xff]  }
  0x50   : > { %2426 = vmatprep.subr.bf16.mxu1 %v2528_v51  ;;  %2407 = vmatpush3.bf16.msra.mxu0 %v2522_v54 }
  0x51   : > { %2280 = vmatprep.subr.bf16.mxu0 %v2523_v61  ;;  %v2886_v10 = vsel %vm257_vm1, %v320_v0, %v324_v1 }
  0x53   : > { %2427 = vmatpush3.bf16.msra.mxu1 %v2528_v51  ;;  %v2546_v51 = vld [vmem:[%s3158_s1 + $0x180] sm:$0xff]  }
  0x54   : > { %2428 = vmatprep.subr.bf16.mxu1 %v2531_v57 }
  0x55   : > { %652 = vmatmul.mubr.bf16.gmra.mxu0 %v2738_v3  ;;  %1023 = vmatmul.mubr.bf16.gmra.mxu1 %v2672_v27 }
  0x56   : > { %659 = vmatprep.mubr.bf16.mxu0 %v2859_v58  ;;  %1030 = vmatprep.mubr.bf16.mxu1 %v2783_v22 }
  0x57   : > { %2429 = vmatpush3.bf16.msra.mxu1 %v2531_v57 }
  0x58   : > { %2430 = vmatprep.subr.bf16.mxu1 %v2534_v62 }
  0x5b   : > { %2431 = vmatpush3.bf16.msra.mxu1 %v2534_v62 }
  0x5c   : > { %2432 = vmatprep.subr.bf16.mxu1 %v2537_v4 }
  0x5d   : > { %660 = vmatmul.mubr.bf16.gmra.mxu0 %v2745_v6  ;;  %1031 = vmatmul.mubr.bf16.gmra.mxu1 %v2702_v52 }
  0x5e   : > { %667 = vmatprep.mubr.bf16.mxu0 %v2886_v10  ;;  %1038 = vmatprep.mubr.bf16.mxu1 %v2820_v39 }
  0x5f   : > { %2433 = vmatpush3.bf16.msra.mxu1 %v2537_v4 }
  0x60   : > { %2434 = vmatprep.subr.bf16.mxu1 %v2540_v13 }
  0x63   : > { %2435 = vmatpush3.bf16.msra.mxu1 %v2540_v13 }
  0x64   : > { %2436 = vmatprep.subr.bf16.mxu1 %v2544_v23 }
  0x65   : > { %668 = vmatmul.mubr.bf16.gmra.mxu0 %v2773_v18  ;;  %1039 = vmatmul.mubr.bf16.gmra.mxu1 %v2705_v53 }
  0x66   : > { %1046 = vmatprep.mubr.bf16.mxu1 %v2838_v48  ;;  %2408 = vmatprep.mubr.bf16.mxu0 %v2694_v46  ;;  %v2527_v46 = vld [vmem:[%s3158_s1 + $0x1b0] sm:$0xff]  }
  0x67   : > { %2437 = vmatpush3.bf16.msra.mxu1 %v2544_v23 }
  0x68   : > { %2438 = vmatprep.subr.bf16.mxu1 %v2547_v30 }
  0x6b   : > { %2439 = vmatpush3.bf16.msra.mxu1 %v2547_v30 }
  0x6d   : > { %1047 = vmatmul.mubr.bf16.gmra.mxu1 %v2738_v3  ;;  %2409 = vmatmul.mubr.bf16.vlgmr.msra.gmra.mxu0 %v2721_v59 }
  0x6e   : > { %2281 = vmatpush3.bf16.msra.mxu0 %v2524_v31  ;;  %1054 = vmatprep.mubr.bf16.mxu1 %v2859_v58 }
  0x6f   : > { %2282 = vmatprep.subr.bf16.mxu0 %v2526_v32  ;;  %2412 = vmatprep.mubr.bf16.mxu0 %v2735_v2 }
  0x72   : > { %2283 = vmatpush3.bf16.msra.mxu0 %v2527_v46 }
  0x73   : > { %2284 = vmatprep.subr.bf16.mxu0 %v2529_v33 }
  0x75   : > { %1055 = vmatmul.mubr.bf16.gmra.mxu1 %v2745_v6  ;;  %2413 = vmatmul.mubr.bf16.gmra.mxu0 %v2759_v11 }
  0x76   : > { %2285 = vmatpush3.bf16.msra.mxu0 %v2530_v34  ;;  %1062 = vmatprep.mubr.bf16.mxu1 %v2886_v10 }
  0x77   : > { %2286 = vmatprep.subr.bf16.mxu0 %v2532_v36  ;;  %2416 = vmatprep.mubr.bf16.mxu0 %v2776_v19 }
  0x7a   : > { %2287 = vmatpush3.bf16.msra.mxu0 %v2533_v38 }
  0x7b   : > { %2288 = vmatprep.subr.bf16.mxu0 %v2535_v40 }
  0x7d   : > { %1063 = vmatmul.mubr.bf16.gmra.mxu1 %v2773_v18  ;;  %2417 = vmatmul.mubr.bf16.gmra.mxu0 %v2793_v28 }
  0x7e   : > { %2289 = vmatpush3.bf16.msra.mxu0 %v2536_v42  ;;  %1070 = vmatprep.mubr.bf16.mxu1 %v333_v44 }
  0x7f   : > { %2290 = vmatprep.subr.bf16.mxu0 %v2538_v43  ;;  %2420 = vmatprep.mubr.bf16.mxu0 %v2810_v35 }
  0x82   : > { %2291 = vmatpush3.bf16.msra.mxu0 %v2539_v45 }
  0x83   : > { %2292 = vmatprep.subr.bf16.mxu0 %v2542_v47 }
  0x85   : > { %1071 = vmatmul.mubr.bf16.gmra.mxu1 %v2779_v20  ;;  %2421 = vmatmul.mubr.bf16.gmra.mxu0 %v2883_v9 }
  0x86   : > { %2293 = vmatpush3.bf16.msra.mxu0 %v2543_v49  ;;  %1449 = vmatprep.mubr.bf16.mxu0 %v2742_v5 }
  0x87   : > { %2294 = vmatprep.subr.bf16.mxu0 %v2545_v50  ;;  %2440 = vmatprep.mubr.bf16.mxu1 %v2721_v59 }
  0x8a   : > { %2295 = vmatpush3.bf16.msra.mxu0 %v2546_v51 }
  0x8d   : > { %1450 = vmatmul.mubr.bf16.vlgmr.msra.gmra.mxu0 %v2672_v27  ;;  %2441 = vmatmul.mubr.bf16.vlgmr.msra.gmra.mxu1 %v2735_v2 }
  0x8e   : > { %1457 = vmatprep.mubr.bf16.mxu0 %v2783_v22  ;;  %2444 = vmatprep.mubr.bf16.mxu1 %v2759_v11 }
  0x95   : > { %1458 = vmatmul.mubr.bf16.gmra.mxu0 %v2702_v52  ;;  %2445 = vmatmul.mubr.bf16.gmra.mxu1 %v2776_v19 }
  0x96   : > { %1465 = vmatprep.mubr.bf16.mxu0 %v2820_v39  ;;  %2448 = vmatprep.mubr.bf16.mxu1 %v2793_v28 }
  0x9d   : > { %1466 = vmatmul.mubr.bf16.gmra.mxu0 %v2705_v53  ;;  %2449 = vmatmul.mubr.bf16.gmra.mxu1 %v2810_v35 }
  0x9e   : > { %1473 = vmatprep.mubr.bf16.mxu0 %v2838_v48  ;;  %2452 = vmatprep.mubr.bf16.mxu1 %v2883_v9 }
  0xa5   : > { %1474 = vmatmul.mubr.bf16.gmra.mxu0 %v2738_v3  ;;  %2453 = vmatmul.mubr.bf16.gmra.mxu1 %v2901_v24 }
  0xa6   : > { %1481 = vmatprep.mubr.bf16.mxu0 %v2859_v58 }
  0xad   : > { %1482 = vmatmul.mubr.bf16.gmra.mxu0 %v2745_v6 }
  0xae   : > { %1489 = vmatprep.mubr.bf16.mxu0 %v2886_v10 }
  0xb5   : > { %1490 = vmatmul.mubr.bf16.gmra.mxu0 %v2773_v18 }
  0xb6   : > { %1497 = vmatprep.mubr.bf16.mxu0 %v333_v44 }
  0xbd   : > { %1498 = vmatmul.mubr.bf16.gmra.mxu0 %v2779_v20 }
  0xbe   : > { %1505 = vmatprep.mubr.bf16.mxu0 %v2904_v29 }
  0xc5   : > { %1506 = vmatmul.mubr.bf16.gmra.mxu0 %v2873_v63 }
  0xed   : > { %v2136_v27 = vpop.f32.mrf.mxu0  ;;  %v2378_v52 = vpop.f32.mrf.mxu1 }
  0xef   : > { %v2137_v53 = vpop.f32.mrf.mxu0  ;;  %v710_v59 = vpop.f32.mrf.mxu1 }
  0xf0   : > { %v2138_v2 = vadd.f32 %v2137_v53, %v2136_v27 }
  0xf1   : > { %v2139_v3 = vpop.f32.mrf.mxu0  ;;  %v2379_v5 = vpop.f32.mrf.mxu1 }
  0xf2   : > { %v2996_v11 = vadd.f32 %v2138_v2, %v710_v59 }
  0xf3   : > { %v2140_v6 = vpop.f32.mrf.mxu0  ;;  %v713_v19 = vpop.f32.mrf.mxu1 }
  0xf4   : > { %v2141_v22 = vadd.f32 %v2140_v6, %v2139_v3 }
  0xf5   : > { %v2142_v18 = vpop.f32.mrf.mxu0  ;;  %v2382_v28 = vpop.f32.mrf.mxu1 }
  0xf6   : > { %v2998_v35 = vadd.f32 %v2141_v22, %v713_v19 }
  0xf7   : > { %v2143_v20 = vpop.f32.mrf.mxu0  ;;  %v726_v39 = vpop.f32.mrf.mxu1 }
  0xf8   : > { %v2144_v48 = vadd.f32 %v2143_v20, %v2142_v18 }
  0xf9   : > { %v2145_v54 = vpop.f32.mrf.mxu0  ;;  %v2383_v55 = vpop.f32.mrf.mxu1 }
  0xfa   : > { %v3000_v56 = vadd.f32 %v2378_v52, %v2144_v48 }
  0xfb   : > { %v2146_v57 = vpop.f32.mrf.mxu0  ;;  %v729_v26 = vpop.f32.mrf.mxu1 }
  0xfc   : > { %v2147_v58 = vadd.f32 %v2146_v57, %v2145_v54 }
  0xfd   : > { %v2148_v60 = vpop.f32.mrf.mxu0  ;;  %v2386_v61 = vpop.f32.mrf.mxu1 }
  0xfe   : > { %v3002_v62 = vadd.f32 %v2379_v5, %v2147_v58 }
  0xff   : > { %v2149_v63 = vpop.f32.mrf.mxu0  ;;  %v742_v0 = vpop.f32.mrf.mxu1 }
 0x100   : > { %v2150_v1 = vadd.f32 %v2149_v63, %v2148_v60 }
 0x101   : > { %v2151_v4 = vpop.f32.mrf.mxu0  ;;  %v2387_v7 = vpop.f32.mrf.mxu1 }
 0x102   : > { %v3004_v8 = vadd.f32 %v2150_v1, %v726_v39 }
 0x103   : > { %v2152_v9 = vpop.f32.mrf.mxu0  ;;  %v745_v10 = vpop.f32.mrf.mxu1 }
 0x104   : > { %v2153_v12 = vadd.f32 %v2152_v9, %v2151_v4 }
 0x105   : > { %v2154_v13 = vpop.f32.mrf.mxu0  ;;  %v2390_v14 = vpop.f32.mrf.mxu1 }
 0x106   : > { %v3006_v15 = vadd.f32 %v2153_v12, %v729_v26 }
 0x107   : > { %v2155_v16 = vpop.f32.mrf.mxu0  ;;  %v758_v17 = vpop.f32.mrf.mxu1 }
 0x108   : > { %v2156_v21 = vadd.f32 %v2155_v16, %v2154_v13 }
 0x109   : > { %v2157_v23 = vpop.f32.mrf.mxu0  ;;  %v2391_v24 = vpop.f32.mrf.mxu1 }
 0x10a   : > { %v3008_v25 = vadd.f32 %v2382_v28, %v2156_v21 }
 0x10b   : > { %v2158_v29 = vpop.f32.mrf.mxu0  ;;  %v761_v30 = vpop.f32.mrf.mxu1 }
 0x10c   : > { %v2159_v31 = vadd.f32 %v2158_v29, %v2157_v23 }
 0x10d   : > { %v2160_v32 = vpop.f32.mrf.mxu0  ;;  %v2216_v46 = vpop.f32.mrf.mxu1 }
 0x10e   : > { %v3010_v33 = vadd.f32 %v2383_v55, %v2159_v31 }
 0x10f   : > { %v2161_v34 = vpop.f32.mrf.mxu0  ;;  %v2217_v36 = vpop.f32.mrf.mxu1 }
 0x110   : > { %v2162_v37 = vadd.f32 %v2161_v34, %v2160_v32  ;;  %v2218_v38 = vadd.f32 %v2217_v36, %v2216_v46 }
 0x111   : > { %v2163_v40 = vpop.f32.mrf.mxu0  ;;  %v3012_v41 = vpop.f32.mrf.mxu1 }
 0x112   : > { %v3014_v42 = vadd.f32 %v2162_v37, %v742_v0 }
 0x113   : > { %v2164_v43 = vpop.f32.mrf.mxu0  ;;  %v3016_v44 = vpop.f32.mrf.mxu1 }
 0x114   : > { %v2165_v45 = vadd.f32 %v2164_v43, %v2163_v40 }
 0x115   : > { %v2166_v47 = vpop.f32.mrf.mxu0  ;;  %v2222_v49 = vpop.f32.mrf.mxu1 }
 0x116   : > { %v3018_v50 = vadd.f32 %v2165_v45, %v745_v10 }
 0x117   : > { %v2167_v51 = vpop.f32.mrf.mxu0  ;;  %v2223_v27 = vpop.f32.mrf.mxu1 }
 0x118   : > { %v2168_v52 = vadd.f32 %v2167_v51, %v2166_v47  ;;  %v2224_v53 = vadd.f32 %v2223_v27, %v2222_v49 }
 0x119   : > { %v2169_v59 = vpop.f32.mrf.mxu0  ;;  %v3020_v2 = vpop.f32.mrf.mxu1 }
 0x11a   : > { %v751_v3 = vadd.f32 %v2386_v61, %v2168_v52 }
 0x11b   : > { %v2170_v5 = vpop.f32.mrf.mxu0  ;;  %v3022_v6 = vpop.f32.mrf.mxu1 }
 0x11c   : > { %v2171_v19 = vadd.f32 %v2170_v5, %v2169_v59 }
 0x11d   : > { %v2172_v22 = vpop.f32.mrf.mxu0  ;;  %v2228_v18 = vpop.f32.mrf.mxu1 }
 0x11e   : > { %v3024_v28 = vadd.f32 %v2387_v7, %v2171_v19 }
 0x11f   : > { %v2173_v20 = vpop.f32.mrf.mxu0  ;;  %v2229_v39 = vpop.f32.mrf.mxu1 }
 0x120   : > { %v2174_v48 = vadd.f32 %v2173_v20, %v2172_v22  ;;  %v2230_v54 = vadd.f32 %v2229_v39, %v2228_v18 }
 0x121   : > { %v2175_v55 = vpop.f32.mrf.mxu0  ;;  %v3026_v57 = vpop.f32.mrf.mxu1 }
 0x122   : > { %v3028_v26 = vadd.f32 %v2174_v48, %v758_v17 }
 0x123   : > { %v2176_v58 = vpop.f32.mrf.mxu0  ;;  %v3030_v60 = vpop.f32.mrf.mxu1 }
 0x124   : > { %v2177_v61 = vadd.f32 %v2176_v58, %v2175_v55 }
 0x125   : > { %v2178_v63 = vpop.f32.mrf.mxu0  ;;  %v2234_v0 = vpop.f32.mrf.mxu1 }
 0x126   : > { %v3032_v1 = vadd.f32 %v2177_v61, %v761_v30 }
 0x127   : > { %v2179_v4 = vpop.f32.mrf.mxu0  ;;  %v2235_v7 = vpop.f32.mrf.mxu1 }
 0x128   : > { %v2180_v9 = vadd.f32 %v2179_v4, %v2178_v63  ;;  %v2236_v10 = vadd.f32 %v2235_v7, %v2234_v0 }
 0x129   : > { %v2181_v12 = vpop.f32.mrf.mxu0  ;;  %v3034_v13 = vpop.f32.mrf.mxu1 }
 0x12a   : > { %v767_v16 = vadd.f32 %v2390_v14, %v2180_v9 }
 0x12b   : > { %v2182_v21 = vpop.f32.mrf.mxu0  ;;  %v3036_v23 = vpop.f32.mrf.mxu1 }
 0x12c   : > { %v2183_v17 = vadd.f32 %v2182_v21, %v2181_v12 }
 0x12d   : > { %v2240_v29 = vpop.f32.mrf.mxu1  ;;  %v2410_v31 = vpop.f32.mrf.mxu0 }
 0x12e   : > { %v770_v32 = vadd.f32 %v2391_v24, %v2183_v17  ;;  %v1122_v46 = vadd.f32 %v2410_v31, %v2224_v53 }
 0x12f   : > { %v2241_v34 = vpop.f32.mrf.mxu1  ;;  %v1113_v36 = vpop.f32.mrf.mxu0 }
 0x130   : > { %v3039_v30 = vadd.f32 %v1122_v46, %v3000_v56  ;;  %v2242_v37 = vadd.f32 %v2241_v34, %v2240_v29  ;;  %v1114_v40 = vadd.f32 %v2218_v38, %v1113_v36 }
 0x131   : > { %v3041_v43 = vpop.f32.mrf.mxu1  ;;  %v3043_v45 = vpop.f32.mrf.mxu0 }
 0x132   : > { %v1192_v14 = vadd.f32 %v1114_v40, %v2996_v11 }
 0x133   : > { %v3046_v47 = vpop.f32.mrf.mxu1  ;;  %v1116_v49 = vpop.f32.mrf.mxu0 }
 0x135   : > { %v2246_v51 = vpop.f32.mrf.mxu1  ;;  %v2414_v27 = vpop.f32.mrf.mxu0 }
 0x136   : > { %v1138_v24 = vadd.f32 %v2414_v27, %v2236_v10 }
 0x137   : > { %v2247_v52 = vpop.f32.mrf.mxu1  ;;  %v1129_v53 = vpop.f32.mrf.mxu0 }
 0x138   : > { %v3049_v59 = vadd.f32 %v1138_v24, %v3008_v25  ;;  %v2248_v56 = vadd.f32 %v2247_v52, %v2246_v51  ;;  %v1130_v5 = vadd.f32 %v2230_v54, %v1129_v53 }
 0x139   : > { %v3051_v38 = vpop.f32.mrf.mxu1  ;;  %v3053_v19 = vpop.f32.mrf.mxu0 }
 0x13a   : > { %v3056_v22 = vadd.f32 %v1130_v5, %v3004_v8 }
 0x13b   : > { %v3058_v11 = vpop.f32.mrf.mxu1  ;;  %v3060_v18 = vpop.f32.mrf.mxu0 }
 0x13d   : > { %v2252_v20 = vpop.f32.mrf.mxu1  ;;  %v2418_v39 = vpop.f32.mrf.mxu0 }
 0x13e   : > { %v1154_v48 = vadd.f32 %v2418_v39, %v2248_v56  ;;  %v2221_v56 = vadd.f32 %v3016_v44, %v3012_v41  ;;  %v2227_v41 = vadd.f32 %v3022_v6, %v3020_v2 }
 0x13f   : > { %v2253_v55 = vpop.f32.mrf.mxu1  ;;  %v1145_v58 = vpop.f32.mrf.mxu0 }
 0x140   : > { %v3062_v25 = vadd.f32 %v1154_v48, %v751_v3  ;;  %v2254_v61 = vadd.f32 %v2253_v55, %v2252_v20  ;;  %v1146_v54 = vadd.f32 %v2242_v37, %v1145_v58  ;;  %v1117_v48 = vadd.f32 %v2221_v56, %v1116_v49 }
 0x141   : > { %v3064_v63 = vpop.f32.mrf.mxu1  ;;  %v3066_v0 = vpop.f32.mrf.mxu0 }
 0x142   : > { %v3069_v8 = vadd.f32 %v1146_v54, %v3014_v42  ;;  %v1193_v44 = vadd.f32 %v1117_v48, %v2998_v35 }
 0x143   : > { %v3071_v4 = vpop.f32.mrf.mxu1  ;;  %v3073_v7 = vpop.f32.mrf.mxu0 }
 0x145   : > { %v2258_v9 = vpop.f32.mrf.mxu1  ;;  %v2422_v10 = vpop.f32.mrf.mxu0 }
 0x147   : > { %v2259_v12 = vpop.f32.mrf.mxu1  ;;  %v1161_v21 = vpop.f32.mrf.mxu0 }
 0x148   : > { %v2260_v17 = vadd.f32 %v2259_v12, %v2258_v9  ;;  %v1162_v3 = vadd.f32 %v2254_v61, %v1161_v21  ;;  %v3089_v9 = vld [vmem:[%s3159_s2] ss:$0 sm:$0xff] }
 0x149   : > { %v2261_v29 = vpop.f32.mrf.mxu1  ;;  %v2423_v31 = vpop.f32.mrf.mxu0 }
 0x14a   : > { %v1170_v46 = vadd.f32 %v2422_v10, %v2260_v17  ;;  %v3076_v34 = vadd.f32 %v1162_v3, %v3028_v26 }
 0x14b   : > { %v2262_v36 = vpop.f32.mrf.mxu1  ;;  %v3078_v37 = vpop.f32.mrf.mxu0 }
 0x14c   : > { %v3080_v42 = vadd.f32 %v1170_v46, %v767_v16  ;;  %v2263_v40 = vadd.f32 %v2262_v36, %v2261_v29  ;;  %v1125_v29 = vadd.f32 %v3043_v45, %v2227_v41  ;;  %v2233_v45 = vadd.f32 %v3030_v60, %v3026_v57 }
 0x14d   : > { %v2296_v51 = vpop.f32.mrf.mxu0  ;;  %v2442_v27 = vpop.f32.mrf.mxu1 }
 0x14e   : > { %v1173_v24 = vadd.f32 %v2423_v31, %v2263_v40 }
 0x14f   : > { %v2297_v52 = vpop.f32.mrf.mxu0  ;;  %v1548_v53 = vpop.f32.mrf.mxu1 }
 0x150   : > { %v3084_v5 = vadd.f32 %v1173_v24, %v770_v32  ;;  %v2298_v20 = vadd.f32 %v2297_v52, %v2296_v51  ;;  %v1195_v52 = vadd.f32 %v1125_v29, %v3002_v62 }
 0x151   : > { %v2299_v39 = vpop.f32.mrf.mxu0  ;;  %v2443_v26 = vpop.f32.mrf.mxu1 }
 0x152   : > { %v1549_v55 = vadd.f32 %v2298_v20, %v1548_v53 }
 0x153   : > { %v2300_v58 = vpop.f32.mrf.mxu0  ;;  %v1551_v16 = vpop.f32.mrf.mxu1 }
 0x154   : > { %v1627_v61 = vadd.f32 %v1549_v55, %v1192_v14  ;;  %v2301_v54 = vadd.f32 %v2300_v58, %v2299_v39  ;;  %v1133_v58 = vadd.f32 %v2233_v45, %v3060_v18 }
 0x155   : > { %v2302_v10 = vpop.f32.mrf.mxu0  ;;  %v2446_v49 = vpop.f32.mrf.mxu1 }
 0x156   : > { %v1552_v32 = vadd.f32 %v2301_v54, %v1551_v16  ;;  %v1682_v21 = vadd.f32 %v3089_v9, %v1627_v61 }
 0x157   : > { %v2303_v12 = vpop.f32.mrf.mxu0  ;;  %v1564_v40 = vpop.f32.mrf.mxu1 }
 0x158   : > { %v1628_v17 = vadd.f32 %v1552_v32, %v1193_v44  ;;  %v2304_v3 = vadd.f32 %v2303_v12, %v2302_v10  ;;  %v1698_v51 = vmax.f32 %v1682_v21, 0.0  ;;  %v2239_v44 = vadd.f32 %v3036_v23, %v3034_v13 }
 0x159   : > { %v2305_v14 = vpop.f32.mrf.mxu0  ;;  %v2447_v20 = vpop.f32.mrf.mxu1  ;;  %v1197_v32 = vadd.f32 %v1133_v58, %v3006_v15 }
 0x15a   : > { %v1683_v31 = vadd.f32 %v3089_v9, %v1628_v17  ;;  %v1557_v46 = vadd.f32 %v2442_v27, %v2304_v3 }
 0x15b   : > { %v2306_v36 = vpop.f32.mrf.mxu0  ;;  %v1567_v57 = vpop.f32.mrf.mxu1 }
 0x15c   : > { %v1699_v2 = vmax.f32 %v1683_v31, 0.0  ;;  %v1629_v35 = vadd.f32 %v1557_v46, %v3039_v30  ;;  %v2307_v6 = vadd.f32 %v2306_v36, %v2305_v14  ;;  %v1141_v46 = vadd.f32 %v3053_v19, %v2239_v44 }
 0x15d   : > { %v2308_v24 = vpop.f32.mrf.mxu0  ;;  %v2450_v17 = vpop.f32.mrf.mxu1 }
 0x15e   : > { %v2076_v27 = vpack.c.bf16 %v1699_v2, %v1698_v51  ;;  %v1560_v53 = vadd.f32 %v2443_v26, %v2307_v6  ;;  %v1684_v30 = vadd.f32 %v3089_v9, %v1629_v35  ;;  %v2245_v6 = vadd.f32 %v3046_v47, %v3041_v43 }
 0x15f   : > { %v2309_v56 = vpop.f32.mrf.mxu0  ;;  %v1580_v13 = vpop.f32.mrf.mxu1 }
 0x160   : > { %2077 = vst [vmem:[%s3102_s19] sm:$0xff] %v2076_v27   ;;  %v1630_v39 = vadd.f32 %v1560_v53, %v1195_v52  ;;  %v2310_v48 = vadd.f32 %v2309_v56, %v2308_v24  ;;  %v1700_v60 = vmax.f32 %v1684_v30, 0.0  ;;  %v1199_v24 = vadd.f32 %v1141_v46, %v3010_v33 }
 0x161   : > { %v2311_v55 = vpop.f32.mrf.mxu0  ;;  %v2451_v27 = vpop.f32.mrf.mxu1 }
 0x162   : > { %v1685_v16 = vadd.f32 %v3089_v9, %v1630_v39  ;;  %v1565_v61 = vadd.f32 %v2310_v48, %v1564_v40  ;;  %v1149_v39 = vadd.f32 %v2245_v6, %v3073_v7 }
 0x163   : > { %v2312_v54 = vpop.f32.mrf.mxu0  ;;  %v1583_v43 = vpop.f32.mrf.mxu1 }
 0x164   : > { %v1701_v62 = vmax.f32 %v1685_v16, 0.0  ;;  %v1631_v26 = vadd.f32 %v1565_v61, %v3056_v22  ;;  %v2313_v10 = vadd.f32 %v2312_v54, %v2311_v55  ;;  %v2251_v61 = vadd.f32 %v3058_v11, %v3051_v38 }
 0x165   : > { %v2314_v41 = vpop.f32.mrf.mxu0  ;;  %v1201_v54 = vadd.f32 %v1149_v39, %v3018_v50 }
 0x166   : > { %v2081_v12 = vpack.c.bf16 %v1701_v62, %v1700_v60  ;;  %v1568_v21 = vadd.f32 %v2313_v10, %v1567_v57  ;;  %v1686_v3 = vadd.f32 %v3089_v9, %v1631_v26  ;;  %v2454_v62 = vpop.f32.mrf.mxu1 }
 0x167   : > { %v2315_v18 = vpop.f32.mrf.mxu0 }
 0x168   : > { %2113 = vst [vmem:[%s3102_s19 + $0x8] sm:$0xff] %v2081_v12   ;;  %v1632_v14 = vadd.f32 %v1568_v21, %v1197_v32  ;;  %v2316_v29 = vadd.f32 %v2315_v18, %v2314_v41  ;;  %v1702_v23 = vmax.f32 %v1686_v3, 0.0  ;;  %v1157_v32 = vadd.f32 %v3066_v0, %v2251_v61  ;;  %v1596_v38 = vpop.f32.mrf.mxu1 }
 0x169   : > { %v2317_v31 = vpop.f32.mrf.mxu0 }
 0x16a   : > { %v1687_v22 = vadd.f32 %v3089_v9, %v1632_v14  ;;  %v1573_v36 = vadd.f32 %v2446_v49, %v2316_v29  ;;  %v1203_v29 = vadd.f32 %v1157_v32, %v3024_v28 }
 0x16b   : > { %v2318_v40 = vpop.f32.mrf.mxu0 }
 0x16c   : > { %v1703_v15 = vmax.f32 %v1687_v22, 0.0  ;;  %v1633_v51 = vadd.f32 %v1573_v36, %v3049_v59  ;;  %v2319_v2 = vadd.f32 %v2318_v40, %v2317_v31  ;;  %v2257_v31 = vadd.f32 %v3071_v4, %v3064_v63  ;;  %v2455_v36 = vpop.f32.mrf.mxu1 }
 0x16d   : > { %v2320_v35 = vpop.f32.mrf.mxu0 }
 0x16e   : > { %v2086_v45 = vpack.c.bf16 %v1703_v15, %v1702_v23  ;;  %v1576_v52 = vadd.f32 %v2447_v20, %v2319_v2  ;;  %v1688_v49 = vadd.f32 %v3089_v9, %v1633_v51  ;;  %v1599_v2 = vpop.f32.mrf.mxu1 }
 0x16f   : > { %v2321_v19 = vpop.f32.mrf.mxu0 }
 0x170   : > { %2114 = vst [vmem:[%s3102_s19 + $0x10] sm:$0xff] %v2086_v45   ;;  %v1634_v53 = vadd.f32 %v1576_v52, %v1199_v24  ;;  %v2322_v56 = vadd.f32 %v2321_v19, %v2320_v35  ;;  %v1704_v47 = vmax.f32 %v1688_v49, 0.0 }
 0x171   : > { %v2323_v30 = vpop.f32.mrf.mxu0 }
 0x172   : > { %v1689_v59 = vadd.f32 %v3089_v9, %v1634_v53  ;;  %v1581_v48 = vadd.f32 %v2322_v56, %v1580_v13 }
 0x173   : > { %v2324_v55 = vpop.f32.mrf.mxu0 }
 0x174   : > { %v1705_v33 = vmax.f32 %v1689_v59, 0.0  ;;  %v1635_v20 = vadd.f32 %v1581_v48, %v3069_v8  ;;  %v2325_v58 = vadd.f32 %v2324_v55, %v2323_v30 }
 0x175   : > { %v2326_v16 = vpop.f32.mrf.mxu0 }
 0x176   : > { %v2091_v57 = vpack.c.bf16 %v1705_v33, %v1704_v47  ;;  %v1584_v60 = vadd.f32 %v2325_v58, %v1583_v43  ;;  %v1690_v26 = vadd.f32 %v3089_v9, %v1635_v20 }
 0x177   : > { %v2327_v7 = vpop.f32.mrf.mxu0 }
 0x178   : > { %2115 = vst [vmem:[%s3102_s19 + $0x18] sm:$0xff] %v2091_v57   ;;  %v1636_v10 = vadd.f32 %v1584_v60, %v1201_v54  ;;  %v2328_v41 = vadd.f32 %v2327_v7, %v2326_v16  ;;  %v1706_v11 = vmax.f32 %v1690_v26, 0.0 }
 0x179   : > { %v2329_v44 = vpop.f32.mrf.mxu0 }
 0x17a   : > { %v1691_v8 = vadd.f32 %v3089_v9, %v1636_v10  ;;  %v1589_v12 = vadd.f32 %v2450_v17, %v2328_v41 }
 0x17b   : > { %v2330_v21 = vpop.f32.mrf.mxu0 }
 0x17c   : > { %v1707_v50 = vmax.f32 %v1691_v8, 0.0  ;;  %v1637_v18 = vadd.f32 %v1589_v12, %v3062_v25  ;;  %v2331_v3 = vadd.f32 %v2330_v21, %v2329_v44  ;;  %v1165_v25 = vadd.f32 %v2257_v31, %v3078_v37 }
 0x17d   : > { %v2332_v14 = vpop.f32.mrf.mxu0 }
 0x17e   : > { %v2096_v46 = vpack.c.bf16 %v1707_v50, %v1706_v11  ;;  %v1592_v22 = vadd.f32 %v2451_v27, %v2331_v3  ;;  %v1692_v17 = vadd.f32 %v3089_v9, %v1637_v18  ;;  %v1205_v45 = vadd.f32 %v1165_v25, %v3032_v1 }
 0x17f   : > { %v2333_v0 = vpop.f32.mrf.mxu0 }
 0x180   : > { %2116 = vst [vmem:[%s3102_s19 + $0x20] sm:$0xff] %v2096_v46   ;;  %v1638_v40 = vadd.f32 %v1592_v22, %v1203_v29  ;;  %v2334_v13 = vadd.f32 %v2333_v0, %v2332_v14  ;;  %v1708_v35 = vmax.f32 %v1692_v17, 0.0 }
 0x181   : > { %v2335_v23 = vpop.f32.mrf.mxu0 }
 0x182   : > { %v1693_v15 = vadd.f32 %v3089_v9, %v1638_v40  ;;  %v1597_v51 = vadd.f32 %v2334_v13, %v1596_v38 }
 0x183   : > { %v2336_v28 = vpop.f32.mrf.mxu0 }
 0x184   : > { %v1709_v63 = vmax.f32 %v1693_v15, 0.0  ;;  %v1639_v4 = vadd.f32 %v1597_v51, %v3076_v34  ;;  %v2337_v6 = vadd.f32 %v2336_v28, %v2335_v23 }
 0x185   : > { %v2338_v24 = vpop.f32.mrf.mxu0 }
 0x186   : > { %v2101_v52 = vpack.c.bf16 %v1709_v63, %v1708_v35  ;;  %v1600_v19 = vadd.f32 %v2337_v6, %v1599_v2  ;;  %v1694_v37 = vadd.f32 %v3089_v9, %v1639_v4 }
 0x187   : > { %v2339_v27 = vpop.f32.mrf.mxu0 }
 0x188   : > { %2117 = vst [vmem:[%s3102_s19 + $0x28] sm:$0xff] %v2101_v52   ;;  %v1640_v49 = vadd.f32 %v1600_v19, %v1205_v45  ;;  %v2340_v53 = vadd.f32 %v2339_v27, %v2338_v24  ;;  %v1710_v34 = vmax.f32 %v1694_v37, 0.0 }
 0x189   : > { %v2341_v56 = vpop.f32.mrf.mxu0 }
 0x18a   : > { %v1695_v30 = vadd.f32 %v3089_v9, %v1640_v49  ;;  %v1605_v39 = vadd.f32 %v2454_v62, %v2340_v53 }
 0x18b   : > { %v2342_v59 = vpop.f32.mrf.mxu0 }
 0x18c   : > { %v1711_v48 = vmax.f32 %v1695_v30, 0.0  ;;  %v1641_v55 = vadd.f32 %v1605_v39, %v3080_v42  ;;  %v2343_v1 = vadd.f32 %v2342_v59, %v2341_v56 }
 0x18e   : > { %v2106_v43 = vpack.c.bf16 %v1711_v48, %v1710_v34  ;;  %v1608_v47 = vadd.f32 %v2455_v36, %v2343_v1  ;;  %v1696_v33 = vadd.f32 %v3089_v9, %v1641_v55 }
 0x190   : > { %2118 = vst [vmem:[%s3102_s19 + $0x30] sm:$0xff] %v2106_v43   ;;  %v1642_v20 = vadd.f32 %v1608_v47, %v3084_v5  ;;  %v1712_v16 = vmax.f32 %v1696_v33, 0.0 }
 0x192   : > { %v1697_v58 = vadd.f32 %v3089_v9, %v1642_v20 }
 0x194   : > { %v1713_v61 = vmax.f32 %v1697_v58, 0.0 }
 0x196   : > { %v2111_v54 = vpack.c.bf16 %v1713_v61, %v1712_v16 }
 0x198   : > { %2119 = vst [vmem:[%s3102_s19 + $0x38] sm:$0xff] %v2111_v54  }
 0x199 PF: > { %s13_s12 = sadd.s32 1, %s2555_s12  }
 0x19a   : > { %p10_p4 = scmp.ge.s32.totalorder %s13_s12, 4  }
 0x19c   :  { %12 = sbr.rel (!%p10_p4) target bundleno = 1 (0x1), region = 64 }

// kernel: _lambda_.23
= control target key start
LH: loop header
LB: loop body
LE: loop exit
PB: predicated region body
PF: predicated region fallthrough
CT: control target
= control target key end

     0   :  { %s2029_s12 = smov 0   ;;  %s2449_s0 = inlined_call_operand.vmem [shape: bf16[2,112,128], index: 0, kind: input, shape index: {}]   ;;  %s2450_s1 = inlined_call_operand.vmem [shape: bf16[3,384,128], index: 1, kind: input, shape index: {}]   ;;  %s2451_s2 = inlined_call_operand.vmem [shape: f32[1,128], index: 2, kind: input, shape index: {}]   ;;  %s2452_s3 = inlined_call_operand.vmem [shape: bf16[2,64,128], index: 3, kind: output, shape index: {}]  }
   0x1 LB: > { %s1457_s13 = sadd.s32 4294967295, %s2007_s12   ;;  %p1461_p0 = scmp.ge.s32.totalorder %s2007_s12, 1  ;;  %s2007_s12 = sphi %s2029_s12, %s13_s12  }
   0x2   : > { %p137_p1 = scmp.lt.s32.totalorder %s2007_s12, 3 }
   0x4   : > { %p138_p2 = pnand %p1461_p0, %p137_p1 }
   0x5   : > { %p161_p3 = scmp.lt.s32.totalorder (!%p138_p2), %s1457_s13, 1 }
   0x6   : > { %141 = sbr.rel (%p138_p2) target bundleno = 344 (0x158), region = 32 }
   0xb   : > { %v1921_v0 = vld [vmem:[%s2450_s1 + $0x78] sm:$0xff]   ;;  %v1924_v3 = vld [vmem:[%s2450_s1 + $0x70] sm:$0xff]   ;;  %v1927_v6 = vld [vmem:[%s2450_s1 + $0x68] sm:$0xff]   ;;  %s2454_s13 = smov (!%p161_p3, %s1457_s13), 1  ;;  %vm287_vm0 = vcmask 1046528  }
   0xc   : > { %v1922_v1 = vld [vmem:[%s2450_s1 + $0x38] sm:$0xff]   ;;  %1684 = vmatprep.subr.bf16.mxu0 %v1921_v0  ;;  %v1925_v4 = vld [vmem:[%s2450_s1 + $0x30] sm:$0xff]   ;;  %v1928_v7 = vld [vmem:[%s2450_s1 + $0x28] sm:$0xff]   ;;  %s1912_s21 = smul.u32 56, %s2454_s13  ;;  %vm225_vm1 = vsmask.f32 7424 }
   0xd   : > { %v1923_v2 = vld [vmem:[%s2450_s1 + $0xb8] sm:$0xff]   ;;  %1685 = vmatpush3.bf16.msra.mxu0 %v1922_v1  ;;  %v1926_v5 = vld [vmem:[%s2450_s1 + $0xb0] sm:$0xff]   ;;  %v1929_v8 = vld [vmem:[%s2450_s1 + $0xa8] sm:$0xff]   ;;  %s1652_s17 = sshll.u32 %s2454_s13, 5 }
   0xe   : > { %1840 = vmatprep.subr.bf16.mxu1 %v1923_v2  ;;  %1686 = vmatprep.subr.bf16.mxu0 %v1924_v3  ;;  %v1930_v9 = vld [vmem:[%s2450_s1 + $0x60] sm:$0xff]   ;;  %v1933_v12 = vld [vmem:[%s2450_s1 + $0x58] sm:$0xff]   ;;  %v1936_v15 = vld [vmem:[%s2450_s1 + $0x50] sm:$0xff]   ;;  %s2107_s5 = scalar_lea.vmem %s2449_s0, %s1912_s21  ;;  %s2416_s20 = scalar_lea.vmem %s2452_s3, %s1652_s17 }
   0xf   : > { %1841 = vmatpush3.bf16.msra.mxu1 %v1923_v2  ;;  %v1931_v10 = vld [vmem:[%s2450_s1 + $0x20] sm:$0xff]   ;;  %v1935_v13 = vld [vmem:[%s2450_s1 + $0x98] sm:$0xff]   ;;  %v1938_v16 = vld [vmem:[%s2450_s1 + $0x90] sm:$0xff]  }
  0x10   : > { %1842 = vmatprep.subr.bf16.mxu1 %v1926_v5  ;;  %v1932_v11 = vld [vmem:[%s2450_s1 + $0xa0] sm:$0xff]   ;;  %v1934_v14 = vld [vmem:[%s2450_s1 + $0x18] sm:$0xff]   ;;  %v1937_v17 = vld [vmem:[%s2450_s1 + $0x10] sm:$0xff]  }
  0x11   : > { %1687 = vmatpush3.bf16.msra.mxu0 %v1925_v4  ;;  %v1939_v18 = vld [vmem:[%s2450_s1 + $0x48] sm:$0xff]   ;;  %v1942_v21 = vld [vmem:[%s2450_s1 + $0x40] sm:$0xff]   ;;  %v1947_v32 = vld [vmem:[%s2450_s1 + $0x138] sm:$0xff]  }
  0x12   : > { %1688 = vmatprep.subr.bf16.mxu0 %v1927_v6  ;;  %v1940_v19 = vld [vmem:[%s2450_s1 + $0x8] sm:$0xff]   ;;  %v172_v22 = vld [vmem:[%s2107_s5] sm:$0xf]  ;;  %v173_v23 = vld [vmem:[%s2107_s5 + $0x4] sm:$0xf] }
  0x13   : > { %1843 = vmatpush3.bf16.msra.mxu1 %v1926_v5  ;;  %v1941_v20 = vld [vmem:[%s2450_s1 + $0x88] sm:$0xff]   ;;  %v1943_v24 = vld [vmem:[%s2450_s1] sm:$0xff]   ;;  %v1465_v26 = vcombine.low %v172_v22, %v173_v23  ;;  %v2133_v35 = vld [vmem:[%s2107_s5 + $0x10] sm:$0xff]  }
  0x14   : > { %1844 = vmatprep.subr.bf16.mxu1 %v1929_v8  ;;  %v1944_v25 = vld [vmem:[%s2450_s1 + $0x80] sm:$0xff]   ;;  %v2124_v27 = vld [vmem:[%s2107_s5 + $0x8] sm:$0xff]   ;;  %v291_v39 = vrot.slane %v2133_v35, 1  ;;  %v1951_v40 = vld [vmem:[%s2450_s1 + $0x178] sm:$0xff]   ;;  %v242_v48 = vshll.u32 %v2133_v35, 16  ;;  %v246_v56 = vshrl.u32 %v2133_v35, 16 }
  0x15   : > { %1689 = vmatpush3.bf16.msra.mxu0 %v1928_v7  ;;  %v185_v28 = vld [vmem:[%s2107_s5] sm:$0xe]  ;;  %v227_v29 = vshrl.u32 %v1465_v26, 16  ;;  %v229_v30 = vshll.u32 %v1465_v26, 16  ;;  %v234_v31 = vshll.u32 %v2124_v27, 16  ;;  %v289_v34 = vrot.slane %v2124_v27, 1 }
  0x16   : > { %1690 = vmatprep.subr.bf16.mxu0 %v1930_v9  ;;  %v1472_v33 = vcombine.low %v185_v28, %v173_v23  ;;  %v1949_v43 = vld [vmem:[%s2450_s1 + $0xf8] sm:$0xff]   ;;  %v238_v44 = vshrl.u32 %v2124_v27, 16  ;;  %v1952_v47 = vld [vmem:[%s2450_s1 + $0x130] sm:$0xff]   ;;  %v244_v51 = vrot.slane %v242_v48, 1  ;;  %v1955_v54 = vld [vmem:[%s2450_s1 + $0x128] sm:$0xff]  }
  0x17   : > { %1845 = vmatpush3.bf16.msra.mxu1 %v1929_v8  ;;  %v231_v36 = vrot.slane %v229_v30, 1  ;;  %v236_v37 = vrot.slane %v234_v31, 1  ;;  %v292_v46 = vsel %vm287_vm0, %v289_v34, %v291_v39  ;;  %v1954_v49 = vld [vmem:[%s2450_s1 + $0x170] sm:$0xff]   ;;  %v1957_v55 = vld [vmem:[%s2450_s1 + $0x168] sm:$0xff]   ;;  %v2171_v58 = vld [vmem:[%s2107_s5 + $0x18] sm:$0xff]  }
  0x18   : > { %1846 = vmatprep.subr.bf16.mxu1 %v1932_v11  ;;  %v288_v38 = vrot.slane %v1472_v33, 1  ;;  %v1953_v52 = vld [vmem:[%s2450_s1 + $0xf0] sm:$0xff]   ;;  %v1956_v57 = vld [vmem:[%s2450_s1 + $0xe8] sm:$0xff]   ;;  %v1958_v59 = vld [vmem:[%s2450_s1 + $0x120] sm:$0xff]   ;;  %v248_v61 = vor.u32 %v246_v56, %v244_v51  ;;  %v250_v62 = vshll.u32 %v2171_v58, 16  ;;  %v293_v63 = vrot.slane %v2171_v58, 1 }
  0x19   : > { %1691 = vmatpush3.bf16.msra.mxu0 %v1931_v10  ;;  %v232_v41 = vor.u32 %v231_v36, %v227_v29  ;;  %v240_v50 = vor.u32 %v238_v44, %v236_v37  ;;  %v1960_v60 = vld [vmem:[%s2450_s1 + $0x160] sm:$0xff]   ;;  %v1962_v3 = vld [vmem:[%s2450_s1 + $0x118] sm:$0xff]   ;;  %v254_v9 = vshrl.u32 %v2171_v58, 16  ;;  %v1978_v28 = vld [vmem:[%s2450_s1 + $0x1f0] sm:$0xff]  }
  0x1a   : > { %1692 = vmatprep.subr.bf16.mxu0 %v1933_v12  ;;  %v290_v42 = vsel %vm287_vm0, %v288_v38, %v289_v34  ;;  %v2182_v0 = vld [vmem:[%s2107_s5 + $0x20] sm:$0xff]   ;;  %v252_v2 = vrot.slane %v250_v62, 1  ;;  %v2192_v4 = vsel %vm287_vm0, %v291_v39, %v293_v63  ;;  %v1965_v8 = vld [vmem:[%s2450_s1 + $0x158] sm:$0xff]   ;;  %v1980_v29 = vld [vmem:[%s2450_s1 + $0x230] sm:$0xff]  }
  0x1b   : > { %1847 = vmatpush3.bf16.msra.mxu1 %v1932_v11  ;;  %1856 = vmatprep.mubr.bf16.mxu1 %v290_v42  ;;  %v237_v45 = vsel %vm225_vm1, %v232_v41, %v236_v37  ;;  %v2157_v53 = vsel %vm225_vm1, %v240_v50, %v244_v51  ;;  %v1959_v1 = vld [vmem:[%s2450_s1 + $0xe0] sm:$0xff]   ;;  %v295_v5 = vrot.slane %v2182_v0, 1  ;;  %v258_v10 = vshll.u32 %v2182_v0, 16  ;;  %v1963_v11 = vld [vmem:[%s2450_s1 + $0xd8] sm:$0xff]   ;;  %v1979_v30 = vld [vmem:[%s2450_s1 + $0x1b0] sm:$0xff]  }
  0x1c   : > { %1848 = vmatprep.subr.bf16.mxu1 %v1935_v13  ;;  %531 = vmatprep.mubr.bf16.mxu0 %v237_v45  ;;  %v2196_v6 = vsel %vm225_vm1, %v248_v61, %v252_v2  ;;  %v256_v12 = vor.u32 %v254_v9, %v252_v2  ;;  %v1974_v22 = vld [vmem:[%s2450_s1 + $0x140] sm:$0xff]   ;;  %v2272_v31 = vld [vmem:[%s2107_s5 + $0x28] sm:$0xff]   ;;  %v262_v36 = vshrl.u32 %v2182_v0, 16  ;;  %v1987_v42 = vld [vmem:[%s2450_s1 + $0x1d8] sm:$0xff]  }
  0x1d   : > { %1693 = vmatpush3.bf16.msra.mxu0 %v1934_v14  ;;  %v2202_v7 = vsel %vm287_vm0, %v293_v63, %v295_v5  ;;  %v2217_v14 = vrot.slane %v258_v10, 1  ;;  %v1973_v23 = vld [vmem:[%s2450_s1 + $0xc0] sm:$0xff]   ;;  %v297_v33 = vrot.slane %v2272_v31, 1  ;;  %v1982_v34 = vld [vmem:[%s2450_s1 + $0x1a8] sm:$0xff]   ;;  %v266_v38 = vshll.u32 %v2272_v31, 16  ;;  %v1988_v48 = vld [vmem:[%s2450_s1 + $0x198] sm:$0xff]  }
  0x1e   : > { %1694 = vmatprep.subr.bf16.mxu0 %v1936_v15  ;;  %v1968_v15 = vld [vmem:[%s2450_s1 + $0x150] sm:$0xff]   ;;  %v1984_v37 = vld [vmem:[%s2450_s1 + $0x1e0] sm:$0xff]   ;;  %v270_v45 = vshrl.u32 %v2272_v31, 16  ;;  %v1996_v61 = vld [vmem:[%s2450_s1 + $0x208] sm:$0xff]  }
  0x1f   : > { %1849 = vmatpush3.bf16.msra.mxu1 %v1935_v13  ;;  %v1966_v13 = vld [vmem:[%s2450_s1 + $0x110] sm:$0xff]   ;;  %v1986_v39 = vld [vmem:[%s2450_s1 + $0x220] sm:$0xff]   ;;  %v298_v41 = vsel %vm287_vm0, %v295_v5, %v297_v33  ;;  %v268_v44 = vrot.slane %v266_v38, 1  ;;  %v1995_v62 = vld [vmem:[%s2450_s1 + $0x188] sm:$0xff]  }
  0x20   : > { %1850 = vmatprep.subr.bf16.mxu1 %v1938_v16  ;;  %v1997_v63 = vld [vmem:[%s2450_s1 + $0x1c0] sm:$0xff]  }
  0x21   : > { %1695 = vmatpush3.bf16.msra.mxu0 %v1937_v17  ;;  %v1967_v17 = vld [vmem:[%s2450_s1 + $0xd0] sm:$0xff]   ;;  %v1998_v2 = vld [vmem:[%s2450_s1 + $0x180] sm:$0xff]  }
  0x22   : > { %1696 = vmatprep.subr.bf16.mxu0 %v1939_v18  ;;  %v1969_v18 = vld [vmem:[%s2450_s1 + $0x108] sm:$0xff]  }
  0x23   : > { %1851 = vmatpush3.bf16.msra.mxu1 %v1938_v16  ;;  %v2225_v16 = vsel %vm225_vm1, %v256_v12, %v2217_v14 }
  0x24   : > { %1852 = vmatprep.subr.bf16.mxu1 %v1941_v20 }
  0x25   : > { %1697 = vmatpush3.bf16.msra.mxu0 %v1940_v19  ;;  %v1971_v19 = vld [vmem:[%s2450_s1 + $0x148] sm:$0xff]  }
  0x26   : > { %1698 = vmatprep.subr.bf16.mxu0 %v1942_v21  ;;  %v1972_v21 = vld [vmem:[%s2450_s1 + $0x100] sm:$0xff]  }
  0x27   : > { %1853 = vmatpush3.bf16.msra.mxu1 %v1941_v20  ;;  %v1970_v20 = vld [vmem:[%s2450_s1 + $0xc8] sm:$0xff]  }
  0x28   : > { %1854 = vmatprep.subr.bf16.mxu1 %v1944_v25 }
  0x29   : > { %1699 = vmatpush3.bf16.msra.mxu0 %v1943_v24  ;;  %v1975_v24 = vld [vmem:[%s2450_s1 + $0x1f8] sm:$0xff]  }
  0x2a   : > { %1736 = vmatprep.subr.bf16.mxu0 %v1947_v32  ;;  %v1981_v32 = vld [vmem:[%s2450_s1 + $0x1e8] sm:$0xff]  }
  0x2b   : > { %1855 = vmatpush3.bf16.msra.mxu1 %v1944_v25  ;;  %v1977_v25 = vld [vmem:[%s2450_s1 + $0x238] sm:$0xff]  }
  0x2c   : > { %1864 = vmatprep.subr.bf16.mxu1 %v1951_v40  ;;  %532 = vmatmul.mubr.bf16.vlgmr.msra.gmra.mxu0 %v1465_v26  ;;  %v1976_v26 = vld [vmem:[%s2450_s1 + $0x1b8] sm:$0xff]  }
  0x2d   : > { %1737 = vmatpush3.bf16.msra.mxu0 %v1949_v43  ;;  %539 = vmatprep.mubr.bf16.mxu0 %v2157_v53  ;;  %v264_v43 = vor.u32 %v262_v36, %v2217_v14 }
  0x2e   : > { %1857 = vmatmul.mubr.bf16.vlgmr.msra.gmra.mxu1 %v292_v46  ;;  %1738 = vmatprep.subr.bf16.mxu0 %v1952_v47  ;;  %v2000_v47 = vld [vmem:[%s2107_s5 + $0x30] ss:$0 sps:$4 sm:$0x11]  }
  0x2f   : > { %1865 = vmatpush3.bf16.msra.mxu1 %v1951_v40  ;;  %1860 = vmatprep.mubr.bf16.mxu1 %v2192_v4  ;;  %v1985_v40 = vld [vmem:[%s2450_s1 + $0x1a0] sm:$0xff]   ;;  %v269_v50 = vsel %vm225_vm1, %v264_v43, %v268_v44  ;;  %v299_v51 = vrot.slane %v2000_v47, 1 }
  0x30   : > { %1866 = vmatprep.subr.bf16.mxu1 %v1954_v49 }
  0x31   : > { %1739 = vmatpush3.bf16.msra.mxu0 %v1953_v52  ;;  %v272_v52 = vor.u32 %v270_v45, %v268_v44 }
  0x32   : > { %1740 = vmatprep.subr.bf16.mxu0 %v1955_v54  ;;  %v1993_v54 = vld [vmem:[%s2450_s1 + $0x210] sm:$0xff]  }
  0x33   : > { %1867 = vmatpush3.bf16.msra.mxu1 %v1954_v49  ;;  %v1991_v49 = vld [vmem:[%s2450_s1 + $0x1d0] sm:$0xff]  }
  0x34   : > { %1868 = vmatprep.subr.bf16.mxu1 %v1957_v55  ;;  %540 = vmatmul.mubr.bf16.gmra.mxu0 %v2124_v27 }
  0x35   : > { %1741 = vmatpush3.bf16.msra.mxu0 %v1956_v57  ;;  %547 = vmatprep.mubr.bf16.mxu0 %v2196_v6  ;;  %v1992_v57 = vld [vmem:[%s2450_s1 + $0x190] sm:$0xff]  }
  0x36   : > { %1742 = vmatprep.subr.bf16.mxu0 %v1958_v59  ;;  %1861 = vmatmul.mubr.bf16.gmra.mxu1 %v2202_v7  ;;  %v1994_v59 = vld [vmem:[%s2450_s1 + $0x1c8] sm:$0xff]  }
  0x37   : > { %1869 = vmatpush3.bf16.msra.mxu1 %v1957_v55  ;;  %1880 = vmatprep.mubr.bf16.mxu1 %v292_v46  ;;  %v1990_v46 = vld [vmem:[%s2450_s1 + $0x218] sm:$0xff]   ;;  %v300_v55 = vsel %vm287_vm0, %v297_v33, %v299_v51 }
  0x38   : > { %1870 = vmatprep.subr.bf16.mxu1 %v1960_v60 }
  0x39   : > { %1743 = vmatpush3.bf16.msra.mxu0 %v1959_v1  ;;  %v1999_v1 = vld [vmem:[%s2450_s1 + $0x200] sm:$0xff]  }
  0x3a   : > { %1744 = vmatprep.subr.bf16.mxu0 %v1962_v3 }
  0x3b   : > { %1871 = vmatpush3.bf16.msra.mxu1 %v1960_v60 }
  0x3c   : > { %1872 = vmatprep.subr.bf16.mxu1 %v1965_v8  ;;  %548 = vmatmul.mubr.bf16.gmra.mxu0 %v2133_v35 }
  0x3d   : > { %1745 = vmatpush3.bf16.msra.mxu0 %v1963_v11  ;;  %555 = vmatprep.mubr.bf16.mxu0 %v2225_v16 }
  0x3e   : > { %1746 = vmatprep.subr.bf16.mxu0 %v1966_v13 }
  0x3f   : > { %1873 = vmatpush3.bf16.msra.mxu1 %v1965_v8 }
  0x40   : > { %1874 = vmatprep.subr.bf16.mxu1 %v1968_v15 }
  0x41   : > { %1747 = vmatpush3.bf16.msra.mxu0 %v1967_v17 }
  0x42   : > { %1748 = vmatprep.subr.bf16.mxu0 %v1969_v18 }
  0x43   : > { %1875 = vmatpush3.bf16.msra.mxu1 %v1968_v15 }
  0x44   : > { %1876 = vmatprep.subr.bf16.mxu1 %v1971_v19  ;;  %556 = vmatmul.mubr.bf16.gmra.mxu0 %v2171_v58 }
  0x45   : > { %1749 = vmatpush3.bf16.msra.mxu0 %v1970_v20  ;;  %862 = vmatprep.mubr.bf16.mxu0 %v2157_v53  ;;  %v274_v53 = vshll.u32 %v2000_v47, 16 }
  0x46   : > { %1750 = vmatprep.subr.bf16.mxu0 %v1972_v21 }
  0x47   : > { %1877 = vmatpush3.bf16.msra.mxu1 %v1971_v19  ;;  %v276_v56 = vrot.slane %v274_v53, 1 }
  0x48   : > { %1878 = vmatprep.subr.bf16.mxu1 %v1974_v22 }
  0x49   : > { %1751 = vmatpush3.bf16.msra.mxu0 %v1973_v23  ;;  %v277_v60 = vsel %vm225_vm1, %v272_v52, %v276_v56 }
  0x4a   : > { %1788 = vmatprep.subr.bf16.mxu0 %v1975_v24 }
  0x4b   : > { %1879 = vmatpush3.bf16.msra.mxu1 %v1974_v22 }
  0x4c   : > { %1888 = vmatprep.subr.bf16.mxu1 %v1977_v25  ;;  %863 = vmatmul.mubr.bf16.vlgmr.msra.gmra.mxu0 %v2124_v27  ;;  %v1983_v27 = vld [vmem:[%s2450_s1 + $0x228] sm:$0xff]  }
  0x4d   : > { %1789 = vmatpush3.bf16.msra.mxu0 %v1976_v26  ;;  %870 = vmatprep.mubr.bf16.mxu0 %v2196_v6 }
  0x4e   : > { %1881 = vmatmul.mubr.bf16.vlgmr.msra.gmra.mxu1 %v2192_v4  ;;  %1790 = vmatprep.subr.bf16.mxu0 %v1978_v28 }
  0x4f   : > { %1889 = vmatpush3.bf16.msra.mxu1 %v1977_v25  ;;  %1884 = vmatprep.mubr.bf16.mxu1 %v2202_v7 }
  0x50   : > { %1890 = vmatprep.subr.bf16.mxu1 %v1980_v29 }
  0x51   : > { %1791 = vmatpush3.bf16.msra.mxu0 %v1979_v30 }
  0x52   : > { %1792 = vmatprep.subr.bf16.mxu0 %v1981_v32 }
  0x53   : > { %1891 = vmatpush3.bf16.msra.mxu1 %v1980_v29 }
  0x54   : > { %1892 = vmatprep.subr.bf16.mxu1 %v1983_v27  ;;  %871 = vmatmul.mubr.bf16.gmra.mxu0 %v2133_v35 }
  0x55   : > { %1793 = vmatpush3.bf16.msra.mxu0 %v1982_v34  ;;  %878 = vmatprep.mubr.bf16.mxu0 %v2225_v16 }
  0x56   : > { %1794 = vmatprep.subr.bf16.mxu0 %v1984_v37  ;;  %1885 = vmatmul.mubr.bf16.gmra.mxu1 %v298_v41 }
  0x57   : > { %1893 = vmatpush3.bf16.msra.mxu1 %v1983_v27  ;;  %1904 = vmatprep.mubr.bf16.mxu1 %v2192_v4 }
  0x58   : > { %1894 = vmatprep.subr.bf16.mxu1 %v1986_v39 }
  0x59   : > { %1795 = vmatpush3.bf16.msra.mxu0 %v1985_v40 }
  0x5a   : > { %1796 = vmatprep.subr.bf16.mxu0 %v1987_v42 }
  0x5b   : > { %1895 = vmatpush3.bf16.msra.mxu1 %v1986_v39 }
  0x5c   : > { %1896 = vmatprep.subr.bf16.mxu1 %v1990_v46  ;;  %879 = vmatmul.mubr.bf16.gmra.mxu0 %v2171_v58 }
  0x5d   : > { %1797 = vmatpush3.bf16.msra.mxu0 %v1988_v48  ;;  %886 = vmatprep.mubr.bf16.mxu0 %v269_v50 }
  0x5e   : > { %1798 = vmatprep.subr.bf16.mxu0 %v1991_v49 }
  0x5f   : > { %1897 = vmatpush3.bf16.msra.mxu1 %v1990_v46 }
  0x60   : > { %1898 = vmatprep.subr.bf16.mxu1 %v1993_v54 }
  0x61   : > { %1799 = vmatpush3.bf16.msra.mxu0 %v1992_v57 }
  0x62   : > { %1800 = vmatprep.subr.bf16.mxu0 %v1994_v59 }
  0x63   : > { %1899 = vmatpush3.bf16.msra.mxu1 %v1993_v54 }
  0x64   : > { %1900 = vmatprep.subr.bf16.mxu1 %v1996_v61  ;;  %887 = vmatmul.mubr.bf16.gmra.mxu0 %v2182_v0 }
  0x65   : > { %1801 = vmatpush3.bf16.msra.mxu0 %v1995_v62  ;;  %1209 = vmatprep.mubr.bf16.mxu0 %v2196_v6 }
  0x66   : > { %1802 = vmatprep.subr.bf16.mxu0 %v1997_v63 }
  0x67   : > { %1901 = vmatpush3.bf16.msra.mxu1 %v1996_v61 }
  0x68   : > { %1902 = vmatprep.subr.bf16.mxu1 %v1999_v1 }
  0x69   : > { %1803 = vmatpush3.bf16.msra.mxu0 %v1998_v2 }
  0x6b   : > { %1903 = vmatpush3.bf16.msra.mxu1 %v1999_v1 }
  0x6c   : > { %1210 = vmatmul.mubr.bf16.vlgmr.msra.gmra.mxu0 %v2133_v35 }
  0x6d   : > { %1217 = vmatprep.mubr.bf16.mxu0 %v2225_v16 }
  0x6e   : > { %1905 = vmatmul.mubr.bf16.vlgmr.msra.gmra.mxu1 %v2202_v7 }
  0x6f   : > { %1908 = vmatprep.mubr.bf16.mxu1 %v298_v41 }
  0x74   : > { %1218 = vmatmul.mubr.bf16.gmra.mxu0 %v2171_v58 }
  0x75   : > { %1225 = vmatprep.mubr.bf16.mxu0 %v269_v50 }
  0x76   : > { %1909 = vmatmul.mubr.bf16.gmra.mxu1 %v300_v55 }
  0x7c   : > { %1226 = vmatmul.mubr.bf16.gmra.mxu0 %v2182_v0 }
  0x7d   : > { %1233 = vmatprep.mubr.bf16.mxu0 %v277_v60 }
  0x84   : > { %1234 = vmatmul.mubr.bf16.gmra.mxu0 %v2272_v31 }
  0xec   : > { %v1700_v3 = vpop.f32.mrf.mxu0 }
  0xee   : > { %v1701_v4 = vpop.f32.mrf.mxu0  ;;  %v2354_v9 = vpop.f32.mrf.mxu1 }
  0xef   : > { %v1702_v5 = vadd.f32 %v1701_v4, %v1700_v3 }
  0xf0   : > { %v1703_v6 = vpop.f32.mrf.mxu0  ;;  %v598_v58 = vpop.f32.mrf.mxu1 }
  0xf1   : > { %v599_v60 = vadd.f32 %v1702_v5, %v598_v58 }
  0xf2   : > { %v1704_v8 = vpop.f32.mrf.mxu0  ;;  %v2362_v13 = vpop.f32.mrf.mxu1 }
  0xf3   : > { %v1705_v61 = vadd.f32 %v1704_v8, %v1703_v6 }
  0xf4   : > { %v1706_v35 = vpop.f32.mrf.mxu0  ;;  %v601_v17 = vpop.f32.mrf.mxu1 }
  0xf6   : > { %v1707_v7 = vpop.f32.mrf.mxu0  ;;  %v2370_v19 = vpop.f32.mrf.mxu1 }
  0xf7   : > { %v2356_v10 = vadd.f32 %v1707_v7, %v1706_v35 }
  0xf8   : > { %v2358_v11 = vpop.f32.mrf.mxu0  ;;  %v2372_v22 = vpop.f32.mrf.mxu1 }
  0xfa   : > { %v2360_v12 = vpop.f32.mrf.mxu0  ;;  %v2380_v26 = vpop.f32.mrf.mxu1 }
  0xfc   : > { %v1712_v0 = vpop.f32.mrf.mxu0  ;;  %v2382_v30 = vpop.f32.mrf.mxu1 }
  0xfe   : > { %v1713_v14 = vpop.f32.mrf.mxu0 }
  0xff   : > { %v2364_v15 = vadd.f32 %v1713_v14, %v1712_v0  ;;  %v602_v14 = vadd.f32 %v1705_v61, %v601_v17  ;;  %v1711_v17 = vadd.f32 %v2360_v12, %v2358_v11 }
 0x100   : > { %v2366_v16 = vpop.f32.mrf.mxu0 }
 0x102   : > { %v2368_v18 = vpop.f32.mrf.mxu0 }
 0x104   : > { %v1718_v20 = vpop.f32.mrf.mxu0 }
 0x106   : > { %v1719_v21 = vpop.f32.mrf.mxu0 }
 0x107   : > { %v2374_v23 = vadd.f32 %v1719_v21, %v1718_v20 }
 0x108   : > { %v2376_v24 = vpop.f32.mrf.mxu0 }
 0x10a   : > { %v2378_v25 = vpop.f32.mrf.mxu0 }
 0x10c   : > { %v1752_v28 = vpop.f32.mrf.mxu0 }
 0x10e   : > { %v1753_v29 = vpop.f32.mrf.mxu0  ;;  %v1882_v32 = vpop.f32.mrf.mxu1 }
 0x10f   : > { %v1754_v51 = vadd.f32 %v1753_v29, %v1752_v28 }
 0x110   : > { %v1755_v31 = vpop.f32.mrf.mxu0  ;;  %v929_v34 = vpop.f32.mrf.mxu1 }
 0x111   : > { %v930_v55 = vadd.f32 %v1754_v51, %v929_v34 }
 0x112   : > { %v1756_v27 = vpop.f32.mrf.mxu0  ;;  %v1883_v38 = vpop.f32.mrf.mxu1 }
 0x113   : > { %v1757_v56 = vadd.f32 %v1756_v27, %v1755_v31  ;;  %v968_v3 = vadd.f32 %v930_v55, %v599_v60  ;;  %v2401_v31 = vld [vmem:[%s2451_s2] ss:$0 sm:$0xff]  ;;  %v607_v27 = vadd.f32 %v2354_v9, %v2356_v10  ;;  %v610_v9 = vadd.f32 %v2362_v13, %v1711_v17 }
 0x114   : > { %v1758_v33 = vpop.f32.mrf.mxu0  ;;  %v932_v41 = vpop.f32.mrf.mxu1  ;;  %v1717_v13 = vadd.f32 %v2368_v18, %v2366_v16 }
 0x115   : > { %v933_v4 = vadd.f32 %v1757_v56, %v932_v41 }
 0x116   : > { %v1759_v36 = vpop.f32.mrf.mxu0  ;;  %v2384_v43 = vpop.f32.mrf.mxu1  ;;  %v618_v18 = vadd.f32 %v1717_v13, %v2382_v30 }
 0x117   : > { %v1760_v1 = vadd.f32 %v1759_v36, %v1758_v33  ;;  %v969_v6 = vadd.f32 %v933_v4, %v602_v14 }
 0x118   : > { %v1761_v37 = vpop.f32.mrf.mxu0  ;;  %v945_v46 = vpop.f32.mrf.mxu1 }
 0x119   : > { %v938_v29 = vadd.f32 %v1882_v32, %v1760_v1 }
 0x11a   : > { %v1762_v39 = vpop.f32.mrf.mxu0  ;;  %v2390_v49 = vpop.f32.mrf.mxu1 }
 0x11b   : > { %v1763_v8 = vadd.f32 %v1762_v39, %v1761_v37  ;;  %v970_v51 = vadd.f32 %v938_v29, %v607_v27  ;;  %v623_v27 = vadd.f32 %v2370_v19, %v2374_v23 }
 0x11c   : > { %v1764_v40 = vpop.f32.mrf.mxu0  ;;  %v2396_v53 = vpop.f32.mrf.mxu1 }
 0x11d   : > { %v941_v55 = vadd.f32 %v1883_v38, %v1763_v8 }
 0x11e   : > { %v1765_v42 = vpop.f32.mrf.mxu0 }
 0x11f   : > { %v1766_v56 = vadd.f32 %v1765_v42, %v1764_v40  ;;  %v971_v40 = vadd.f32 %v941_v55, %v610_v9 }
 0x120   : > { %v1767_v44 = vpop.f32.mrf.mxu0 }
 0x121   : > { %v946_v42 = vadd.f32 %v1766_v56, %v945_v46 }
 0x122   : > { %v1768_v45 = vpop.f32.mrf.mxu0 }
 0x124   : > { %v2386_v47 = vpop.f32.mrf.mxu0 }
 0x126   : > { %v2388_v48 = vpop.f32.mrf.mxu0 }
 0x127   : > { %v1772_v46 = vadd.f32 %v2388_v48, %v2386_v47 }
 0x128   : > { %v2392_v50 = vpop.f32.mrf.mxu0 }
 0x12a   : > { %v2394_v52 = vpop.f32.mrf.mxu0 }
 0x12b   : > { %v1775_v8 = vadd.f32 %v2394_v52, %v2392_v50 }
 0x12c   : > { %v1804_v54 = vpop.f32.mrf.mxu0 }
 0x12e   : > { %v1906_v57 = vpop.f32.mrf.mxu1  ;;  %v1805_v59 = vpop.f32.mrf.mxu0 }
 0x12f   : > { %v1806_v62 = vadd.f32 %v1805_v59, %v1804_v54 }
 0x130   : > { %v1276_v63 = vpop.f32.mrf.mxu1  ;;  %v1807_v2 = vpop.f32.mrf.mxu0 }
 0x131   : > { %v1277_v35 = vadd.f32 %v1806_v62, %v1276_v63  ;;  %v1769_v62 = vadd.f32 %v1768_v45, %v1767_v44 }
 0x132   : > { %v1907_v7 = vpop.f32.mrf.mxu1  ;;  %v1808_v0 = vpop.f32.mrf.mxu0 }
 0x133   : > { %v1315_v20 = vadd.f32 %v1277_v35, %v968_v3  ;;  %v1809_v21 = vadd.f32 %v1808_v0, %v1807_v2  ;;  %v615_v3 = vadd.f32 %v2364_v15, %v2372_v22  ;;  %v949_v35 = vadd.f32 %v1769_v62, %v2396_v53 }
 0x134   : > { %v1279_v28 = vpop.f32.mrf.mxu1  ;;  %v1810_v5 = vpop.f32.mrf.mxu0  ;;  %v954_v53 = vadd.f32 %v2384_v43, %v1772_v46 }
 0x135   : > { %v1280_v58 = vadd.f32 %v1809_v21, %v1279_v28  ;;  %v1346_v32 = vadd.f32 %v2401_v31, %v1315_v20  ;;  %v972_v14 = vadd.f32 %v946_v42, %v615_v3 }
 0x136   : > { %v1811_v33 = vpop.f32.mrf.mxu0  ;;  %v2407_v34 = vpop.f32.mrf.mxu1  ;;  %v974_v43 = vadd.f32 %v954_v53, %v623_v27 }
 0x137   : > { %v1316_v36 = vadd.f32 %v1280_v58, %v969_v6  ;;  %v1812_v41 = vadd.f32 %v1811_v33, %v1810_v5  ;;  %v1354_v11 = vmax.f32 %v1346_v32, 0.0  ;;  %v973_v5 = vadd.f32 %v949_v35, %v618_v18 }
 0x138   : > { %v1813_v54 = vpop.f32.mrf.mxu0  ;;  %v1292_v59 = vpop.f32.mrf.mxu1  ;;  %v1723_v58 = vadd.f32 %v2378_v25, %v2376_v24 }
 0x139   : > { %v1347_v37 = vadd.f32 %v2401_v31, %v1316_v36  ;;  %v1285_v39 = vadd.f32 %v1906_v57, %v1812_v41  ;;  %v957_v41 = vadd.f32 %v2390_v49, %v1775_v8 }
 0x13a   : > { %v1814_v10 = vpop.f32.mrf.mxu0  ;;  %v1911_v2 = vpop.f32.mrf.mxu1  ;;  %v626_v24 = vadd.f32 %v2380_v26, %v1723_v58 }
 0x13b   : > { %v1355_v12 = vmax.f32 %v1347_v37, 0.0  ;;  %v1317_v60 = vadd.f32 %v1285_v39, %v970_v51  ;;  %v1815_v61 = vadd.f32 %v1814_v10, %v1813_v54 }
 0x13c   : > { %v1816_v38 = vpop.f32.mrf.mxu0  ;;  %v1295_v15 = vpop.f32.mrf.mxu1  ;;  %v975_v55 = vadd.f32 %v957_v41, %v626_v24 }
 0x13d   : > { %v1664_v63 = vpack.c.bf16 %v1355_v12, %v1354_v11  ;;  %v1288_v57 = vadd.f32 %v1907_v7, %v1815_v61  ;;  %v1348_v44 = vadd.f32 %v2401_v31, %v1317_v60 }
 0x13e   : > { %v1817_v1 = vpop.f32.mrf.mxu0 }
 0x13f   : > { %1665 = vst [vmem:[%s2416_s20] sm:$0xff] %v1664_v63   ;;  %v1318_v45 = vadd.f32 %v1288_v57, %v971_v40  ;;  %v1818_v4 = vadd.f32 %v1817_v1, %v1816_v38  ;;  %v1356_v22 = vmax.f32 %v1348_v44, 0.0 }
 0x140   : > { %v1819_v0 = vpop.f32.mrf.mxu0 }
 0x141   : > { %v1349_v7 = vadd.f32 %v2401_v31, %v1318_v45  ;;  %v1293_v16 = vadd.f32 %v1818_v4, %v1292_v59 }
 0x142   : > { %v1820_v20 = vpop.f32.mrf.mxu0 }
 0x143   : > { %v1357_v21 = vmax.f32 %v1349_v7, 0.0  ;;  %v1319_v28 = vadd.f32 %v1293_v16, %v972_v14  ;;  %v1821_v29 = vadd.f32 %v1820_v20, %v1819_v0 }
 0x144   : > { %v1822_v6 = vpop.f32.mrf.mxu0 }
 0x145   : > { %v1669_v47 = vpack.c.bf16 %v1357_v21, %v1356_v22  ;;  %v1296_v48 = vadd.f32 %v1821_v29, %v1295_v15  ;;  %v1350_v17 = vadd.f32 %v2401_v31, %v1319_v28 }
 0x146   : > { %v1823_v30 = vpop.f32.mrf.mxu0 }
 0x147   : > { %1681 = vst [vmem:[%s2416_s20 + $0x8] sm:$0xff] %v1669_v47   ;;  %v1320_v33 = vadd.f32 %v1296_v48, %v973_v5  ;;  %v1824_v32 = vadd.f32 %v1823_v30, %v1822_v6  ;;  %v1358_v51 = vmax.f32 %v1350_v17, 0.0 }
 0x148   : > { %v1825_v36 = vpop.f32.mrf.mxu0 }
 0x149   : > { %v1351_v50 = vadd.f32 %v2401_v31, %v1320_v33  ;;  %v1301_v52 = vadd.f32 %v2407_v34, %v1824_v32 }
 0x14a   : > { %v1826_v25 = vpop.f32.mrf.mxu0 }
 0x14b   : > { %v1359_v19 = vmax.f32 %v1351_v50, 0.0  ;;  %v1321_v23 = vadd.f32 %v1301_v52, %v974_v43  ;;  %v1827_v54 = vadd.f32 %v1826_v25, %v1825_v36 }
 0x14d   : > { %v1674_v56 = vpack.c.bf16 %v1359_v19, %v1358_v51  ;;  %v1304_v37 = vadd.f32 %v1911_v2, %v1827_v54  ;;  %v1352_v39 = vadd.f32 %v2401_v31, %v1321_v23 }
 0x14f   : > { %1682 = vst [vmem:[%s2416_s20 + $0x10] sm:$0xff] %v1674_v56   ;;  %v1322_v9 = vadd.f32 %v1304_v37, %v975_v55  ;;  %v1360_v10 = vmax.f32 %v1352_v39, 0.0 }
 0x151   : > { %v1353_v49 = vadd.f32 %v2401_v31, %v1322_v9 }
 0x153   : > { %v1361_v59 = vmax.f32 %v1353_v49, 0.0 }
 0x155   : > { %v1679_v34 = vpack.c.bf16 %v1361_v59, %v1360_v10 }
 0x157   : > { %1683 = vst [vmem:[%s2416_s20 + $0x18] sm:$0xff] %v1679_v34  }
 0x158 PF: > { %s13_s12 = sadd.s32 1, %s2007_s12  }
 0x159   : > { %p10_p4 = scmp.ge.s32.totalorder %s13_s12, 4  }
 0x15b   :  { %12 = sbr.rel (!%p10_p4) target bundleno = 1 (0x1), region = 64 }

// kernel: _lambda_.27
= control target key start
LH: loop header
LB: loop body
LE: loop exit
PB: predicated region body
PF: predicated region fallthrough
CT: control target
= control target key end

     0   :  { %v195_v0 = vmov 0.0   ;;  %vm196_vm0 = vmmov 0   ;;  %s250_s1 = inlined_call_operand.vmem [shape: bf16[128,128], index: 1, kind: input, shape index: {}]   ;;  %s251_s0 = inlined_call_operand.vmem [shape: bf16[8,128], index: 0, kind: input, shape index: {}]   ;;  %s252_s2 = inlined_call_operand.vmem [shape: f32[1,128], index: 2, kind: input, shape index: {}]   ;;  %s253_s3 = inlined_call_operand.vmem [shape: bf16[8,128], index: 3, kind: output, shape index: {}]  }
   0x1   :  { %165 = vmatprep.subr.bf16.mxu0 %v195_v0  ;;  %v187_v1 = vld [vmem:[%s250_s1 + $0x38] sm:$0xff]   ;;  %181 = vmatprep.mubr.msk.bf16.mxu0 %vm196_vm0, %v195_v0  ;;  %v188_v2 = vld [vmem:[%s250_s1 + $0x30] sm:$0xff]   ;;  %v189_v3 = vld [vmem:[%s250_s1 + $0x28] sm:$0xff]  }
   0x2   :  { %166 = vmatpush3.bf16.msra.mxu0 %v187_v1  ;;  %v190_v4 = vld [vmem:[%s250_s1 + $0x20] sm:$0xff]   ;;  %v191_v5 = vld [vmem:[%s250_s1 + $0x18] sm:$0xff]   ;;  %v192_v6 = vld [vmem:[%s250_s1 + $0x10] sm:$0xff]  }
   0x3   :  { %167 = vmatprep.subr.bf16.mxu0 %v195_v0  ;;  %v193_v7 = vld [vmem:[%s250_s1 + $0x8] sm:$0xff]   ;;  %v194_v8 = vld [vmem:[%s250_s1] sm:$0xff]  }
   0x4   :  { %v21_v9 = vld [vmem:[%s251_s0] sm:$0xf] }
   0x5   :  { %v155_v10 = vld [vmem:[%s252_s2] ss:$0 sm:$0xff] }
   0x6   :  { %168 = vmatpush3.bf16.msra.mxu0 %v188_v2 }
   0x7   :  { %169 = vmatprep.subr.bf16.mxu0 %v195_v0 }
   0xa   :  { %170 = vmatpush3.bf16.msra.mxu0 %v189_v3 }
   0xb   :  { %171 = vmatprep.subr.bf16.mxu0 %v195_v0 }
   0xe   :  { %172 = vmatpush3.bf16.msra.mxu0 %v190_v4 }
   0xf   :  { %173 = vmatprep.subr.bf16.mxu0 %v195_v0 }
  0x12   :  { %174 = vmatpush3.bf16.msra.mxu0 %v191_v5 }
  0x13   :  { %175 = vmatprep.subr.bf16.mxu0 %v195_v0 }
  0x16   :  { %176 = vmatpush3.bf16.msra.mxu0 %v192_v6 }
  0x17   :  { %177 = vmatprep.subr.bf16.mxu0 %v195_v0 }
  0x1a   :  { %178 = vmatpush3.bf16.msra.mxu0 %v193_v7 }
  0x1b   :  { %179 = vmatprep.subr.bf16.mxu0 %v195_v0 }
  0x1e   :  { %180 = vmatpush3.bf16.msra.mxu0 %v194_v8 }
  0x21   :  { %182 = vmatmul.mubr.bf16.vlgmr.msra.gmra.mxu0 %v21_v9 }
  0xe1   :  { %v120_v11 = vpop.f32.mrf.mxu0 }
  0xe2   :  { %v139_v12 = vadd.f32 %v155_v10, %v120_v11 }
  0xe3   :  { %v183_v13 = vpop.f32.mrf.mxu0 }
  0xe4   :  { %v140_v14 = vmax.f32 %v139_v12, 0.0 }
  0xe5   :  { %v123_v15 = vpop.f32.mrf.mxu0 }
  0xe6   :  { %v141_v16 = vpack.c.bf16 %v140_v14, %v140_v14 }
  0xe7   :  { %v184_v17 = vpop.f32.mrf.mxu0 }
  0xe8   :  { %142 = vst [vmem:[%s253_s3] sm:$0xf] %v141_v16 }

// kernel: _lambda_.31
= control target key start
LH: loop header
LB: loop body
LE: loop exit
PB: predicated region body
PF: predicated region fallthrough
CT: control target
= control target key end

     0   :  { %s106_s0 = inlined_call_operand.vmem [shape: bf16[8,128], index: 0, kind: input, shape index: {}]   ;;  %s107_s1 = inlined_call_operand.vmem [shape: f32[1,128], index: 1, kind: input, shape index: {}]   ;;  %s108_s2 = inlined_call_operand.vmem [shape: f32[1,128], index: 2, kind: input, shape index: {}]   ;;  %s109_s3 = inlined_call_operand.hbm [shape: f32[8,128], index: 3, kind: output, shape index: {}]  }
   0x1   :  { %v15_v0 = vld [vmem:[%s106_s0] sm:$0xf] }
   0x2   :  { %v48_v1 = vld [vmem:[%s107_s1] ss:$0 sm:$0xff]  ;;  %v16_v2 = vunpack.c.l.bf16 %v15_v0 }
   0x3   :  { %8 = vsyncpa [#allocation3], 0  ;;  %v49_v3 = vld [vmem:[%s108_s2] ss:$0 sm:$0xff]  ;;  %s73_s18 = smov [#allocation2]  }
   0x4   :  { %s40_s19 = sshll.u32 %s73_s18, 4  ;;  %v24_v4 = vmul.f32 %v48_v1, %v16_v2  ;;  %s41_s19 = int_to_ptr.vmem [resolvable:$true] %s40_s19 }
   0x5   :  { %s51_s20 = scalar_lea.vmem %s41_s19, 128  ;;  %p56_p1 = scmp.lt.s32.totalorder %s41_s19, %s41_s19 }
   0x6   :  { %v32_v5 = vadd.f32 %v49_v3, %v24_v4  ;;  %p52_p0 = scmp.ne.s32.totalorder %s41_s19, %s51_s20  ;;  %p57_p2 = scmp.lt.s32.totalorder %s51_s20, %s51_s20 }
   0x8   :  { %33 = vst [vmem:[#allocation2] sm:$0xff] %v32_v5  ;;  %p58_p3 = por %p57_p2, %p56_p1 }
   0xa   :  { %p59_p4 = pnand %p58_p3, %p52_p0 }
   0xc   :  { %62 = shalt.err (!%p59_p4)
}
   0xd   :  { %43 = dma.vmem_to_hbm [thread:$0]  %s41_s19, 128, %s109_s3, [#allocation3]  }
   0xe   :  { %71 = dma.done.wait [#allocation3], 128  }
   0xf   :  { %72 = vsyncadd [#allocation3], 4294967168 }
  0x10   :  { %47 = vsyncpa [#allocation3], 1 }

// kernel: _lambda_.28
= control target key start
LH: loop header
LB: loop body
LE: loop exit
PB: predicated region body
PF: predicated region fallthrough
CT: control target
= control target key end

     0   :  { %s1755_s12 = smov 0   ;;  %s2040_s0 = inlined_call_operand.vmem [shape: bf16[2,80,128], index: 0, kind: input, shape index: {}]   ;;  %s2041_s1 = inlined_call_operand.vmem [shape: bf16[3,384,128], index: 1, kind: input, shape index: {}]   ;;  %s2042_s2 = inlined_call_operand.vmem [shape: f32[1,128], index: 2, kind: input, shape index: {}]   ;;  %s2043_s3 = inlined_call_operand.vmem [shape: bf16[2,32,128], index: 3, kind: output, shape index: {}]  }
   0x1 LB: > { %s1261_s13 = sadd.s32 4294967295, %s1733_s12   ;;  %p1265_p0 = scmp.ge.s32.totalorder %s1733_s12, 1  ;;  %s1733_s12 = sphi %s1755_s12, %s13_s12  }
   0x2   : > { %p137_p1 = scmp.lt.s32.totalorder %s1733_s12, 3 }
   0x4   : > { %p138_p2 = pnand %p1265_p0, %p137_p1 }
   0x5   : > { %p161_p3 = scmp.lt.s32.totalorder (!%p138_p2), %s1261_s13, 1 }
   0x6   : > { %141 = sbr.rel (%p138_p2) target bundleno = 328 (0x148), region = 32 }
   0xb   : > { %v1649_v0 = vld [vmem:[%s2041_s1 + $0x78] sm:$0xff]   ;;  %v1652_v3 = vld [vmem:[%s2041_s1 + $0x70] sm:$0xff]   ;;  %v1655_v6 = vld [vmem:[%s2041_s1 + $0x68] sm:$0xff]   ;;  %s2045_s13 = smov (!%p161_p3, %s1261_s13), 1  ;;  %vm253_vm0 = vcmask 1046528  }
   0xc   : > { %v1650_v1 = vld [vmem:[%s2041_s1 + $0x38] sm:$0xff]   ;;  %1466 = vmatprep.subr.bf16.mxu0 %v1649_v0  ;;  %v1653_v4 = vld [vmem:[%s2041_s1 + $0x30] sm:$0xff]   ;;  %v1656_v7 = vld [vmem:[%s2041_s1 + $0x28] sm:$0xff]   ;;  %s1640_s21 = smul.u32 40, %s2045_s13  ;;  %vm209_vm1 = vsmask.f32 7424 }
   0xd   : > { %v1651_v2 = vld [vmem:[%s2041_s1 + $0xb8] sm:$0xff]   ;;  %1467 = vmatpush3.bf16.msra.mxu0 %v1650_v1  ;;  %v1654_v5 = vld [vmem:[%s2041_s1 + $0xb0] sm:$0xff]   ;;  %v1657_v8 = vld [vmem:[%s2041_s1 + $0xa8] sm:$0xff]   ;;  %s1450_s17 = sshll.u32 %s2045_s13, 4 }
   0xe   : > { %1580 = vmatprep.subr.bf16.mxu1 %v1651_v2  ;;  %1468 = vmatprep.subr.bf16.mxu0 %v1652_v3  ;;  %v1658_v9 = vld [vmem:[%s2041_s1 + $0x60] sm:$0xff]   ;;  %v1661_v12 = vld [vmem:[%s2041_s1 + $0x58] sm:$0xff]   ;;  %v1664_v15 = vld [vmem:[%s2041_s1 + $0x50] sm:$0xff]   ;;  %s1833_s5 = scalar_lea.vmem %s2040_s0, %s1640_s21  ;;  %s170_s20 = scalar_lea.vmem %s2043_s3, %s1450_s17 }
   0xf   : > { %1581 = vmatpush3.bf16.msra.mxu1 %v1651_v2  ;;  %v1659_v10 = vld [vmem:[%s2041_s1 + $0x20] sm:$0xff]   ;;  %v1663_v13 = vld [vmem:[%s2041_s1 + $0x98] sm:$0xff]   ;;  %v1666_v16 = vld [vmem:[%s2041_s1 + $0x90] sm:$0xff]  }
  0x10   : > { %1582 = vmatprep.subr.bf16.mxu1 %v1654_v5  ;;  %v1660_v11 = vld [vmem:[%s2041_s1 + $0xa0] sm:$0xff]   ;;  %v1662_v14 = vld [vmem:[%s2041_s1 + $0x18] sm:$0xff]   ;;  %v1665_v17 = vld [vmem:[%s2041_s1 + $0x10] sm:$0xff]  }
  0x11   : > { %1469 = vmatpush3.bf16.msra.mxu0 %v1653_v4  ;;  %v1667_v18 = vld [vmem:[%s2041_s1 + $0x48] sm:$0xff]   ;;  %v1670_v21 = vld [vmem:[%s2041_s1 + $0x40] sm:$0xff]   ;;  %v1675_v32 = vld [vmem:[%s2041_s1 + $0x138] sm:$0xff]  }
  0x12   : > { %1470 = vmatprep.subr.bf16.mxu0 %v1655_v6  ;;  %v1668_v19 = vld [vmem:[%s2041_s1 + $0x8] sm:$0xff]   ;;  %v172_v22 = vld [vmem:[%s1833_s5] sm:$0xf]  ;;  %v173_v23 = vld [vmem:[%s1833_s5 + $0x4] sm:$0xf] }
  0x13   : > { %1583 = vmatpush3.bf16.msra.mxu1 %v1654_v5  ;;  %v1669_v20 = vld [vmem:[%s2041_s1 + $0x88] sm:$0xff]   ;;  %v1671_v24 = vld [vmem:[%s2041_s1] sm:$0xff]   ;;  %v1269_v26 = vcombine.low %v172_v22, %v173_v23  ;;  %v1859_v35 = vld [vmem:[%s1833_s5 + $0x10] sm:$0xff]  }
  0x14   : > { %1584 = vmatprep.subr.bf16.mxu1 %v1657_v8  ;;  %v1672_v25 = vld [vmem:[%s2041_s1 + $0x80] sm:$0xff]   ;;  %v1850_v27 = vld [vmem:[%s1833_s5 + $0x8] sm:$0xff]   ;;  %v257_v39 = vrot.slane %v1859_v35, 1  ;;  %v1679_v40 = vld [vmem:[%s2041_s1 + $0x178] sm:$0xff]   ;;  %v226_v48 = vshll.u32 %v1859_v35, 16 }
  0x15   : > { %1471 = vmatpush3.bf16.msra.mxu0 %v1656_v7  ;;  %v181_v28 = vld [vmem:[%s1833_s5] sm:$0xe]  ;;  %v211_v29 = vshrl.u32 %v1269_v26, 16  ;;  %v213_v30 = vshll.u32 %v1269_v26, 16  ;;  %v218_v31 = vshll.u32 %v1850_v27, 16  ;;  %v255_v34 = vrot.slane %v1850_v27, 1 }
  0x16   : > { %1472 = vmatprep.subr.bf16.mxu0 %v1658_v9  ;;  %v1274_v33 = vcombine.low %v181_v28, %v173_v23  ;;  %v1677_v43 = vld [vmem:[%s2041_s1 + $0xf8] sm:$0xff]   ;;  %v222_v44 = vshrl.u32 %v1850_v27, 16  ;;  %v1680_v47 = vld [vmem:[%s2041_s1 + $0x130] sm:$0xff]   ;;  %v228_v51 = vrot.slane %v226_v48, 1  ;;  %v1683_v54 = vld [vmem:[%s2041_s1 + $0x128] sm:$0xff]  }
  0x17   : > { %1585 = vmatpush3.bf16.msra.mxu1 %v1657_v8  ;;  %v215_v36 = vrot.slane %v213_v30, 1  ;;  %v220_v37 = vrot.slane %v218_v31, 1  ;;  %v258_v46 = vsel %vm253_vm0, %v255_v34, %v257_v39  ;;  %v1682_v49 = vld [vmem:[%s2041_s1 + $0x170] sm:$0xff]   ;;  %v1685_v55 = vld [vmem:[%s2041_s1 + $0x168] sm:$0xff]   ;;  %v1686_v57 = vld [vmem:[%s2041_s1 + $0x120] sm:$0xff]   ;;  %v230_v8 = vshrl.u32 %v1859_v35, 16 }
  0x18   : > { %1586 = vmatprep.subr.bf16.mxu1 %v1660_v11  ;;  %v254_v38 = vrot.slane %v1274_v33, 1  ;;  %v1681_v52 = vld [vmem:[%s2041_s1 + $0xf0] sm:$0xff]   ;;  %v1684_v56 = vld [vmem:[%s2041_s1 + $0xe8] sm:$0xff]   ;;  %v1688_v58 = vld [vmem:[%s2041_s1 + $0x160] sm:$0xff]  }
  0x19   : > { %1473 = vmatpush3.bf16.msra.mxu0 %v1659_v10  ;;  %v216_v41 = vor.u32 %v215_v36, %v211_v29  ;;  %v224_v50 = vor.u32 %v222_v44, %v220_v37  ;;  %v1687_v59 = vld [vmem:[%s2041_s1 + $0xe0] sm:$0xff]   ;;  %v1689_v60 = vld [vmem:[%s2041_s1 + $0x118] sm:$0xff]   ;;  %v1692_v63 = vld [vmem:[%s2041_s1 + $0x110] sm:$0xff]  }
  0x1a   : > { %1474 = vmatprep.subr.bf16.mxu0 %v1661_v12  ;;  %v256_v42 = vsel %vm253_vm0, %v254_v38, %v255_v34  ;;  %v1691_v61 = vld [vmem:[%s2041_s1 + $0x158] sm:$0xff]   ;;  %v1694_v0 = vld [vmem:[%s2041_s1 + $0x150] sm:$0xff]   ;;  %v1695_v2 = vld [vmem:[%s2041_s1 + $0x108] sm:$0xff]  }
  0x1b   : > { %1587 = vmatpush3.bf16.msra.mxu1 %v1660_v11  ;;  %1596 = vmatprep.mubr.bf16.mxu1 %v256_v42  ;;  %v221_v45 = vsel %vm209_vm1, %v216_v41, %v220_v37  ;;  %v229_v53 = vsel %vm209_vm1, %v224_v50, %v228_v51  ;;  %v1690_v62 = vld [vmem:[%s2041_s1 + $0xd8] sm:$0xff]   ;;  %v1693_v1 = vld [vmem:[%s2041_s1 + $0xd0] sm:$0xff]   ;;  %v1697_v3 = vld [vmem:[%s2041_s1 + $0x148] sm:$0xff]  }
  0x1c   : > { %1588 = vmatprep.subr.bf16.mxu1 %v1663_v13  ;;  %491 = vmatprep.mubr.bf16.mxu0 %v221_v45  ;;  %v1696_v4 = vld [vmem:[%s2041_s1 + $0xc8] sm:$0xff]   ;;  %v1698_v5 = vld [vmem:[%s2041_s1 + $0x100] sm:$0xff]   ;;  %v1935_v6 = vld [vmem:[%s1833_s5 + $0x18] sm:$0xff]  }
  0x1d   : > { %1475 = vmatpush3.bf16.msra.mxu0 %v1662_v14  ;;  %v1700_v7 = vld [vmem:[%s2041_s1 + $0x140] sm:$0xff]   ;;  %v234_v9 = vshll.u32 %v1935_v6, 16  ;;  %v1701_v11 = vld [vmem:[%s2041_s1 + $0x1f8] sm:$0xff]   ;;  %v259_v12 = vrot.slane %v1935_v6, 1  ;;  %v232_v14 = vor.u32 %v230_v8, %v228_v51  ;;  %v1708_v22 = vld [vmem:[%s2041_s1 + $0x1e8] sm:$0xff]  }
  0x1e   : > { %1476 = vmatprep.subr.bf16.mxu0 %v1664_v15  ;;  %v1699_v10 = vld [vmem:[%s2041_s1 + $0xc0] sm:$0xff]   ;;  %v1710_v23 = vld [vmem:[%s2041_s1 + $0x228] sm:$0xff]   ;;  %v1714_v29 = vld [vmem:[%s2041_s1 + $0x1d8] sm:$0xff]  }
  0x1f   : > { %1589 = vmatpush3.bf16.msra.mxu1 %v1663_v13  ;;  %v1704_v13 = vld [vmem:[%s2041_s1 + $0x238] sm:$0xff]   ;;  %v236_v15 = vrot.slane %v234_v9, 1  ;;  %v1712_v28 = vld [vmem:[%s2041_s1 + $0x1a0] sm:$0xff]   ;;  %v1717_v37 = vld [vmem:[%s2041_s1 + $0x1d0] sm:$0xff]  }
  0x20   : > { %1590 = vmatprep.subr.bf16.mxu1 %v1666_v16  ;;  %v1726_v30 = vld [vmem:[%s1833_s5 + $0x20] ss:$0 sps:$4 sm:$0x11]   ;;  %v1716_v31 = vld [vmem:[%s2041_s1 + $0x218] sm:$0xff]   ;;  %v1718_v42 = vld [vmem:[%s2041_s1 + $0x190] sm:$0xff]  }
  0x21   : > { %1477 = vmatpush3.bf16.msra.mxu0 %v1665_v17  ;;  %v260_v17 = vsel %vm253_vm0, %v257_v39, %v259_v12  ;;  %v242_v34 = vshll.u32 %v1726_v30, 16  ;;  %v1715_v36 = vld [vmem:[%s2041_s1 + $0x198] sm:$0xff]   ;;  %v1722_v44 = vld [vmem:[%s2041_s1 + $0x208] sm:$0xff]   ;;  %v1724_v48 = vld [vmem:[%s2041_s1 + $0x180] sm:$0xff]  }
  0x22   : > { %1478 = vmatprep.subr.bf16.mxu0 %v1667_v18  ;;  %v1705_v18 = vld [vmem:[%s2041_s1 + $0x1f0] sm:$0xff]   ;;  %v1721_v45 = vld [vmem:[%s2041_s1 + $0x188] sm:$0xff]  }
  0x23   : > { %1591 = vmatpush3.bf16.msra.mxu1 %v1666_v16  ;;  %v1702_v16 = vld [vmem:[%s2041_s1 + $0x1b8] sm:$0xff]   ;;  %v244_v39 = vrot.slane %v242_v34, 1 }
  0x24   : > { %1592 = vmatprep.subr.bf16.mxu1 %v1669_v20 }
  0x25   : > { %1479 = vmatpush3.bf16.msra.mxu0 %v1668_v19  ;;  %v1707_v19 = vld [vmem:[%s2041_s1 + $0x230] sm:$0xff]  }
  0x26   : > { %1480 = vmatprep.subr.bf16.mxu0 %v1670_v21  ;;  %v1706_v21 = vld [vmem:[%s2041_s1 + $0x1b0] sm:$0xff]  }
  0x27   : > { %1593 = vmatpush3.bf16.msra.mxu1 %v1669_v20  ;;  %v237_v20 = vsel %vm209_vm1, %v232_v14, %v236_v15 }
  0x28   : > { %1594 = vmatprep.subr.bf16.mxu1 %v1672_v25 }
  0x29   : > { %1481 = vmatpush3.bf16.msra.mxu0 %v1671_v24  ;;  %v1709_v24 = vld [vmem:[%s2041_s1 + $0x1a8] sm:$0xff]  }
  0x2a   : > { %1504 = vmatprep.subr.bf16.mxu0 %v1675_v32  ;;  %v261_v32 = vrot.slane %v1726_v30, 1 }
  0x2b   : > { %1595 = vmatpush3.bf16.msra.mxu1 %v1672_v25  ;;  %v1711_v25 = vld [vmem:[%s2041_s1 + $0x1e0] sm:$0xff]  }
  0x2c   : > { %1600 = vmatprep.subr.bf16.mxu1 %v1679_v40  ;;  %492 = vmatmul.mubr.bf16.vlgmr.msra.gmra.mxu0 %v1269_v26  ;;  %v1713_v26 = vld [vmem:[%s2041_s1 + $0x220] sm:$0xff]   ;;  %v262_v38 = vsel %vm253_vm0, %v259_v12, %v261_v32 }
  0x2d   : > { %1505 = vmatpush3.bf16.msra.mxu0 %v1677_v43  ;;  %499 = vmatprep.mubr.bf16.mxu0 %v229_v53  ;;  %v1720_v43 = vld [vmem:[%s2041_s1 + $0x1c8] sm:$0xff]  }
  0x2e   : > { %1597 = vmatmul.mubr.bf16.vlgmr.msra.gmra.mxu1 %v258_v46  ;;  %1506 = vmatprep.subr.bf16.mxu0 %v1680_v47  ;;  %v1725_v47 = vld [vmem:[%s2041_s1 + $0x200] sm:$0xff]  }
  0x2f   : > { %1601 = vmatpush3.bf16.msra.mxu1 %v1679_v40  ;;  %1616 = vmatprep.mubr.bf16.mxu1 %v258_v46  ;;  %v1719_v40 = vld [vmem:[%s2041_s1 + $0x210] sm:$0xff]   ;;  %v1723_v46 = vld [vmem:[%s2041_s1 + $0x1c0] sm:$0xff]  }
  0x30   : > { %1602 = vmatprep.subr.bf16.mxu1 %v1682_v49 }
  0x31   : > { %1507 = vmatpush3.bf16.msra.mxu0 %v1681_v52 }
  0x32   : > { %1508 = vmatprep.subr.bf16.mxu0 %v1683_v54 }
  0x33   : > { %1603 = vmatpush3.bf16.msra.mxu1 %v1682_v49 }
  0x34   : > { %1604 = vmatprep.subr.bf16.mxu1 %v1685_v55  ;;  %500 = vmatmul.mubr.bf16.gmra.mxu0 %v1850_v27 }
  0x35   : > { %1509 = vmatpush3.bf16.msra.mxu0 %v1684_v56  ;;  %786 = vmatprep.mubr.bf16.mxu0 %v229_v53 }
  0x36   : > { %1510 = vmatprep.subr.bf16.mxu0 %v1686_v57 }
  0x37   : > { %1605 = vmatpush3.bf16.msra.mxu1 %v1685_v55 }
  0x38   : > { %1606 = vmatprep.subr.bf16.mxu1 %v1688_v58 }
  0x39   : > { %1511 = vmatpush3.bf16.msra.mxu0 %v1687_v59 }
  0x3a   : > { %1512 = vmatprep.subr.bf16.mxu0 %v1689_v60 }
  0x3b   : > { %1607 = vmatpush3.bf16.msra.mxu1 %v1688_v58 }
  0x3c   : > { %1608 = vmatprep.subr.bf16.mxu1 %v1691_v61 }
  0x3d   : > { %1513 = vmatpush3.bf16.msra.mxu0 %v1690_v62 }
  0x3e   : > { %1514 = vmatprep.subr.bf16.mxu0 %v1692_v63 }
  0x3f   : > { %1609 = vmatpush3.bf16.msra.mxu1 %v1691_v61 }
  0x40   : > { %1610 = vmatprep.subr.bf16.mxu1 %v1694_v0 }
  0x41   : > { %1515 = vmatpush3.bf16.msra.mxu0 %v1693_v1 }
  0x42   : > { %1516 = vmatprep.subr.bf16.mxu0 %v1695_v2 }
  0x43   : > { %1611 = vmatpush3.bf16.msra.mxu1 %v1694_v0 }
  0x44   : > { %1612 = vmatprep.subr.bf16.mxu1 %v1697_v3 }
  0x45   : > { %1517 = vmatpush3.bf16.msra.mxu0 %v1696_v4 }
  0x46   : > { %1518 = vmatprep.subr.bf16.mxu0 %v1698_v5 }
  0x47   : > { %1613 = vmatpush3.bf16.msra.mxu1 %v1697_v3 }
  0x48   : > { %1614 = vmatprep.subr.bf16.mxu1 %v1700_v7 }
  0x49   : > { %1519 = vmatpush3.bf16.msra.mxu0 %v1699_v10 }
  0x4a   : > { %1542 = vmatprep.subr.bf16.mxu0 %v1701_v11 }
  0x4b   : > { %1615 = vmatpush3.bf16.msra.mxu1 %v1700_v7 }
  0x4c   : > { %1620 = vmatprep.subr.bf16.mxu1 %v1704_v13  ;;  %787 = vmatmul.mubr.bf16.vlgmr.msra.gmra.mxu0 %v1850_v27  ;;  %v238_v27 = vshrl.u32 %v1935_v6, 16 }
  0x4d   : > { %1543 = vmatpush3.bf16.msra.mxu0 %v1702_v16  ;;  %794 = vmatprep.mubr.bf16.mxu0 %v237_v20 }
  0x4e   : > { %1617 = vmatmul.mubr.bf16.vlgmr.msra.gmra.mxu1 %v260_v17  ;;  %1544 = vmatprep.subr.bf16.mxu0 %v1705_v18  ;;  %v240_v33 = vor.u32 %v238_v27, %v236_v15 }
  0x4f   : > { %1621 = vmatpush3.bf16.msra.mxu1 %v1704_v13  ;;  %1636 = vmatprep.mubr.bf16.mxu1 %v260_v17 }
  0x50   : > { %1622 = vmatprep.subr.bf16.mxu1 %v1707_v19  ;;  %v245_v41 = vsel %vm209_vm1, %v240_v33, %v244_v39 }
  0x51   : > { %1545 = vmatpush3.bf16.msra.mxu0 %v1706_v21 }
  0x52   : > { %1546 = vmatprep.subr.bf16.mxu0 %v1708_v22 }
  0x53   : > { %1623 = vmatpush3.bf16.msra.mxu1 %v1707_v19 }
  0x54   : > { %1624 = vmatprep.subr.bf16.mxu1 %v1710_v23  ;;  %795 = vmatmul.mubr.bf16.gmra.mxu0 %v1859_v35 }
  0x55   : > { %1547 = vmatpush3.bf16.msra.mxu0 %v1709_v24  ;;  %1089 = vmatprep.mubr.bf16.mxu0 %v237_v20 }
  0x56   : > { %1548 = vmatprep.subr.bf16.mxu0 %v1711_v25 }
  0x57   : > { %1625 = vmatpush3.bf16.msra.mxu1 %v1710_v23 }
  0x58   : > { %1626 = vmatprep.subr.bf16.mxu1 %v1713_v26 }
  0x59   : > { %1549 = vmatpush3.bf16.msra.mxu0 %v1712_v28 }
  0x5a   : > { %1550 = vmatprep.subr.bf16.mxu0 %v1714_v29 }
  0x5b   : > { %1627 = vmatpush3.bf16.msra.mxu1 %v1713_v26 }
  0x5c   : > { %1628 = vmatprep.subr.bf16.mxu1 %v1716_v31 }
  0x5d   : > { %1551 = vmatpush3.bf16.msra.mxu0 %v1715_v36 }
  0x5e   : > { %1552 = vmatprep.subr.bf16.mxu0 %v1717_v37 }
  0x5f   : > { %1629 = vmatpush3.bf16.msra.mxu1 %v1716_v31  ;;  %v1443_v31 = vld [vmem:[%s2042_s2] ss:$0 sm:$0xff] }
  0x60   : > { %1630 = vmatprep.subr.bf16.mxu1 %v1719_v40 }
  0x61   : > { %1553 = vmatpush3.bf16.msra.mxu0 %v1718_v42 }
  0x62   : > { %1554 = vmatprep.subr.bf16.mxu0 %v1720_v43 }
  0x63   : > { %1631 = vmatpush3.bf16.msra.mxu1 %v1719_v40 }
  0x64   : > { %1632 = vmatprep.subr.bf16.mxu1 %v1722_v44 }
  0x65   : > { %1555 = vmatpush3.bf16.msra.mxu0 %v1721_v45 }
  0x66   : > { %1556 = vmatprep.subr.bf16.mxu0 %v1723_v46 }
  0x67   : > { %1633 = vmatpush3.bf16.msra.mxu1 %v1722_v44 }
  0x68   : > { %1634 = vmatprep.subr.bf16.mxu1 %v1725_v47 }
  0x69   : > { %1557 = vmatpush3.bf16.msra.mxu0 %v1724_v48 }
  0x6b   : > { %1635 = vmatpush3.bf16.msra.mxu1 %v1725_v47 }
  0x6c   : > { %1090 = vmatmul.mubr.bf16.vlgmr.msra.gmra.mxu0 %v1859_v35 }
  0x6d   : > { %1097 = vmatprep.mubr.bf16.mxu0 %v245_v41 }
  0x6e   : > { %1637 = vmatmul.mubr.bf16.vlgmr.msra.gmra.mxu1 %v262_v38 }
  0x74   : > { %1098 = vmatmul.mubr.bf16.gmra.mxu0 %v1935_v6 }
  0xec   : > { %v1482_v49 = vpop.f32.mrf.mxu0 }
  0xee   : > { %v1483_v50 = vpop.f32.mrf.mxu0  ;;  %v1598_v58 = vpop.f32.mrf.mxu1 }
  0xef   : > { %v1484_v8 = vadd.f32 %v1483_v50, %v1482_v49 }
  0xf0   : > { %v1485_v51 = vpop.f32.mrf.mxu0  ;;  %v542_v60 = vpop.f32.mrf.mxu1 }
  0xf1   : > { %v543_v15 = vadd.f32 %v1484_v8, %v542_v60 }
  0xf2   : > { %v1486_v52 = vpop.f32.mrf.mxu0  ;;  %v1599_v62 = vpop.f32.mrf.mxu1 }
  0xf3   : > { %v1487_v16 = vadd.f32 %v1486_v52, %v1485_v51 }
  0xf4   : > { %v1488_v53 = vpop.f32.mrf.mxu0  ;;  %v545_v35 = vpop.f32.mrf.mxu1 }
  0xf5   : > { %v546_v26 = vadd.f32 %v1487_v16, %v545_v35 }
  0xf6   : > { %v1489_v54 = vpop.f32.mrf.mxu0 }
  0xf7   : > { %v1490_v27 = vadd.f32 %v1489_v54, %v1488_v53 }
  0xf8   : > { %v1491_v55 = vpop.f32.mrf.mxu0 }
  0xf9   : > { %v551_v40 = vadd.f32 %v1598_v58, %v1490_v27 }
  0xfa   : > { %v1492_v56 = vpop.f32.mrf.mxu0 }
  0xfb   : > { %v1493_v38 = vadd.f32 %v1492_v56, %v1491_v55 }
  0xfd   : > { %v554_v49 = vadd.f32 %v1599_v62, %v1493_v38 }
 0x10c   : > { %v1520_v57 = vpop.f32.mrf.mxu0 }
 0x10e   : > { %v1521_v59 = vpop.f32.mrf.mxu0  ;;  %v1618_v1 = vpop.f32.mrf.mxu1 }
 0x10f   : > { %v1522_v6 = vadd.f32 %v1521_v59, %v1520_v57 }
 0x110   : > { %v1523_v61 = vpop.f32.mrf.mxu0  ;;  %v837_v3 = vpop.f32.mrf.mxu1 }
 0x111   : > { %v838_v11 = vadd.f32 %v1522_v6, %v837_v3 }
 0x112   : > { %v1524_v63 = vpop.f32.mrf.mxu0  ;;  %v1619_v5 = vpop.f32.mrf.mxu1 }
 0x113   : > { %v1525_v12 = vadd.f32 %v1524_v63, %v1523_v61  ;;  %v856_v20 = vadd.f32 %v838_v11, %v543_v15 }
 0x114   : > { %v1526_v0 = vpop.f32.mrf.mxu0  ;;  %v840_v9 = vpop.f32.mrf.mxu1 }
 0x115   : > { %v841_v21 = vadd.f32 %v1525_v12, %v840_v9 }
 0x116   : > { %v1527_v2 = vpop.f32.mrf.mxu0 }
 0x117   : > { %v1528_v22 = vadd.f32 %v1527_v2, %v1526_v0  ;;  %v857_v33 = vadd.f32 %v841_v21, %v546_v26 }
 0x118   : > { %v1529_v4 = vpop.f32.mrf.mxu0 }
 0x119   : > { %v846_v34 = vadd.f32 %v1618_v1, %v1528_v22 }
 0x11a   : > { %v1530_v7 = vpop.f32.mrf.mxu0 }
 0x11b   : > { %v1531_v36 = vadd.f32 %v1530_v7, %v1529_v4  ;;  %v858_v45 = vadd.f32 %v846_v34, %v551_v40 }
 0x11d   : > { %v849_v46 = vadd.f32 %v1619_v5, %v1531_v36 }
 0x11f   : > { %v859_v55 = vadd.f32 %v849_v46, %v554_v49 }
 0x12c   : > { %v1558_v10 = vpop.f32.mrf.mxu0 }
 0x12e   : > { %v1638_v13 = vpop.f32.mrf.mxu1  ;;  %v1559_v14 = vpop.f32.mrf.mxu0 }
 0x12f   : > { %v1560_v17 = vadd.f32 %v1559_v14, %v1558_v10 }
 0x130   : > { %v1140_v18 = vpop.f32.mrf.mxu1  ;;  %v1561_v19 = vpop.f32.mrf.mxu0 }
 0x131   : > { %v1141_v23 = vadd.f32 %v1560_v17, %v1140_v18 }
 0x132   : > { %v1639_v24 = vpop.f32.mrf.mxu1  ;;  %v1562_v25 = vpop.f32.mrf.mxu0 }
 0x133   : > { %v1159_v28 = vadd.f32 %v1141_v23, %v856_v20  ;;  %v1563_v29 = vadd.f32 %v1562_v25, %v1561_v19 }
 0x134   : > { %v1143_v30 = vpop.f32.mrf.mxu1  ;;  %v1564_v32 = vpop.f32.mrf.mxu0 }
 0x135   : > { %v1144_v37 = vadd.f32 %v1563_v29, %v1143_v30  ;;  %v1178_v41 = vadd.f32 %v1443_v31, %v1159_v28 }
 0x136   : > { %v1565_v39 = vpop.f32.mrf.mxu0 }
 0x137   : > { %v1160_v42 = vadd.f32 %v1144_v37, %v857_v33  ;;  %v1566_v43 = vadd.f32 %v1565_v39, %v1564_v32  ;;  %v1182_v51 = vmax.f32 %v1178_v41, 0.0 }
 0x138   : > { %v1567_v44 = vpop.f32.mrf.mxu0 }
 0x139   : > { %v1179_v47 = vadd.f32 %v1443_v31, %v1160_v42  ;;  %v1149_v48 = vadd.f32 %v1638_v13, %v1566_v43 }
 0x13a   : > { %v1568_v50 = vpop.f32.mrf.mxu0 }
 0x13b   : > { %v1183_v52 = vmax.f32 %v1179_v47, 0.0  ;;  %v1161_v53 = vadd.f32 %v1149_v48, %v858_v45  ;;  %v1569_v54 = vadd.f32 %v1568_v50, %v1567_v44 }
 0x13d   : > { %v1458_v56 = vpack.c.bf16 %v1183_v52, %v1182_v51  ;;  %v1152_v57 = vadd.f32 %v1639_v24, %v1569_v54  ;;  %v1180_v58 = vadd.f32 %v1443_v31, %v1161_v53 }
 0x13f   : > { %1459 = vst [vmem:[%s170_s20] sm:$0xff] %v1458_v56   ;;  %v1162_v59 = vadd.f32 %v1152_v57, %v859_v55  ;;  %v1184_v61 = vmax.f32 %v1180_v58, 0.0 }
 0x141   : > { %v1181_v60 = vadd.f32 %v1443_v31, %v1162_v59 }
 0x143   : > { %v1185_v63 = vmax.f32 %v1181_v60, 0.0 }
 0x145   : > { %v1463_v35 = vpack.c.bf16 %v1185_v63, %v1184_v61 }
 0x147   : > { %1465 = vst [vmem:[%s170_s20 + $0x8] sm:$0xff] %v1463_v35  }
 0x148 PF: > { %s13_s12 = sadd.s32 1, %s1733_s12  }
 0x149   : > { %p10_p4 = scmp.ge.s32.totalorder %s13_s12, 4  }
 0x14b   :  { %12 = sbr.rel (!%p10_p4) target bundleno = 1 (0x1), region = 64 }

</bundles_post_ra>
